<compile_context>
chip_gen: v5e
topology: v5e:2x2
jax: 0.10.0
libtpu: 0.0.40
codegen_flags: <defaults>
</compile_context>

<pallas_src>
import functools

import jax
import jax.numpy as jnp
from jax.experimental import pallas as pl
from jax.experimental.pallas import tpu as pltpu

KW = 4            # conv kernel size
PAD = 2           # ceil((KW - 1) / 2)
LRELU_SLOPE = 0.2
BN_EPS = 1e-5
VMEM_LIMIT_BYTES = 48 * 1024 * 1024   # < v7x 64 MiB physical, >> actual footprint
TARGET_M_ROWS = 512                   # rows per MXU matmul after row blocking


def _round_up(x, m):
    return ((x + m - 1) // m) * m


def _cdiv(a, b):
    return -(-a // b)


# ----------------------------------------------------------------------------
# Conv kernel: tap-decomposed, row-blocked matmul (+ bias/act or BN partials)
# ----------------------------------------------------------------------------
def _conv_tap_kernel(r_ref, w_ref, *rest, n_shifts, bm, wo, wo_pad,
                     use_bias, use_bn, use_lrelu, use_sigmoid):
    if use_bias:
        b_ref = rest[0]
        rest = rest[1:]
    if use_bn:
        z_ref, ssum_ref, ssq_ref, acc_ref = rest
    else:
        z_ref, acc_ref = rest

    t = pl.program_id(1)
    n_taps = pl.num_programs(1)
    cin_pad = r_ref.shape[-1]
    cout_pad = acc_ref.shape[-1]

    @pl.when(t == 0)
    def _():
        acc_ref[...] = jnp.zeros_like(acc_ref)

    x = r_ref[0]                                      # (bm, wkp, cin_pad)
    acc = acc_ref[...]                                # (bm*wo_pad, cout_pad) f32
    for s_idx in range(n_shifts):                     # static unroll: 4//stride dots
        lhs = x[:, s_idx:s_idx + wo_pad, :].reshape(bm * wo_pad, cin_pad)
        w = w_ref[t * n_shifts + s_idx]               # (cin_pad, cout_pad), VMEM resident
        acc = acc + jnp.dot(lhs, w, preferred_element_type=jnp.float32)
    acc_ref[...] = acc

    @pl.when(t == n_taps - 1)
    def _():
        y = acc
        if use_bias:
            y = y + b_ref[...]
        if use_bn:
            # Mask the wo..wo_pad junk columns out of the BN partial statistics.
            row = jax.lax.broadcasted_iota(jnp.int32, (bm * wo_pad, 1), 0)
            yv = jnp.where((row % wo_pad) < wo, y, 0.0)
            ssum_ref[...] = jnp.sum(yv, axis=0, keepdims=True).reshape(1, 1, cout_pad)
            ssq_ref[...] = jnp.sum(yv * yv, axis=0, keepdims=True).reshape(1, 1, cout_pad)
        else:
            if use_lrelu:
                y = jnp.where(y >= 0, y, LRELU_SLOPE * y)
            if use_sigmoid:
                y = jax.nn.sigmoid(y)
        z_ref[...] = y.reshape(bm, wo_pad, cout_pad).astype(z_ref.dtype)


def conv_tap_pass(R, Wr, bias2d, *, bm, wo, wo_pad, n_shifts,
                  use_bias, use_bn, use_lrelu, use_sigmoid, out_dtype):
    T, mr_pad, wkp, cin_pad = R.shape
    cout_pad = Wr.shape[-1]
    nblocks = mr_pad // bm

    kernel = functools.partial(
        _conv_tap_kernel, n_shifts=n_shifts, bm=bm, wo=wo, wo_pad=wo_pad,
        use_bias=use_bias, use_bn=use_bn, use_lrelu=use_lrelu,
        use_sigmoid=use_sigmoid)

    in_specs = [
        # One (bm, wkp, cin_pad) activation slab per (row-block, tap) grid point.
        pl.BlockSpec((1, bm, wkp, cin_pad), lambda m, t: (t, m, 0, 0)),
        # All 16 tap weights; constant index_map -> fetched once, VMEM resident.
        pl.BlockSpec((KW * KW, cin_pad, cout_pad), lambda m, t: (0, 0, 0)),
    ]
    args = [R, Wr]
    if use_bias:
        in_specs.append(pl.BlockSpec((1, cout_pad), lambda m, t: (0, 0)))
        args.append(bias2d)

    out_shape = [jax.ShapeDtypeStruct((mr_pad, wo_pad, cout_pad), out_dtype)]
    out_specs = [pl.BlockSpec((bm, wo_pad, cout_pad), lambda m, t: (m, 0, 0))]
    if use_bn:
        out_shape += [jax.ShapeDtypeStruct((nblocks, 1, cout_pad), jnp.float32),
                      jax.ShapeDtypeStruct((nblocks, 1, cout_pad), jnp.float32)]
        out_specs += [pl.BlockSpec((1, 1, cout_pad), lambda m, t: (m, 0, 0)),
                      pl.BlockSpec((1, 1, cout_pad), lambda m, t: (m, 0, 0))]

    flops = 2 * mr_pad * wo_pad * (KW * KW) * cin_pad * cout_pad
    bytes_accessed = (R.size * R.dtype.itemsize + Wr.size * Wr.dtype.itemsize
                      + mr_pad * wo_pad * cout_pad * jnp.dtype(out_dtype).itemsize)

    outs = pl.pallas_call(
        kernel,
        grid=(nblocks, T),
        in_specs=in_specs,
        out_specs=out_specs,
        out_shape=out_shape,
        scratch_shapes=[pltpu.VMEM((bm * wo_pad, cout_pad), jnp.float32)],
        compiler_params=pltpu.CompilerParams(
            # Row-block axis parallel (megacore shardable); tap axis is reduction.
            dimension_semantics=("parallel", "arbitrary"),
            vmem_limit_bytes=VMEM_LIMIT_BYTES),
        cost_estimate=pl.CostEstimate(
            flops=flops, transcendentals=0, bytes_accessed=bytes_accessed),
    )(*args)

    if use_bn:
        return outs[0], outs[1], outs[2]
    return outs[0], None, None


# ----------------------------------------------------------------------------
# Glue: tap/phase stack construction (no im2col), weights, params, forward
# ----------------------------------------------------------------------------
def build_tap_stack(y_nhwc, stride, cin_pad, mr_pad, wo_pad, Ho, Wo, dtype):
    """R[di*stride+p, n*Ho+ho, col, c] = x_pad[n, stride*ho+di, p+stride*col, c]."""
    N, H, W, C = y_nhwc.shape
    n_shifts = KW // stride
    wkp = wo_pad + n_shifts - 1
    mr = N * Ho
    x = jnp.pad(y_nhwc.astype(dtype),
                ((0, 0), (PAD, PAD), (PAD, PAD), (0, cin_pad - C)))
    slabs = []
    for di in range(KW):
        for p in range(stride):
            sl = x[:, di:di + stride * (Ho - 1) + 1:stride, p::stride, :]
            wcur = min(sl.shape[2], wkp)
            sl = sl[:, :, :wcur, :].reshape(mr, wcur, cin_pad)
            sl = jnp.pad(sl, ((0, mr_pad - mr), (0, wkp - wcur), (0, 0)))
            slabs.append(sl)
    return jnp.stack(slabs, axis=0), n_shifts


def build_tap_weights(w_oihw, stride, cin_pad, cout_pad, dtype):
    """(Cout, Cin, 4, 4) -> (16, Cin_pad, Cout_pad), ordered to match the kernel:
       flat index = (di*stride + p) * n_shifts + s_idx, with dj = p + stride*s_idx."""
    cout, cin = w_oihw.shape[0], w_oihw.shape[1]
    n_shifts = KW // stride
    wk = jnp.transpose(w_oihw, (2, 3, 1, 0))          # (di, dj, Cin, Cout)
    slabs = []
    for di in range(KW):
        for p in range(stride):
            for s_idx in range(n_shifts):
                slabs.append(wk[di, p + stride * s_idx])
    w16 = jnp.stack(slabs, axis=0)                    # (16, Cin, Cout)
    w16 = jnp.pad(w16, ((0, 0), (0, cin_pad - cin), (0, cout_pad - cout)))
    return w16.astype(dtype)


def init_params(key, inc, onc=64, nlayers=3):
    """Deterministic synthetic init mirroring the torch module's layer shapes."""
    specs = []
    ci, co = inc, onc
    specs.append((ci, co, 2, False, True))            # layer 0: no norm
    for _ in range(nlayers - 1):
        ci, co = co, min(co * 2, 512)
        specs.append((ci, co, 2, True, True))
    ci, co = co, min(co * 2, 512)
    specs.append((ci, co, 1, True, True))
    specs.append((co, 1, 1, False, False))            # final 1-channel conv

    layers = []
    keys = jax.random.split(key, len(specs))
    for k, (ci, co, s, use_bn, use_lrelu) in zip(keys, specs):
        kw_, kb_, kg_, kbeta_ = jax.random.split(k, 4)
        w = 0.02 * jax.random.normal(kw_, (co, ci, 4, 4), jnp.float32)   # OIHW
        b = 0.1 * jax.random.normal(kb_, (co,), jnp.float32)
        g = 1.0 + 0.1 * jax.random.normal(kg_, (co,), jnp.float32)
        beta = 0.1 * jax.random.normal(kbeta_, (co,), jnp.float32)
        layers.append((w, b, g, beta, s, use_bn, use_lrelu))
    return layers


def nlayer_discriminator_forward(x_nchw, layers, use_sigmoid=False,
                                 compute_dtype=jnp.bfloat16):
    y = jnp.transpose(x_nchw, (0, 2, 3, 1))           # NCHW -> NHWC
    n_layers = len(layers)
    last_cout = None
    for i, (w, b, g, beta, stride, use_bn, use_lrelu) in enumerate(layers):
        cout = w.shape[0]
        N, H, Wsp, c_cur = y.shape
        cin_pad = _round_up(c_cur, 8)                 # == c_cur after layer 0 (kept padded)
        cout_pad = _round_up(cout, 128)               # lane-dense output (incl. Cout=1)

        Ho = (H + 2 * PAD - KW) // stride + 1
        Wo = (Wsp + 2 * PAD - KW) // stride + 1
        wo_pad = _round_up(Wo, 8)
        MR = N * Ho
        # Row blocking: ~TARGET_M_ROWS matmul rows per grid step; keep >= 2 row
        # blocks so both v7x TensorCores get balanced work.
        bm = max(1, _cdiv(TARGET_M_ROWS, wo_pad))
        bm = min(bm, max(1, _cdiv(MR, 2)))
        mr_pad = _round_up(MR, bm)

        R, n_shifts = build_tap_stack(y, stride, cin_pad, mr_pad, wo_pad, Ho, Wo,
                                      compute_dtype)
        Wr = build_tap_weights(w, stride, cin_pad, cout_pad, compute_dtype)
        bias2d = jnp.pad(b, (0, cout_pad - cout)).astype(jnp.float32).reshape(1, cout_pad)

        is_last = i == n_layers - 1
        z, ssum, ssq = conv_tap_pass(
            R, Wr, bias2d, bm=bm, wo=Wo, wo_pad=wo_pad, n_shifts=n_shifts,
            use_bias=not use_bn,                      # bias before BN is a no-op; dropped
            use_bn=use_bn,
            use_lrelu=(use_lrelu and not use_bn),
            use_sigmoid=(use_sigmoid and is_last),
            out_dtype=compute_dtype)

        zc = z[:MR, :Wo, :]                           # strip row/column padding
        if use_bn:
            cnt = jnp.float32(MR * Wo)                # = N * Ho * Wo
            mean = jnp.sum(ssum, axis=(0, 1)) / cnt
            var = jnp.maximum(jnp.sum(ssq, axis=(0, 1)) / cnt - mean * mean, 0.0)
            g_pad = jnp.pad(g, (0, cout_pad - cout)).astype(jnp.float32)
            beta_pad = jnp.pad(beta, (0, cout_pad - cout)).astype(jnp.float32)
            scale = g_pad * jax.lax.rsqrt(var + BN_EPS)
            shift = beta_pad - mean * scale
            # BN affine + LeakyReLU fused (by XLA) into the next layer's tap-stack
            # build; the separate elementwise Pallas pass is gone.
            yv = zc.astype(jnp.float32) * scale + shift
            yv = jnp.where(yv >= 0, yv, LRELU_SLOPE * yv).astype(compute_dtype)
        else:
            yv = zc                                   # activation applied in-kernel
        # Keep channels padded to cout_pad for the next layer (its weights are
        # zero-padded on cin) -> no per-layer slice + re-pad HBM copy.
        y = yv.reshape(N, Ho, Wo, cout_pad)
        last_cout = cout
    out = y[..., :last_cout]
    return jnp.transpose(out, (0, 3, 1, 2)).astype(jnp.float32)   # NHWC -> NCHW


# ----------------------------------------------------------------------------
# Pure-JAX reference (mirrors torch: conv+bias, training-mode BN, LReLU, sigmoid)
# ----------------------------------------------------------------------------
def reference_forward(x, layers, use_sigmoid=False):
    y = x
    for i, (w, b, g, beta, stride, use_bn, use_lrelu) in enumerate(layers):
        y = jax.lax.conv_general_dilated(
            y, w, (stride, stride), [(2, 2), (2, 2)],
            dimension_numbers=('NCHW', 'OIHW', 'NCHW'))
        y = y + b[None, :, None, None]
        if use_bn:
            mean = jnp.mean(y, axis=(0, 2, 3), keepdims=True)
            var = jnp.mean((y - mean) ** 2, axis=(0, 2, 3), keepdims=True)
            y = ((y - mean) * jax.lax.rsqrt(var + BN_EPS)
                 * g[None, :, None, None] + beta[None, :, None, None])
        if use_lrelu:
            y = jnp.where(y >= 0, y, LRELU_SLOPE * y)
        if use_sigmoid and i == len(layers) - 1:
            y = jax.nn.sigmoid(y)
    return y


if __name__ == "__main__":
    key = jax.random.PRNGKey(0)
    kx, kp = jax.random.split(key)

    # Small shapes: batch=2, inc=4, 16x16 spatial, onc=8, nlayers=3.
    N, INC, H, W = 2, 4, 16, 16
    x = jax.random.normal(kx, (N, INC, H, W), jnp.float32)
    layers = init_params(kp, inc=INC, onc=8, nlayers=3)

    ref = jax.block_until_ready(reference_forward(x, layers))

    # f32 compute: tight check of the row-blocked tap decomposition + fused BN.
    fwd_f32 = jax.jit(lambda xx: nlayer_discriminator_forward(
        xx, layers, compute_dtype=jnp.float32))
    out_f32 = jax.block_until_ready(fwd_f32(x))
    assert out_f32.shape == ref.shape, (out_f32.shape, ref.shape)
    err_f32 = float(jnp.max(jnp.abs(out_f32 - ref)))
    assert bool(jnp.allclose(out_f32, ref, atol=2e-2, rtol=2e-2)), \
        f"f32 mismatch vs reference (max abs err {err_f32})"

    # bf16 compute: the performance configuration (bf16 MXU operands, f32 accum).
    fwd_bf16 = jax.jit(lambda xx: nlayer_discriminator_forward(
        xx, layers, compute_dtype=jnp.bfloat16))
    out_bf16 = jax.block_until_ready(fwd_bf16(x))
    err_bf16 = float(jnp.max(jnp.abs(out_bf16 - ref)))
    assert bool(jnp.allclose(out_bf16, ref, atol=5e-2, rtol=5e-2)), \
        f"bf16 mismatch vs reference (max abs err {err_bf16})"

    print("KERNEL_OK")
</pallas_src>

<mosaic_0001>
module attributes {stable_mosaic.version = 11 : i64} {
  func.func @_conv_tap_kernel(%arg0: i32, %arg1: i32, %arg2: memref<1x9x17x8xf32, #tpu.memory_space<vmem>>, %arg3: memref<16x8x128xf32, #tpu.memory_space<vmem>>, %arg4: memref<1x128xf32, #tpu.memory_space<vmem>>, %arg5: memref<9x16x128xf32, #tpu.memory_space<vmem>>, %arg6: memref<144x128xf32, #tpu.memory_space<vmem>>) attributes {dimension_semantics = [#tpu.dimension_semantics<parallel>, #tpu.dimension_semantics<arbitrary>], iteration_bounds = array<i64: 2, 8>, scalar_prefetch = 0 : i64, scratch_operands = 1 : i64, tpu.core_type = #tpu.core_type<tc>, window_params = [{transform_indices = @transform_0, window_bounds = array<i64: 1, 9, 17, 8>}, {pipeline_mode = #tpu.pipeline_mode<synchronous>, transform_indices = @transform_1, window_bounds = array<i64: 16, 8, 128>}, {pipeline_mode = #tpu.pipeline_mode<synchronous>, transform_indices = @transform_2, window_bounds = array<i64: 1, 128>}, {transform_indices = @transform_3, window_bounds = array<i64: 9, 16, 128>}]} {
    %c0_i32 = arith.constant 0 : i32
    %0 = arith.cmpi eq, %arg1, %c0_i32 : i32
    %1 = arith.extui %0 : i1 to i32
    %c0_i32_0 = arith.constant 0 : i32
    %2 = arith.cmpi ne, %1, %c0_i32_0 : i32
    scf.if %2 {
      %cst_16 = arith.constant 0.000000e+00 : f32
      %28 = vector.broadcast %cst_16 : f32 to vector<144x128xf32>
      %c0_17 = arith.constant 0 : index
      %c0_18 = arith.constant 0 : index
      %29 = vector.load %arg6[%c0_17, %c0_18] : memref<144x128xf32, #tpu.memory_space<vmem>>, vector<144x128xf32>
      tpu.vector_store %arg6[%c0_17, %c0_18], %28 {strides = array<i32>} : memref<144x128xf32, #tpu.memory_space<vmem>>, vector<144x128xf32>,
    } else {
    }
    %c0 = arith.constant 0 : index
    %c0_1 = arith.constant 0 : index
    %c0_2 = arith.constant 0 : index
    %c0_3 = arith.constant 0 : index
    %3 = vector.load %arg2[%c0, %c0_1, %c0_2, %c0_3] : memref<1x9x17x8xf32, #tpu.memory_space<vmem>>, vector<1x9x17x8xf32>
    %4 = vector.shape_cast %3 : vector<1x9x17x8xf32> to vector<9x17x8xf32>
    %c0_4 = arith.constant 0 : index
    %c0_5 = arith.constant 0 : index
    %5 = vector.load %arg6[%c0_4, %c0_5] : memref<144x128xf32, #tpu.memory_space<vmem>>, vector<144x128xf32>
    %6 = vector.extract_strided_slice %4 {offsets = [0, 0, 0], sizes = [9, 16, 8], strides = [1, 1, 1]} : vector<9x17x8xf32> to vector<9x16x8xf32>
    %7 = vector.shape_cast %6 : vector<9x16x8xf32> to vector<144x8xf32>
    %c2_i32 = arith.constant 2 : i32
    %8 = arith.muli %arg1, %c2_i32 : i32
    %c0_i32_6 = arith.constant 0 : i32
    %9 = arith.addi %8, %c0_i32_6 : i32
    %10 = arith.index_cast %9 : i32 to index
    %c0_7 = arith.constant 0 : index
    %c0_8 = arith.constant 0 : index
    %11 = vector.load %arg3[%10, %c0_7, %c0_8] : memref<16x8x128xf32, #tpu.memory_space<vmem>>, vector<1x8x128xf32>
    %12 = vector.shape_cast %11 : vector<1x8x128xf32> to vector<8x128xf32>
    %cst = arith.constant dense<0.000000e+00> : vector<144x128xf32>
    %13 = tpu.matmul %7, %12, %cst {dimension_numbers = #tpu.dot_dimension_numbers<[1], [0], [0], [1], [0, 0, 1, 1], [], []>} : vector<144x8xf32>, vector<8x128xf32>, vector<144x128xf32> -> vector<144x128xf32>
    %14 = arith.addf %5, %13 : vector<144x128xf32>
    %15 = vector.extract_strided_slice %4 {offsets = [0, 1, 0], sizes = [9, 16, 8], strides = [1, 1, 1]} : vector<9x17x8xf32> to vector<9x16x8xf32>
    %16 = vector.shape_cast %15 : vector<9x16x8xf32> to vector<144x8xf32>
    %c2_i32_9 = arith.constant 2 : i32
    %17 = arith.muli %arg1, %c2_i32_9 : i32
    %c1_i32 = arith.constant 1 : i32
    %18 = arith.addi %17, %c1_i32 : i32
    %19 = arith.index_cast %18 : i32 to index
    %c0_10 = arith.constant 0 : index
    %c0_11 = arith.constant 0 : index
    %20 = vector.load %arg3[%19, %c0_10, %c0_11] : memref<16x8x128xf32, #tpu.memory_space<vmem>>, vector<1x8x128xf32>
    %21 = vector.shape_cast %20 : vector<1x8x128xf32> to vector<8x128xf32>
    %cst_12 = arith.constant dense<0.000000e+00> : vector<144x128xf32>
    %22 = tpu.matmul %16, %21, %cst_12 {dimension_numbers = #tpu.dot_dimension_numbers<[1], [0], [0], [1], [0, 0, 1, 1], [], []>} : vector<144x8xf32>, vector<8x128xf32>, vector<144x128xf32> -> vector<144x128xf32>
    %23 = arith.addf %14, %22 : vector<144x128xf32>
    %c0_13 = arith.constant 0 : index
    %c0_14 = arith.constant 0 : index
    %24 = vector.load %arg6[%c0_13, %c0_14] : memref<144x128xf32, #tpu.memory_space<vmem>>, vector<144x128xf32>
    tpu.vector_store %arg6[%c0_13, %c0_14], %23 {strides = array<i32>} : memref<144x128xf32, #tpu.memory_space<vmem>>, vector<144x128xf32>,
    %c7_i32 = arith.constant 7 : i32
    %25 = arith.cmpi eq, %arg1, %c7_i32 : i32
    %26 = arith.extui %25 : i1 to i32
    %c0_i32_15 = arith.constant 0 : i32
    %27 = arith.cmpi ne, %26, %c0_i32_15 : i32
    scf.if %27 {
      %c0_16 = arith.constant 0 : index
      %c0_17 = arith.constant 0 : index
      %28 = vector.load %arg4[%c0_16, %c0_17] : memref<1x128xf32, #tpu.memory_space<vmem>>, vector<1x128xf32>
      %29 = vector.broadcast %28 : vector<1x128xf32> to vector<144x128xf32>
      %30 = arith.addf %23, %29 : vector<144x128xf32>
      %cst_18 = arith.constant 0.000000e+00 : f32
      %31 = vector.broadcast %cst_18 : f32 to vector<144x128xf32>
      %32 = arith.cmpf oge, %30, %31 : vector<144x128xf32>
      %cst_19 = arith.constant 2.000000e-01 : f32
      %33 = vector.broadcast %cst_19 : f32 to vector<144x128xf32>
      %34 = arith.mulf %33, %30 : vector<144x128xf32>
      %35 = arith.select %32, %30, %34 : vector<144x128xi1>, vector<144x128xf32>
      %36 = vector.shape_cast %35 : vector<144x128xf32> to vector<9x16x128xf32>
      %c0_20 = arith.constant 0 : index
      %c0_21 = arith.constant 0 : index
      %c0_22 = arith.constant 0 : index
      %37 = vector.load %arg5[%c0_20, %c0_21, %c0_22] : memref<9x16x128xf32, #tpu.memory_space<vmem>>, vector<9x16x128xf32>
      tpu.vector_store %arg5[%c0_20, %c0_21, %c0_22], %36 {strides = array<i32>} : memref<9x16x128xf32, #tpu.memory_space<vmem>>, vector<9x16x128xf32>,
    } else {
    }
    return
  }
  func.func @transform_0(%arg0: i32, %arg1: i32) -> (i32, i32, i32, i32) {
    %c0_i32 = arith.constant 0 : i32
    %c0_i32_0 = arith.constant 0 : i32
    %c0_i32_1 = arith.constant 0 : i32
    return %arg1, %arg0, %c0_i32, %c0_i32_0 : i32, i32, i32, i32
  }
  func.func @transform_1(%arg0: i32, %arg1: i32) -> (i32, i32, i32) {
    %c0_i32 = arith.constant 0 : i32
    %c0_i32_0 = arith.constant 0 : i32
    %c0_i32_1 = arith.constant 0 : i32
    %c0_i32_2 = arith.constant 0 : i32
    return %c0_i32, %c0_i32_0, %c0_i32_1 : i32, i32, i32
  }
  func.func @transform_2(%arg0: i32, %arg1: i32) -> (i32, i32) {
    %c0_i32 = arith.constant 0 : i32
    %c0_i32_0 = arith.constant 0 : i32
    %c0_i32_1 = arith.constant 0 : i32
    return %c0_i32, %c0_i32_0 : i32, i32
  }
  func.func @transform_3(%arg0: i32, %arg1: i32) -> (i32, i32, i32) {
    %c0_i32 = arith.constant 0 : i32
    %c0_i32_0 = arith.constant 0 : i32
    %c0_i32_1 = arith.constant 0 : i32
    return %arg0, %c0_i32, %c0_i32_0 : i32, i32, i32
  }
}

module attributes {stable_mosaic.version = 11 : i64} {
  func.func @_conv_tap_kernel(%arg0: i32, %arg1: i32, %arg2: memref<1x5x9x128xf32, #tpu.memory_space<vmem>>, %arg3: memref<16x128x128xf32, #tpu.memory_space<vmem>>, %arg4: memref<5x8x128xf32, #tpu.memory_space<vmem>>, %arg5: memref<1x1x128xf32, #tpu.memory_space<vmem>>, %arg6: memref<1x1x128xf32, #tpu.memory_space<vmem>>, %arg7: memref<40x128xf32, #tpu.memory_space<vmem>>) attributes {dimension_semantics = [#tpu.dimension_semantics<parallel>, #tpu.dimension_semantics<arbitrary>], iteration_bounds = array<i64: 2, 8>, scalar_prefetch = 0 : i64, scratch_operands = 1 : i64, tpu.core_type = #tpu.core_type<tc>, window_params = [{transform_indices = @transform_0, window_bounds = array<i64: 1, 5, 9, 128>}, {pipeline_mode = #tpu.pipeline_mode<synchronous>, transform_indices = @transform_1, window_bounds = array<i64: 16, 128, 128>}, {transform_indices = @transform_2, window_bounds = array<i64: 5, 8, 128>}, {transform_indices = @transform_3, window_bounds = array<i64: 1, 1, 128>}, {transform_indices = @transform_4, window_bounds = array<i64: 1, 1, 128>}]} {
    %c0_i32 = arith.constant 0 : i32
    %0 = arith.cmpi eq, %arg1, %c0_i32 : i32
    %1 = arith.extui %0 : i1 to i32
    %c0_i32_0 = arith.constant 0 : i32
    %2 = arith.cmpi ne, %1, %c0_i32_0 : i32
    scf.if %2 {
      %cst_16 = arith.constant 0.000000e+00 : f32
      %28 = vector.broadcast %cst_16 : f32 to vector<40x128xf32>
      %c0_17 = arith.constant 0 : index
      %c0_18 = arith.constant 0 : index
      %29 = vector.load %arg7[%c0_17, %c0_18] : memref<40x128xf32, #tpu.memory_space<vmem>>, vector<40x128xf32>
      tpu.vector_store %arg7[%c0_17, %c0_18], %28 {strides = array<i32>} : memref<40x128xf32, #tpu.memory_space<vmem>>, vector<40x128xf32>,
    } else {
    }
    %c0 = arith.constant 0 : index
    %c0_1 = arith.constant 0 : index
    %c0_2 = arith.constant 0 : index
    %c0_3 = arith.constant 0 : index
    %3 = vector.load %arg2[%c0, %c0_1, %c0_2, %c0_3] : memref<1x5x9x128xf32, #tpu.memory_space<vmem>>, vector<1x5x9x128xf32>
    %4 = vector.shape_cast %3 : vector<1x5x9x128xf32> to vector<5x9x128xf32>
    %c0_4 = arith.constant 0 : index
    %c0_5 = arith.constant 0 : index
    %5 = vector.load %arg7[%c0_4, %c0_5] : memref<40x128xf32, #tpu.memory_space<vmem>>, vector<40x128xf32>
    %6 = vector.extract_strided_slice %4 {offsets = [0, 0, 0], sizes = [5, 8, 128], strides = [1, 1, 1]} : vector<5x9x128xf32> to vector<5x8x128xf32>
    %7 = vector.shape_cast %6 : vector<5x8x128xf32> to vector<40x128xf32>
    %c2_i32 = arith.constant 2 : i32
    %8 = arith.muli %arg1, %c2_i32 : i32
    %c0_i32_6 = arith.constant 0 : i32
    %9 = arith.addi %8, %c0_i32_6 : i32
    %10 = arith.index_cast %9 : i32 to index
    %c0_7 = arith.constant 0 : index
    %c0_8 = arith.constant 0 : index
    %11 = vector.load %arg3[%10, %c0_7, %c0_8] : memref<16x128x128xf32, #tpu.memory_space<vmem>>, vector<1x128x128xf32>
    %12 = vector.shape_cast %11 : vector<1x128x128xf32> to vector<128x128xf32>
    %cst = arith.constant dense<0.000000e+00> : vector<40x128xf32>
    %13 = tpu.matmul %7, %12, %cst {dimension_numbers = #tpu.dot_dimension_numbers<[1], [0], [0], [1], [0, 0, 1, 1], [], []>} : vector<40x128xf32>, vector<128x128xf32>, vector<40x128xf32> -> vector<40x128xf32>
    %14 = arith.addf %5, %13 : vector<40x128xf32>
    %15 = vector.extract_strided_slice %4 {offsets = [0, 1, 0], sizes = [5, 8, 128], strides = [1, 1, 1]} : vector<5x9x128xf32> to vector<5x8x128xf32>
    %16 = vector.shape_cast %15 : vector<5x8x128xf32> to vector<40x128xf32>
    %c2_i32_9 = arith.constant 2 : i32
    %17 = arith.muli %arg1, %c2_i32_9 : i32
    %c1_i32 = arith.constant 1 : i32
    %18 = arith.addi %17, %c1_i32 : i32
    %19 = arith.index_cast %18 : i32 to index
    %c0_10 = arith.constant 0 : index
    %c0_11 = arith.constant 0 : index
    %20 = vector.load %arg3[%19, %c0_10, %c0_11] : memref<16x128x128xf32, #tpu.memory_space<vmem>>, vector<1x128x128xf32>
    %21 = vector.shape_cast %20 : vector<1x128x128xf32> to vector<128x128xf32>
    %cst_12 = arith.constant dense<0.000000e+00> : vector<40x128xf32>
    %22 = tpu.matmul %16, %21, %cst_12 {dimension_numbers = #tpu.dot_dimension_numbers<[1], [0], [0], [1], [0, 0, 1, 1], [], []>} : vector<40x128xf32>, vector<128x128xf32>, vector<40x128xf32> -> vector<40x128xf32>
    %23 = arith.addf %14, %22 : vector<40x128xf32>
    %c0_13 = arith.constant 0 : index
    %c0_14 = arith.constant 0 : index
    %24 = vector.load %arg7[%c0_13, %c0_14] : memref<40x128xf32, #tpu.memory_space<vmem>>, vector<40x128xf32>
    tpu.vector_store %arg7[%c0_13, %c0_14], %23 {strides = array<i32>} : memref<40x128xf32, #tpu.memory_space<vmem>>, vector<40x128xf32>,
    %c7_i32 = arith.constant 7 : i32
    %25 = arith.cmpi eq, %arg1, %c7_i32 : i32
    %26 = arith.extui %25 : i1 to i32
    %c0_i32_15 = arith.constant 0 : i32
    %27 = arith.cmpi ne, %26, %c0_i32_15 : i32
    scf.if %27 {
      %28 = tpu.iota {dimensions = array<i32: 0>} : vector<40x1xi32>
      %c8_i32 = arith.constant 8 : i32
      %c0_i32_16 = arith.constant 0 : i32
      %29 = arith.cmpi eq, %c8_i32, %c0_i32_16 : i32
      %c1_i32_17 = arith.constant 1 : i32
      %30 = arith.select %29, %c1_i32_17, %c8_i32 : i32
      %31 = vector.broadcast %30 : i32 to vector<40x1xi32>
      %32 = arith.remsi %28, %31 : vector<40x1xi32>
      %c0_i32_18 = arith.constant 0 : i32
      %33 = vector.broadcast %c0_i32_18 : i32 to vector<40x1xi32>
      %34 = arith.cmpi ne, %32, %33 : vector<40x1xi32>
      %c0_i32_19 = arith.constant 0 : i32
      %35 = vector.broadcast %c0_i32_19 : i32 to vector<40x1xi32>
      %36 = arith.cmpi slt, %32, %35 : vector<40x1xi32>
      %c0_i32_20 = arith.constant 0 : i32
      %37 = arith.cmpi slt, %30, %c0_i32_20 : i32
      %38 = vector.broadcast %37 : i1 to vector<40x1xi1>
      %39 = vector.broadcast %38 : vector<40x1xi1> to vector<40x1xi1>
      %40 = arith.xori %36, %39 : vector<40x1xi1>
      %41 = arith.andi %40, %34 : vector<40x1xi1>
      %42 = vector.broadcast %30 : i32 to vector<40x1xi32>
      %43 = arith.addi %32, %42 : vector<40x1xi32>
      %44 = arith.select %41, %43, %32 : vector<40x1xi1>, vector<40x1xi32>
      %c5_i32 = arith.constant 5 : i32
      %45 = vector.broadcast %c5_i32 : i32 to vector<40x1xi32>
      %46 = arith.cmpi slt, %44, %45 : vector<40x1xi32>
      %cst_21 = arith.constant 0.000000e+00 : f32
      %47 = vector.shape_cast %46 : vector<40x1xi1> to vector<40x1xi1>
      %48 = vector.broadcast %47 : vector<40x1xi1> to vector<40x128xi1>
      %49 = vector.broadcast %cst_21 : f32 to vector<40x128xf32>
      %50 = arith.select %48, %23, %49 : vector<40x128xi1>, vector<40x128xf32>
      %cst_22 = arith.constant dense<0.000000e+00> : vector<128xf32>
      %51 = vector.multi_reduction <add>, %50, %cst_22 [0] : vector<40x128xf32> to vector<128xf32>
      %52 = vector.shape_cast %51 : vector<128xf32> to vector<1x128xf32>
      %53 = vector.shape_cast %52 : vector<1x128xf32> to vector<1x1x128xf32>
      %c0_23 = arith.constant 0 : index
      %c0_24 = arith.constant 0 : index
      %c0_25 = arith.constant 0 : index
      %54 = vector.load %arg5[%c0_23, %c0_24, %c0_25] : memref<1x1x128xf32, #tpu.memory_space<vmem>>, vector<1x1x128xf32>
      tpu.vector_store %arg5[%c0_23, %c0_24, %c0_25], %53 {strides = array<i32>} : memref<1x1x128xf32, #tpu.memory_space<vmem>>, vector<1x1x128xf32>,
      %55 = arith.mulf %50, %50 : vector<40x128xf32>
      %cst_26 = arith.constant dense<0.000000e+00> : vector<128xf32>
      %56 = vector.multi_reduction <add>, %55, %cst_26 [0] : vector<40x128xf32> to vector<128xf32>
      %57 = vector.shape_cast %56 : vector<128xf32> to vector<1x128xf32>
      %58 = vector.shape_cast %57 : vector<1x128xf32> to vector<1x1x128xf32>
      %c0_27 = arith.constant 0 : index
      %c0_28 = arith.constant 0 : index
      %c0_29 = arith.constant 0 : index
      %59 = vector.load %arg6[%c0_27, %c0_28, %c0_29] : memref<1x1x128xf32, #tpu.memory_space<vmem>>, vector<1x1x128xf32>
      tpu.vector_store %arg6[%c0_27, %c0_28, %c0_29], %58 {strides = array<i32>} : memref<1x1x128xf32, #tpu.memory_space<vmem>>, vector<1x1x128xf32>,
      %60 = vector.shape_cast %23 : vector<40x128xf32> to vector<5x8x128xf32>
      %c0_30 = arith.constant 0 : index
      %c0_31 = arith.constant 0 : index
      %c0_32 = arith.constant 0 : index
      %61 = vector.load %arg4[%c0_30, %c0_31, %c0_32] : memref<5x8x128xf32, #tpu.memory_space<vmem>>, vector<5x8x128xf32>
      tpu.vector_store %arg4[%c0_30, %c0_31, %c0_32], %60 {strides = array<i32>} : memref<5x8x128xf32, #tpu.memory_space<vmem>>, vector<5x8x128xf32>,
    } else {
    }
    return
  }
  func.func @transform_0(%arg0: i32, %arg1: i32) -> (i32, i32, i32, i32) {
    %c0_i32 = arith.constant 0 : i32
    %c0_i32_0 = arith.constant 0 : i32
    %c0_i32_1 = arith.constant 0 : i32
    return %arg1, %arg0, %c0_i32, %c0_i32_0 : i32, i32, i32, i32
  }
  func.func @transform_1(%arg0: i32, %arg1: i32) -> (i32, i32, i32) {
    %c0_i32 = arith.constant 0 : i32
    %c0_i32_0 = arith.constant 0 : i32
    %c0_i32_1 = arith.constant 0 : i32
    %c0_i32_2 = arith.constant 0 : i32
    return %c0_i32, %c0_i32_0, %c0_i32_1 : i32, i32, i32
  }
  func.func @transform_2(%arg0: i32, %arg1: i32) -> (i32, i32, i32) {
    %c0_i32 = arith.constant 0 : i32
    %c0_i32_0 = arith.constant 0 : i32
    %c0_i32_1 = arith.constant 0 : i32
    return %arg0, %c0_i32, %c0_i32_0 : i32, i32, i32
  }
  func.func @transform_3(%arg0: i32, %arg1: i32) -> (i32, i32, i32) {
    %c0_i32 = arith.constant 0 : i32
    %c0_i32_0 = arith.constant 0 : i32
    %c0_i32_1 = arith.constant 0 : i32
    return %arg0, %c0_i32, %c0_i32_0 : i32, i32, i32
  }
  func.func @transform_4(%arg0: i32, %arg1: i32) -> (i32, i32, i32) {
    %c0_i32 = arith.constant 0 : i32
    %c0_i32_0 = arith.constant 0 : i32
    %c0_i32_1 = arith.constant 0 : i32
    return %arg0, %c0_i32, %c0_i32_0 : i32, i32, i32
  }
}

module attributes {stable_mosaic.version = 11 : i64} {
  func.func @_conv_tap_kernel(%arg0: i32, %arg1: i32, %arg2: memref<1x3x9x128xf32, #tpu.memory_space<vmem>>, %arg3: memref<16x128x128xf32, #tpu.memory_space<vmem>>, %arg4: memref<3x8x128xf32, #tpu.memory_space<vmem>>, %arg5: memref<1x1x128xf32, #tpu.memory_space<vmem>>, %arg6: memref<1x1x128xf32, #tpu.memory_space<vmem>>, %arg7: memref<24x128xf32, #tpu.memory_space<vmem>>) attributes {dimension_semantics = [#tpu.dimension_semantics<parallel>, #tpu.dimension_semantics<arbitrary>], iteration_bounds = array<i64: 2, 8>, scalar_prefetch = 0 : i64, scratch_operands = 1 : i64, tpu.core_type = #tpu.core_type<tc>, window_params = [{transform_indices = @transform_0, window_bounds = array<i64: 1, 3, 9, 128>}, {pipeline_mode = #tpu.pipeline_mode<synchronous>, transform_indices = @transform_1, window_bounds = array<i64: 16, 128, 128>}, {transform_indices = @transform_2, window_bounds = array<i64: 3, 8, 128>}, {transform_indices = @transform_3, window_bounds = array<i64: 1, 1, 128>}, {transform_indices = @transform_4, window_bounds = array<i64: 1, 1, 128>}]} {
    %c0_i32 = arith.constant 0 : i32
    %0 = arith.cmpi eq, %arg1, %c0_i32 : i32
    %1 = arith.extui %0 : i1 to i32
    %c0_i32_0 = arith.constant 0 : i32
    %2 = arith.cmpi ne, %1, %c0_i32_0 : i32
    scf.if %2 {
      %cst_16 = arith.constant 0.000000e+00 : f32
      %28 = vector.broadcast %cst_16 : f32 to vector<24x128xf32>
      %c0_17 = arith.constant 0 : index
      %c0_18 = arith.constant 0 : index
      %29 = vector.load %arg7[%c0_17, %c0_18] : memref<24x128xf32, #tpu.memory_space<vmem>>, vector<24x128xf32>
      tpu.vector_store %arg7[%c0_17, %c0_18], %28 {strides = array<i32>} : memref<24x128xf32, #tpu.memory_space<vmem>>, vector<24x128xf32>,
    } else {
    }
    %c0 = arith.constant 0 : index
    %c0_1 = arith.constant 0 : index
    %c0_2 = arith.constant 0 : index
    %c0_3 = arith.constant 0 : index
    %3 = vector.load %arg2[%c0, %c0_1, %c0_2, %c0_3] : memref<1x3x9x128xf32, #tpu.memory_space<vmem>>, vector<1x3x9x128xf32>
    %4 = vector.shape_cast %3 : vector<1x3x9x128xf32> to vector<3x9x128xf32>
    %c0_4 = arith.constant 0 : index
    %c0_5 = arith.constant 0 : index
    %5 = vector.load %arg7[%c0_4, %c0_5] : memref<24x128xf32, #tpu.memory_space<vmem>>, vector<24x128xf32>
    %6 = vector.extract_strided_slice %4 {offsets = [0, 0, 0], sizes = [3, 8, 128], strides = [1, 1, 1]} : vector<3x9x128xf32> to vector<3x8x128xf32>
    %7 = vector.shape_cast %6 : vector<3x8x128xf32> to vector<24x128xf32>
    %c2_i32 = arith.constant 2 : i32
    %8 = arith.muli %arg1, %c2_i32 : i32
    %c0_i32_6 = arith.constant 0 : i32
    %9 = arith.addi %8, %c0_i32_6 : i32
    %10 = arith.index_cast %9 : i32 to index
    %c0_7 = arith.constant 0 : index
    %c0_8 = arith.constant 0 : index
    %11 = vector.load %arg3[%10, %c0_7, %c0_8] : memref<16x128x128xf32, #tpu.memory_space<vmem>>, vector<1x128x128xf32>
    %12 = vector.shape_cast %11 : vector<1x128x128xf32> to vector<128x128xf32>
    %cst = arith.constant dense<0.000000e+00> : vector<24x128xf32>
    %13 = tpu.matmul %7, %12, %cst {dimension_numbers = #tpu.dot_dimension_numbers<[1], [0], [0], [1], [0, 0, 1, 1], [], []>} : vector<24x128xf32>, vector<128x128xf32>, vector<24x128xf32> -> vector<24x128xf32>
    %14 = arith.addf %5, %13 : vector<24x128xf32>
    %15 = vector.extract_strided_slice %4 {offsets = [0, 1, 0], sizes = [3, 8, 128], strides = [1, 1, 1]} : vector<3x9x128xf32> to vector<3x8x128xf32>
    %16 = vector.shape_cast %15 : vector<3x8x128xf32> to vector<24x128xf32>
    %c2_i32_9 = arith.constant 2 : i32
    %17 = arith.muli %arg1, %c2_i32_9 : i32
    %c1_i32 = arith.constant 1 : i32
    %18 = arith.addi %17, %c1_i32 : i32
    %19 = arith.index_cast %18 : i32 to index
    %c0_10 = arith.constant 0 : index
    %c0_11 = arith.constant 0 : index
    %20 = vector.load %arg3[%19, %c0_10, %c0_11] : memref<16x128x128xf32, #tpu.memory_space<vmem>>, vector<1x128x128xf32>
    %21 = vector.shape_cast %20 : vector<1x128x128xf32> to vector<128x128xf32>
    %cst_12 = arith.constant dense<0.000000e+00> : vector<24x128xf32>
    %22 = tpu.matmul %16, %21, %cst_12 {dimension_numbers = #tpu.dot_dimension_numbers<[1], [0], [0], [1], [0, 0, 1, 1], [], []>} : vector<24x128xf32>, vector<128x128xf32>, vector<24x128xf32> -> vector<24x128xf32>
    %23 = arith.addf %14, %22 : vector<24x128xf32>
    %c0_13 = arith.constant 0 : index
    %c0_14 = arith.constant 0 : index
    %24 = vector.load %arg7[%c0_13, %c0_14] : memref<24x128xf32, #tpu.memory_space<vmem>>, vector<24x128xf32>
    tpu.vector_store %arg7[%c0_13, %c0_14], %23 {strides = array<i32>} : memref<24x128xf32, #tpu.memory_space<vmem>>, vector<24x128xf32>,
    %c7_i32 = arith.constant 7 : i32
    %25 = arith.cmpi eq, %arg1, %c7_i32 : i32
    %26 = arith.extui %25 : i1 to i32
    %c0_i32_15 = arith.constant 0 : i32
    %27 = arith.cmpi ne, %26, %c0_i32_15 : i32
    scf.if %27 {
      %28 = tpu.iota {dimensions = array<i32: 0>} : vector<24x1xi32>
      %c8_i32 = arith.constant 8 : i32
      %c0_i32_16 = arith.constant 0 : i32
      %29 = arith.cmpi eq, %c8_i32, %c0_i32_16 : i32
      %c1_i32_17 = arith.constant 1 : i32
      %30 = arith.select %29, %c1_i32_17, %c8_i32 : i32
      %31 = vector.broadcast %30 : i32 to vector<24x1xi32>
      %32 = arith.remsi %28, %31 : vector<24x1xi32>
      %c0_i32_18 = arith.constant 0 : i32
      %33 = vector.broadcast %c0_i32_18 : i32 to vector<24x1xi32>
      %34 = arith.cmpi ne, %32, %33 : vector<24x1xi32>
      %c0_i32_19 = arith.constant 0 : i32
      %35 = vector.broadcast %c0_i32_19 : i32 to vector<24x1xi32>
      %36 = arith.cmpi slt, %32, %35 : vector<24x1xi32>
      %c0_i32_20 = arith.constant 0 : i32
      %37 = arith.cmpi slt, %30, %c0_i32_20 : i32
      %38 = vector.broadcast %37 : i1 to vector<24x1xi1>
      %39 = vector.broadcast %38 : vector<24x1xi1> to vector<24x1xi1>
      %40 = arith.xori %36, %39 : vector<24x1xi1>
      %41 = arith.andi %40, %34 : vector<24x1xi1>
      %42 = vector.broadcast %30 : i32 to vector<24x1xi32>
      %43 = arith.addi %32, %42 : vector<24x1xi32>
      %44 = arith.select %41, %43, %32 : vector<24x1xi1>, vector<24x1xi32>
      %c3_i32 = arith.constant 3 : i32
      %45 = vector.broadcast %c3_i32 : i32 to vector<24x1xi32>
      %46 = arith.cmpi slt, %44, %45 : vector<24x1xi32>
      %cst_21 = arith.constant 0.000000e+00 : f32
      %47 = vector.shape_cast %46 : vector<24x1xi1> to vector<24x1xi1>
      %48 = vector.broadcast %47 : vector<24x1xi1> to vector<24x128xi1>
      %49 = vector.broadcast %cst_21 : f32 to vector<24x128xf32>
      %50 = arith.select %48, %23, %49 : vector<24x128xi1>, vector<24x128xf32>
      %cst_22 = arith.constant dense<0.000000e+00> : vector<128xf32>
      %51 = vector.multi_reduction <add>, %50, %cst_22 [0] : vector<24x128xf32> to vector<128xf32>
      %52 = vector.shape_cast %51 : vector<128xf32> to vector<1x128xf32>
      %53 = vector.shape_cast %52 : vector<1x128xf32> to vector<1x1x128xf32>
      %c0_23 = arith.constant 0 : index
      %c0_24 = arith.constant 0 : index
      %c0_25 = arith.constant 0 : index
      %54 = vector.load %arg5[%c0_23, %c0_24, %c0_25] : memref<1x1x128xf32, #tpu.memory_space<vmem>>, vector<1x1x128xf32>
      tpu.vector_store %arg5[%c0_23, %c0_24, %c0_25], %53 {strides = array<i32>} : memref<1x1x128xf32, #tpu.memory_space<vmem>>, vector<1x1x128xf32>,
      %55 = arith.mulf %50, %50 : vector<24x128xf32>
      %cst_26 = arith.constant dense<0.000000e+00> : vector<128xf32>
      %56 = vector.multi_reduction <add>, %55, %cst_26 [0] : vector<24x128xf32> to vector<128xf32>
      %57 = vector.shape_cast %56 : vector<128xf32> to vector<1x128xf32>
      %58 = vector.shape_cast %57 : vector<1x128xf32> to vector<1x1x128xf32>
      %c0_27 = arith.constant 0 : index
      %c0_28 = arith.constant 0 : index
      %c0_29 = arith.constant 0 : index
      %59 = vector.load %arg6[%c0_27, %c0_28, %c0_29] : memref<1x1x128xf32, #tpu.memory_space<vmem>>, vector<1x1x128xf32>
      tpu.vector_store %arg6[%c0_27, %c0_28, %c0_29], %58 {strides = array<i32>} : memref<1x1x128xf32, #tpu.memory_space<vmem>>, vector<1x1x128xf32>,
      %60 = vector.shape_cast %23 : vector<24x128xf32> to vector<3x8x128xf32>
      %c0_30 = arith.constant 0 : index
      %c0_31 = arith.constant 0 : index
      %c0_32 = arith.constant 0 : index
      %61 = vector.load %arg4[%c0_30, %c0_31, %c0_32] : memref<3x8x128xf32, #tpu.memory_space<vmem>>, vector<3x8x128xf32>
      tpu.vector_store %arg4[%c0_30, %c0_31, %c0_32], %60 {strides = array<i32>} : memref<3x8x128xf32, #tpu.memory_space<vmem>>, vector<3x8x128xf32>,
    } else {
    }
    return
  }
  func.func @transform_0(%arg0: i32, %arg1: i32) -> (i32, i32, i32, i32) {
    %c0_i32 = arith.constant 0 : i32
    %c0_i32_0 = arith.constant 0 : i32
    %c0_i32_1 = arith.constant 0 : i32
    return %arg1, %arg0, %c0_i32, %c0_i32_0 : i32, i32, i32, i32
  }
  func.func @transform_1(%arg0: i32, %arg1: i32) -> (i32, i32, i32) {
    %c0_i32 = arith.constant 0 : i32
    %c0_i32_0 = arith.constant 0 : i32
    %c0_i32_1 = arith.constant 0 : i32
    %c0_i32_2 = arith.constant 0 : i32
    return %c0_i32, %c0_i32_0, %c0_i32_1 : i32, i32, i32
  }
  func.func @transform_2(%arg0: i32, %arg1: i32) -> (i32, i32, i32) {
    %c0_i32 = arith.constant 0 : i32
    %c0_i32_0 = arith.constant 0 : i32
    %c0_i32_1 = arith.constant 0 : i32
    return %arg0, %c0_i32, %c0_i32_0 : i32, i32, i32
  }
  func.func @transform_3(%arg0: i32, %arg1: i32) -> (i32, i32, i32) {
    %c0_i32 = arith.constant 0 : i32
    %c0_i32_0 = arith.constant 0 : i32
    %c0_i32_1 = arith.constant 0 : i32
    return %arg0, %c0_i32, %c0_i32_0 : i32, i32, i32
  }
  func.func @transform_4(%arg0: i32, %arg1: i32) -> (i32, i32, i32) {
    %c0_i32 = arith.constant 0 : i32
    %c0_i32_0 = arith.constant 0 : i32
    %c0_i32_1 = arith.constant 0 : i32
    return %arg0, %c0_i32, %c0_i32_0 : i32, i32, i32
  }
}

module attributes {stable_mosaic.version = 11 : i64} {
  func.func @_conv_tap_kernel(%arg0: i32, %arg1: i32, %arg2: memref<1x4x11x128xf32, #tpu.memory_space<vmem>>, %arg3: memref<16x128x128xf32, #tpu.memory_space<vmem>>, %arg4: memref<4x8x128xf32, #tpu.memory_space<vmem>>, %arg5: memref<1x1x128xf32, #tpu.memory_space<vmem>>, %arg6: memref<1x1x128xf32, #tpu.memory_space<vmem>>, %arg7: memref<32x128xf32, #tpu.memory_space<vmem>>) attributes {dimension_semantics = [#tpu.dimension_semantics<parallel>, #tpu.dimension_semantics<arbitrary>], iteration_bounds = array<i64: 2, 4>, scalar_prefetch = 0 : i64, scratch_operands = 1 : i64, tpu.core_type = #tpu.core_type<tc>, window_params = [{transform_indices = @transform_0, window_bounds = array<i64: 1, 4, 11, 128>}, {pipeline_mode = #tpu.pipeline_mode<synchronous>, transform_indices = @transform_1, window_bounds = array<i64: 16, 128, 128>}, {transform_indices = @transform_2, window_bounds = array<i64: 4, 8, 128>}, {transform_indices = @transform_3, window_bounds = array<i64: 1, 1, 128>}, {transform_indices = @transform_4, window_bounds = array<i64: 1, 1, 128>}]} {
    %c0_i32 = arith.constant 0 : i32
    %0 = arith.cmpi eq, %arg1, %c0_i32 : i32
    %1 = arith.extui %0 : i1 to i32
    %c0_i32_0 = arith.constant 0 : i32
    %2 = arith.cmpi ne, %1, %c0_i32_0 : i32
    scf.if %2 {
      %cst_25 = arith.constant 0.000000e+00 : f32
      %46 = vector.broadcast %cst_25 : f32 to vector<32x128xf32>
      %c0_26 = arith.constant 0 : index
      %c0_27 = arith.constant 0 : index
      %47 = vector.load %arg7[%c0_26, %c0_27] : memref<32x128xf32, #tpu.memory_space<vmem>>, vector<32x128xf32>
      tpu.vector_store %arg7[%c0_26, %c0_27], %46 {strides = array<i32>} : memref<32x128xf32, #tpu.memory_space<vmem>>, vector<32x128xf32>,
    } else {
    }
    %c0 = arith.constant 0 : index
    %c0_1 = arith.constant 0 : index
    %c0_2 = arith.constant 0 : index
    %c0_3 = arith.constant 0 : index
    %3 = vector.load %arg2[%c0, %c0_1, %c0_2, %c0_3] : memref<1x4x11x128xf32, #tpu.memory_space<vmem>>, vector<1x4x11x128xf32>
    %4 = vector.shape_cast %3 : vector<1x4x11x128xf32> to vector<4x11x128xf32>
    %c0_4 = arith.constant 0 : index
    %c0_5 = arith.constant 0 : index
    %5 = vector.load %arg7[%c0_4, %c0_5] : memref<32x128xf32, #tpu.memory_space<vmem>>, vector<32x128xf32>
    %6 = vector.extract_strided_slice %4 {offsets = [0, 0, 0], sizes = [4, 8, 128], strides = [1, 1, 1]} : vector<4x11x128xf32> to vector<4x8x128xf32>
    %7 = vector.shape_cast %6 : vector<4x8x128xf32> to vector<32x128xf32>
    %c4_i32 = arith.constant 4 : i32
    %8 = arith.muli %arg1, %c4_i32 : i32
    %c0_i32_6 = arith.constant 0 : i32
    %9 = arith.addi %8, %c0_i32_6 : i32
    %10 = arith.index_cast %9 : i32 to index
    %c0_7 = arith.constant 0 : index
    %c0_8 = arith.constant 0 : index
    %11 = vector.load %arg3[%10, %c0_7, %c0_8] : memref<16x128x128xf32, #tpu.memory_space<vmem>>, vector<1x128x128xf32>
    %12 = vector.shape_cast %11 : vector<1x128x128xf32> to vector<128x128xf32>
    %cst = arith.constant dense<0.000000e+00> : vector<32x128xf32>
    %13 = tpu.matmul %7, %12, %cst {dimension_numbers = #tpu.dot_dimension_numbers<[1], [0], [0], [1], [0, 0, 1, 1], [], []>} : vector<32x128xf32>, vector<128x128xf32>, vector<32x128xf32> -> vector<32x128xf32>
    %14 = arith.addf %5, %13 : vector<32x128xf32>
    %15 = vector.extract_strided_slice %4 {offsets = [0, 1, 0], sizes = [4, 8, 128], strides = [1, 1, 1]} : vector<4x11x128xf32> to vector<4x8x128xf32>
    %16 = vector.shape_cast %15 : vector<4x8x128xf32> to vector<32x128xf32>
    %c4_i32_9 = arith.constant 4 : i32
    %17 = arith.muli %arg1, %c4_i32_9 : i32
    %c1_i32 = arith.constant 1 : i32
    %18 = arith.addi %17, %c1_i32 : i32
    %19 = arith.index_cast %18 : i32 to index
    %c0_10 = arith.constant 0 : index
    %c0_11 = arith.constant 0 : index
    %20 = vector.load %arg3[%19, %c0_10, %c0_11] : memref<16x128x128xf32, #tpu.memory_space<vmem>>, vector<1x128x128xf32>
    %21 = vector.shape_cast %20 : vector<1x128x128xf32> to vector<128x128xf32>
    %cst_12 = arith.constant dense<0.000000e+00> : vector<32x128xf32>
    %22 = tpu.matmul %16, %21, %cst_12 {dimension_numbers = #tpu.dot_dimension_numbers<[1], [0], [0], [1], [0, 0, 1, 1], [], []>} : vector<32x128xf32>, vector<128x128xf32>, vector<32x128xf32> -> vector<32x128xf32>
    %23 = arith.addf %14, %22 : vector<32x128xf32>
    %24 = vector.extract_strided_slice %4 {offsets = [0, 2, 0], sizes = [4, 8, 128], strides = [1, 1, 1]} : vector<4x11x128xf32> to vector<4x8x128xf32>
    %25 = vector.shape_cast %24 : vector<4x8x128xf32> to vector<32x128xf32>
    %c4_i32_13 = arith.constant 4 : i32
    %26 = arith.muli %arg1, %c4_i32_13 : i32
    %c2_i32 = arith.constant 2 : i32
    %27 = arith.addi %26, %c2_i32 : i32
    %28 = arith.index_cast %27 : i32 to index
    %c0_14 = arith.constant 0 : index
    %c0_15 = arith.constant 0 : index
    %29 = vector.load %arg3[%28, %c0_14, %c0_15] : memref<16x128x128xf32, #tpu.memory_space<vmem>>, vector<1x128x128xf32>
    %30 = vector.shape_cast %29 : vector<1x128x128xf32> to vector<128x128xf32>
    %cst_16 = arith.constant dense<0.000000e+00> : vector<32x128xf32>
    %31 = tpu.matmul %25, %30, %cst_16 {dimension_numbers = #tpu.dot_dimension_numbers<[1], [0], [0], [1], [0, 0, 1, 1], [], []>} : vector<32x128xf32>, vector<128x128xf32>, vector<32x128xf32> -> vector<32x128xf32>
    %32 = arith.addf %23, %31 : vector<32x128xf32>
    %33 = vector.extract_strided_slice %4 {offsets = [0, 3, 0], sizes = [4, 8, 128], strides = [1, 1, 1]} : vector<4x11x128xf32> to vector<4x8x128xf32>
    %34 = vector.shape_cast %33 : vector<4x8x128xf32> to vector<32x128xf32>
    %c4_i32_17 = arith.constant 4 : i32
    %35 = arith.muli %arg1, %c4_i32_17 : i32
    %c3_i32 = arith.constant 3 : i32
    %36 = arith.addi %35, %c3_i32 : i32
    %37 = arith.index_cast %36 : i32 to index
    %c0_18 = arith.constant 0 : index
    %c0_19 = arith.constant 0 : index
    %38 = vector.load %arg3[%37, %c0_18, %c0_19] : memref<16x128x128xf32, #tpu.memory_space<vmem>>, vector<1x128x128xf32>
    %39 = vector.shape_cast %38 : vector<1x128x128xf32> to vector<128x128xf32>
    %cst_20 = arith.constant dense<0.000000e+00> : vector<32x128xf32>
    %40 = tpu.matmul %34, %39, %cst_20 {dimension_numbers = #tpu.dot_dimension_numbers<[1], [0], [0], [1], [0, 0, 1, 1], [], []>} : vector<32x128xf32>, vector<128x128xf32>, vector<32x128xf32> -> vector<32x128xf32>
    %41 = arith.addf %32, %40 : vector<32x128xf32>
    %c0_21 = arith.constant 0 : index
    %c0_22 = arith.constant 0 : index
    %42 = vector.load %arg7[%c0_21, %c0_22] : memref<32x128xf32, #tpu.memory_space<vmem>>, vector<32x128xf32>
    tpu.vector_store %arg7[%c0_21, %c0_22], %41 {strides = array<i32>} : memref<32x128xf32, #tpu.memory_space<vmem>>, vector<32x128xf32>,
    %c3_i32_23 = arith.constant 3 : i32
    %43 = arith.cmpi eq, %arg1, %c3_i32_23 : i32
    %44 = arith.extui %43 : i1 to i32
    %c0_i32_24 = arith.constant 0 : i32
    %45 = arith.cmpi ne, %44, %c0_i32_24 : i32
    scf.if %45 {
      %46 = tpu.iota {dimensions = array<i32: 0>} : vector<32x1xi32>
      %c8_i32 = arith.constant 8 : i32
      %c0_i32_25 = arith.constant 0 : i32
      %47 = arith.cmpi eq, %c8_i32, %c0_i32_25 : i32
      %c1_i32_26 = arith.constant 1 : i32
      %48 = arith.select %47, %c1_i32_26, %c8_i32 : i32
      %49 = vector.broadcast %48 : i32 to vector<32x1xi32>
      %50 = arith.remsi %46, %49 : vector<32x1xi32>
      %c0_i32_27 = arith.constant 0 : i32
      %51 = vector.broadcast %c0_i32_27 : i32 to vector<32x1xi32>
      %52 = arith.cmpi ne, %50, %51 : vector<32x1xi32>
      %c0_i32_28 = arith.constant 0 : i32
      %53 = vector.broadcast %c0_i32_28 : i32 to vector<32x1xi32>
      %54 = arith.cmpi slt, %50, %53 : vector<32x1xi32>
      %c0_i32_29 = arith.constant 0 : i32
      %55 = arith.cmpi slt, %48, %c0_i32_29 : i32
      %56 = vector.broadcast %55 : i1 to vector<32x1xi1>
      %57 = vector.broadcast %56 : vector<32x1xi1> to vector<32x1xi1>
      %58 = arith.xori %54, %57 : vector<32x1xi1>
      %59 = arith.andi %58, %52 : vector<32x1xi1>
      %60 = vector.broadcast %48 : i32 to vector<32x1xi32>
      %61 = arith.addi %50, %60 : vector<32x1xi32>
      %62 = arith.select %59, %61, %50 : vector<32x1xi1>, vector<32x1xi32>
      %c4_i32_30 = arith.constant 4 : i32
      %63 = vector.broadcast %c4_i32_30 : i32 to vector<32x1xi32>
      %64 = arith.cmpi slt, %62, %63 : vector<32x1xi32>
      %cst_31 = arith.constant 0.000000e+00 : f32
      %65 = vector.shape_cast %64 : vector<32x1xi1> to vector<32x1xi1>
      %66 = vector.broadcast %65 : vector<32x1xi1> to vector<32x128xi1>
      %67 = vector.broadcast %cst_31 : f32 to vector<32x128xf32>
      %68 = arith.select %66, %41, %67 : vector<32x128xi1>, vector<32x128xf32>
      %cst_32 = arith.constant dense<0.000000e+00> : vector<128xf32>
      %69 = vector.multi_reduction <add>, %68, %cst_32 [0] : vector<32x128xf32> to vector<128xf32>
      %70 = vector.shape_cast %69 : vector<128xf32> to vector<1x128xf32>
      %71 = vector.shape_cast %70 : vector<1x128xf32> to vector<1x1x128xf32>
      %c0_33 = arith.constant 0 : index
      %c0_34 = arith.constant 0 : index
      %c0_35 = arith.constant 0 : index
      %72 = vector.load %arg5[%c0_33, %c0_34, %c0_35] : memref<1x1x128xf32, #tpu.memory_space<vmem>>, vector<1x1x128xf32>
      tpu.vector_store %arg5[%c0_33, %c0_34, %c0_35], %71 {strides = array<i32>} : memref<1x1x128xf32, #tpu.memory_space<vmem>>, vector<1x1x128xf32>,
      %73 = arith.mulf %68, %68 : vector<32x128xf32>
      %cst_36 = arith.constant dense<0.000000e+00> : vector<128xf32>
      %74 = vector.multi_reduction <add>, %73, %cst_36 [0] : vector<32x128xf32> to vector<128xf32>
      %75 = vector.shape_cast %74 : vector<128xf32> to vector<1x128xf32>
      %76 = vector.shape_cast %75 : vector<1x128xf32> to vector<1x1x128xf32>
      %c0_37 = arith.constant 0 : index
      %c0_38 = arith.constant 0 : index
      %c0_39 = arith.constant 0 : index
      %77 = vector.load %arg6[%c0_37, %c0_38, %c0_39] : memref<1x1x128xf32, #tpu.memory_space<vmem>>, vector<1x1x128xf32>
      tpu.vector_store %arg6[%c0_37, %c0_38, %c0_39], %76 {strides = array<i32>} : memref<1x1x128xf32, #tpu.memory_space<vmem>>, vector<1x1x128xf32>,
      %78 = vector.shape_cast %41 : vector<32x128xf32> to vector<4x8x128xf32>
      %c0_40 = arith.constant 0 : index
      %c0_41 = arith.constant 0 : index
      %c0_42 = arith.constant 0 : index
      %79 = vector.load %arg4[%c0_40, %c0_41, %c0_42] : memref<4x8x128xf32, #tpu.memory_space<vmem>>, vector<4x8x128xf32>
      tpu.vector_store %arg4[%c0_40, %c0_41, %c0_42], %78 {strides = array<i32>} : memref<4x8x128xf32, #tpu.memory_space<vmem>>, vector<4x8x128xf32>,
    } else {
    }
    return
  }
  func.func @transform_0(%arg0: i32, %arg1: i32) -> (i32, i32, i32, i32) {
    %c0_i32 = arith.constant 0 : i32
    %c0_i32_0 = arith.constant 0 : i32
    %c0_i32_1 = arith.constant 0 : i32
    return %arg1, %arg0, %c0_i32, %c0_i32_0 : i32, i32, i32, i32
  }
  func.func @transform_1(%arg0: i32, %arg1: i32) -> (i32, i32, i32) {
    %c0_i32 = arith.constant 0 : i32
    %c0_i32_0 = arith.constant 0 : i32
    %c0_i32_1 = arith.constant 0 : i32
    %c0_i32_2 = arith.constant 0 : i32
    return %c0_i32, %c0_i32_0, %c0_i32_1 : i32, i32, i32
  }
  func.func @transform_2(%arg0: i32, %arg1: i32) -> (i32, i32, i32) {
    %c0_i32 = arith.constant 0 : i32
    %c0_i32_0 = arith.constant 0 : i32
    %c0_i32_1 = arith.constant 0 : i32
    return %arg0, %c0_i32, %c0_i32_0 : i32, i32, i32
  }
  func.func @transform_3(%arg0: i32, %arg1: i32) -> (i32, i32, i32) {
    %c0_i32 = arith.constant 0 : i32
    %c0_i32_0 = arith.constant 0 : i32
    %c0_i32_1 = arith.constant 0 : i32
    return %arg0, %c0_i32, %c0_i32_0 : i32, i32, i32
  }
  func.func @transform_4(%arg0: i32, %arg1: i32) -> (i32, i32, i32) {
    %c0_i32 = arith.constant 0 : i32
    %c0_i32_0 = arith.constant 0 : i32
    %c0_i32_1 = arith.constant 0 : i32
    return %arg0, %c0_i32, %c0_i32_0 : i32, i32, i32
  }
}

module attributes {stable_mosaic.version = 11 : i64} {
  func.func @_conv_tap_kernel(%arg0: i32, %arg1: i32, %arg2: memref<1x5x11x128xf32, #tpu.memory_space<vmem>>, %arg3: memref<16x128x128xf32, #tpu.memory_space<vmem>>, %arg4: memref<1x128xf32, #tpu.memory_space<vmem>>, %arg5: memref<5x8x128xf32, #tpu.memory_space<vmem>>, %arg6: memref<40x128xf32, #tpu.memory_space<vmem>>) attributes {dimension_semantics = [#tpu.dimension_semantics<parallel>, #tpu.dimension_semantics<arbitrary>], iteration_bounds = array<i64: 2, 4>, scalar_prefetch = 0 : i64, scratch_operands = 1 : i64, tpu.core_type = #tpu.core_type<tc>, window_params = [{transform_indices = @transform_0, window_bounds = array<i64: 1, 5, 11, 128>}, {pipeline_mode = #tpu.pipeline_mode<synchronous>, transform_indices = @transform_1, window_bounds = array<i64: 16, 128, 128>}, {pipeline_mode = #tpu.pipeline_mode<synchronous>, transform_indices = @transform_2, window_bounds = array<i64: 1, 128>}, {transform_indices = @transform_3, window_bounds = array<i64: 5, 8, 128>}]} {
    %c0_i32 = arith.constant 0 : i32
    %0 = arith.cmpi eq, %arg1, %c0_i32 : i32
    %1 = arith.extui %0 : i1 to i32
    %c0_i32_0 = arith.constant 0 : i32
    %2 = arith.cmpi ne, %1, %c0_i32_0 : i32
    scf.if %2 {
      %cst_25 = arith.constant 0.000000e+00 : f32
      %46 = vector.broadcast %cst_25 : f32 to vector<40x128xf32>
      %c0_26 = arith.constant 0 : index
      %c0_27 = arith.constant 0 : index
      %47 = vector.load %arg6[%c0_26, %c0_27] : memref<40x128xf32, #tpu.memory_space<vmem>>, vector<40x128xf32>
      tpu.vector_store %arg6[%c0_26, %c0_27], %46 {strides = array<i32>} : memref<40x128xf32, #tpu.memory_space<vmem>>, vector<40x128xf32>,
    } else {
    }
    %c0 = arith.constant 0 : index
    %c0_1 = arith.constant 0 : index
    %c0_2 = arith.constant 0 : index
    %c0_3 = arith.constant 0 : index
    %3 = vector.load %arg2[%c0, %c0_1, %c0_2, %c0_3] : memref<1x5x11x128xf32, #tpu.memory_space<vmem>>, vector<1x5x11x128xf32>
    %4 = vector.shape_cast %3 : vector<1x5x11x128xf32> to vector<5x11x128xf32>
    %c0_4 = arith.constant 0 : index
    %c0_5 = arith.constant 0 : index
    %5 = vector.load %arg6[%c0_4, %c0_5] : memref<40x128xf32, #tpu.memory_space<vmem>>, vector<40x128xf32>
    %6 = vector.extract_strided_slice %4 {offsets = [0, 0, 0], sizes = [5, 8, 128], strides = [1, 1, 1]} : vector<5x11x128xf32> to vector<5x8x128xf32>
    %7 = vector.shape_cast %6 : vector<5x8x128xf32> to vector<40x128xf32>
    %c4_i32 = arith.constant 4 : i32
    %8 = arith.muli %arg1, %c4_i32 : i32
    %c0_i32_6 = arith.constant 0 : i32
    %9 = arith.addi %8, %c0_i32_6 : i32
    %10 = arith.index_cast %9 : i32 to index
    %c0_7 = arith.constant 0 : index
    %c0_8 = arith.constant 0 : index
    %11 = vector.load %arg3[%10, %c0_7, %c0_8] : memref<16x128x128xf32, #tpu.memory_space<vmem>>, vector<1x128x128xf32>
    %12 = vector.shape_cast %11 : vector<1x128x128xf32> to vector<128x128xf32>
    %cst = arith.constant dense<0.000000e+00> : vector<40x128xf32>
    %13 = tpu.matmul %7, %12, %cst {dimension_numbers = #tpu.dot_dimension_numbers<[1], [0], [0], [1], [0, 0, 1, 1], [], []>} : vector<40x128xf32>, vector<128x128xf32>, vector<40x128xf32> -> vector<40x128xf32>
    %14 = arith.addf %5, %13 : vector<40x128xf32>
    %15 = vector.extract_strided_slice %4 {offsets = [0, 1, 0], sizes = [5, 8, 128], strides = [1, 1, 1]} : vector<5x11x128xf32> to vector<5x8x128xf32>
    %16 = vector.shape_cast %15 : vector<5x8x128xf32> to vector<40x128xf32>
    %c4_i32_9 = arith.constant 4 : i32
    %17 = arith.muli %arg1, %c4_i32_9 : i32
    %c1_i32 = arith.constant 1 : i32
    %18 = arith.addi %17, %c1_i32 : i32
    %19 = arith.index_cast %18 : i32 to index
    %c0_10 = arith.constant 0 : index
    %c0_11 = arith.constant 0 : index
    %20 = vector.load %arg3[%19, %c0_10, %c0_11] : memref<16x128x128xf32, #tpu.memory_space<vmem>>, vector<1x128x128xf32>
    %21 = vector.shape_cast %20 : vector<1x128x128xf32> to vector<128x128xf32>
    %cst_12 = arith.constant dense<0.000000e+00> : vector<40x128xf32>
    %22 = tpu.matmul %16, %21, %cst_12 {dimension_numbers = #tpu.dot_dimension_numbers<[1], [0], [0], [1], [0, 0, 1, 1], [], []>} : vector<40x128xf32>, vector<128x128xf32>, vector<40x128xf32> -> vector<40x128xf32>
    %23 = arith.addf %14, %22 : vector<40x128xf32>
    %24 = vector.extract_strided_slice %4 {offsets = [0, 2, 0], sizes = [5, 8, 128], strides = [1, 1, 1]} : vector<5x11x128xf32> to vector<5x8x128xf32>
    %25 = vector.shape_cast %24 : vector<5x8x128xf32> to vector<40x128xf32>
    %c4_i32_13 = arith.constant 4 : i32
    %26 = arith.muli %arg1, %c4_i32_13 : i32
    %c2_i32 = arith.constant 2 : i32
    %27 = arith.addi %26, %c2_i32 : i32
    %28 = arith.index_cast %27 : i32 to index
    %c0_14 = arith.constant 0 : index
    %c0_15 = arith.constant 0 : index
    %29 = vector.load %arg3[%28, %c0_14, %c0_15] : memref<16x128x128xf32, #tpu.memory_space<vmem>>, vector<1x128x128xf32>
    %30 = vector.shape_cast %29 : vector<1x128x128xf32> to vector<128x128xf32>
    %cst_16 = arith.constant dense<0.000000e+00> : vector<40x128xf32>
    %31 = tpu.matmul %25, %30, %cst_16 {dimension_numbers = #tpu.dot_dimension_numbers<[1], [0], [0], [1], [0, 0, 1, 1], [], []>} : vector<40x128xf32>, vector<128x128xf32>, vector<40x128xf32> -> vector<40x128xf32>
    %32 = arith.addf %23, %31 : vector<40x128xf32>
    %33 = vector.extract_strided_slice %4 {offsets = [0, 3, 0], sizes = [5, 8, 128], strides = [1, 1, 1]} : vector<5x11x128xf32> to vector<5x8x128xf32>
    %34 = vector.shape_cast %33 : vector<5x8x128xf32> to vector<40x128xf32>
    %c4_i32_17 = arith.constant 4 : i32
    %35 = arith.muli %arg1, %c4_i32_17 : i32
    %c3_i32 = arith.constant 3 : i32
    %36 = arith.addi %35, %c3_i32 : i32
    %37 = arith.index_cast %36 : i32 to index
    %c0_18 = arith.constant 0 : index
    %c0_19 = arith.constant 0 : index
    %38 = vector.load %arg3[%37, %c0_18, %c0_19] : memref<16x128x128xf32, #tpu.memory_space<vmem>>, vector<1x128x128xf32>
    %39 = vector.shape_cast %38 : vector<1x128x128xf32> to vector<128x128xf32>
    %cst_20 = arith.constant dense<0.000000e+00> : vector<40x128xf32>
    %40 = tpu.matmul %34, %39, %cst_20 {dimension_numbers = #tpu.dot_dimension_numbers<[1], [0], [0], [1], [0, 0, 1, 1], [], []>} : vector<40x128xf32>, vector<128x128xf32>, vector<40x128xf32> -> vector<40x128xf32>
    %41 = arith.addf %32, %40 : vector<40x128xf32>
    %c0_21 = arith.constant 0 : index
    %c0_22 = arith.constant 0 : index
    %42 = vector.load %arg6[%c0_21, %c0_22] : memref<40x128xf32, #tpu.memory_space<vmem>>, vector<40x128xf32>
    tpu.vector_store %arg6[%c0_21, %c0_22], %41 {strides = array<i32>} : memref<40x128xf32, #tpu.memory_space<vmem>>, vector<40x128xf32>,
    %c3_i32_23 = arith.constant 3 : i32
    %43 = arith.cmpi eq, %arg1, %c3_i32_23 : i32
    %44 = arith.extui %43 : i1 to i32
    %c0_i32_24 = arith.constant 0 : i32
    %45 = arith.cmpi ne, %44, %c0_i32_24 : i32
    scf.if %45 {
      %c0_25 = arith.constant 0 : index
      %c0_26 = arith.constant 0 : index
      %46 = vector.load %arg4[%c0_25, %c0_26] : memref<1x128xf32, #tpu.memory_space<vmem>>, vector<1x128xf32>
      %47 = vector.broadcast %46 : vector<1x128xf32> to vector<40x128xf32>
      %48 = arith.addf %41, %47 : vector<40x128xf32>
      %49 = vector.shape_cast %48 : vector<40x128xf32> to vector<5x8x128xf32>
      %c0_27 = arith.constant 0 : index
      %c0_28 = arith.constant 0 : index
      %c0_29 = arith.constant 0 : index
      %50 = vector.load %arg5[%c0_27, %c0_28, %c0_29] : memref<5x8x128xf32, #tpu.memory_space<vmem>>, vector<5x8x128xf32>
      tpu.vector_store %arg5[%c0_27, %c0_28, %c0_29], %49 {strides = array<i32>} : memref<5x8x128xf32, #tpu.memory_space<vmem>>, vector<5x8x128xf32>,
    } else {
    }
    return
  }
  func.func @transform_0(%arg0: i32, %arg1: i32) -> (i32, i32, i32, i32) {
    %c0_i32 = arith.constant 0 : i32
    %c0_i32_0 = arith.constant 0 : i32
    %c0_i32_1 = arith.constant 0 : i32
    return %arg1, %arg0, %c0_i32, %c0_i32_0 : i32, i32, i32, i32
  }
  func.func @transform_1(%arg0: i32, %arg1: i32) -> (i32, i32, i32) {
    %c0_i32 = arith.constant 0 : i32
    %c0_i32_0 = arith.constant 0 : i32
    %c0_i32_1 = arith.constant 0 : i32
    %c0_i32_2 = arith.constant 0 : i32
    return %c0_i32, %c0_i32_0, %c0_i32_1 : i32, i32, i32
  }
  func.func @transform_2(%arg0: i32, %arg1: i32) -> (i32, i32) {
    %c0_i32 = arith.constant 0 : i32
    %c0_i32_0 = arith.constant 0 : i32
    %c0_i32_1 = arith.constant 0 : i32
    return %c0_i32, %c0_i32_0 : i32, i32
  }
  func.func @transform_3(%arg0: i32, %arg1: i32) -> (i32, i32, i32) {
    %c0_i32 = arith.constant 0 : i32
    %c0_i32_0 = arith.constant 0 : i32
    %c0_i32_1 = arith.constant 0 : i32
    return %arg0, %c0_i32, %c0_i32_0 : i32, i32, i32
  }
}

</mosaic_0001>

<bundles_post_ra>
// kernel: _lambda_.5
= control target key start
LH: loop header
LB: loop body
LE: loop exit
PB: predicated region body
PF: predicated region fallthrough
CT: control target
= control target key end

     0   :  { %s968_s12 = smov 0   ;;  %s970_s13 = smov 0   ;;  %s1215_s0 = inlined_call_operand.vmem [shape: f32[8,18,17,8], index: 0, kind: input, shape index: {}]   ;;  %s1216_s1 = inlined_call_operand.vmem [shape: f32[16,8,128], index: 1, kind: input, shape index: {}]   ;;  %s1217_s2 = inlined_call_operand.vmem [shape: f32[1,128], index: 2, kind: input, shape index: {}]   ;;  %s1218_s3 = inlined_call_operand.vmem [shape: f32[18,16,128], index: 3, kind: output, shape index: {}]  }
   0x1   :  { %s972_s14 = smov 0   ;;  %s974_s15 = smov 0  }
   0x2   :  { %s976_s16 = smov 0  }
   0x3 LB: > { %s22_s17 = sadd.s32 1, %s937_s14  ;;  %s25_s18 = sadd.s32 1, %s941_s15  ;;  %s945_s16 = sphi %s976_s16, %s13_s16   ;;  %s941_s15 = sphi %s974_s15, %s1222_s15   ;;  %s937_s14 = sphi %s972_s14, %s1221_s14   ;;  %s933_s13 = sphi %s970_s13, %s1220_s13   ;;  %s929_s12 = sphi %s968_s12, %s1219_s12  }
   0x4   : > { %p23_p0 = scmp.ge.s32.totalorder %s22_s17, 8  ;;  %p809_p1 = scmp.ge.s32.totalorder %s945_s16, 1 }
   0x5   : > { %p157_p2 = scmp.lt.s32.totalorder %s945_s16, 17 }
   0x6   : > { %s1224_s17 = smov (%p23_p0, %s22_s17), 0  ;;  %s1226_s18 = smov (!%p23_p0, %s25_s18), %s941_s15 }
   0x7   : > { %p158_p3 = pnand %p809_p1, %p157_p2  ;;  %p27_p4 = scmp.ge.s32.totalorder %s1226_s18, 2 }
   0x8   : > { %s187_s19 = smul.u32 (!%p158_p3), 9, %s933_s13  ;;  %p188_p5 = scmp.lt.s32.totalorder (!%p158_p3), %s929_s12, 7 }
   0x9   : > { %s1228_s18 = smov (%p27_p4, %s1226_s18), 0  ;;  %161 = sbr.rel (%p158_p3) target bundleno = 271 (0x10f), region = 32 }
   0xa   : > { %p190_p6 = scmp.lt.s32.totalorder (!%p158_p3), %s187_s19, 17  ;;  %p813_p7 = scmp.ne.s32.totalorder (!%p158_p3), %s929_s12, 0 }
   0xe   : > { %s189_s20 = scalar_select %p188_p5, %s929_s12, 7 }
   0xf   : > { %s1230_s19 = smov (!%p190_p6, %s187_s19), 17 }
  0x10   : > { %s864_s21 = smul.u32 54, %s189_s20  ;;  %s858_s23 = sshll.u32 %s1230_s19, 4 }
  0x11   : > { %s863_s22 = smul.u32 3, %s1230_s19  ;;  %s1005_s26 = scalar_lea.vmem %s1218_s3, %s858_s23 }
  0x12   : > { %208 = sbr.rel (%p813_p7) target bundleno = 42 (0x2a), region = 36 }
  0x13   : > { %s194_s27 = sadd.s32 %s864_s21, %s863_s22 }
  0x14   : > { %s810_s28 = sshll.u32 %s194_s27, 3 }
  0x15   : > { %s1010_s4 = scalar_lea.vmem %s1215_s0, %s810_s28 }
  0x17   : > { %v947_v0 = vmov 0.0  }
  0x18   : > { %209 = vst [vmem:[#allocation2] sm:$0xff] %v947_v0 }
  0x19   : > { %210 = vst [vmem:[#allocation2 + $0x38] sm:$0xff] %v947_v0 }
  0x1a   : > { %211 = vst [vmem:[#allocation2 + $0x78] sm:$0xff] %v947_v0 }
  0x1b   : > { %212 = vst [vmem:[#allocation2 + $0x58] sm:$0xff] %v947_v0 }
  0x1c   : > { %213 = vst [vmem:[#allocation2 + $0x20] sm:$0xff] %v947_v0 }
  0x1d   : > { %214 = vst [vmem:[#allocation2 + $0x8] sm:$0xff] %v947_v0 }
  0x1e   : > { %215 = vst [vmem:[#allocation2 + $0x70] sm:$0xff] %v947_v0 }
  0x1f   : > { %216 = vst [vmem:[#allocation2 + $0x80] sm:$0xff] %v947_v0 }
  0x20   : > { %217 = vst [vmem:[#allocation2 + $0x88] sm:$0xff] %v947_v0 }
  0x21   : > { %218 = vst [vmem:[#allocation2 + $0x40] sm:$0xff] %v947_v0 }
  0x22   : > { %219 = vst [vmem:[#allocation2 + $0x50] sm:$0xff] %v947_v0 }
  0x23   : > { %220 = vst [vmem:[#allocation2 + $0x28] sm:$0xff] %v947_v0 }
  0x24   : > { %221 = vst [vmem:[#allocation2 + $0x10] sm:$0xff] %v947_v0 }
  0x25   : > { %222 = vst [vmem:[#allocation2 + $0x48] sm:$0xff] %v947_v0 }
  0x26   : > { %223 = vst [vmem:[#allocation2 + $0x30] sm:$0xff] %v947_v0 }
  0x27   : > { %224 = vst [vmem:[#allocation2 + $0x18] sm:$0xff] %v947_v0 }
  0x28   : > { %225 = vst [vmem:[#allocation2 + $0x68] sm:$0xff] %v947_v0 }
  0x29   : > { %226 = vst [vmem:[#allocation2 + $0x60] sm:$0xff] %v947_v0 }
  0x2a PF: > { %s859_s5 = sshll.u32 %s929_s12, 4  ;;  %v1015_v1 = vld [vmem:[%s1010_s4 + $0x68] sm:$0xff]  ;;  %v241_v2 = vld [vmem:[%s1010_s4 + $0x70] sm:$0x1]  ;;  %vm429_vm0 = vcmask 1046528   ;;  %vm276_vm1 = vcmask 64512  }
  0x2b   : > { %s274_s8 = scalar_lea.vmem %s1216_s1, %s859_s5  ;;  %v451_v3 = vrot.slane %v1015_v1, 1  ;;  %v453_v4 = vrot.slane %v241_v2, 1  ;;  %v227_v5 = vld [vmem:[%s1010_s4] sm:$0xff]  ;;  %v242_v6 = vld [vmem:[%s1010_s4 + $0x78] sm:$0xff]  ;;  %v228_v7 = vld [vmem:[%s1010_s4 + $0x8] sm:$0xff]  ;;  %p855_p8 = scmp.ne.s32.totalorder %s929_s12, 7 }
  0x2c   : > { %v275_v8 = vld [vmem:[%s274_s8] sm:$0xff]  ;;  %v836_v9 = vld [vmem:[%s274_s8 + $0x8] sm:$0xff]  ;;  %v430_v10 = vrot.slane %v227_v5, 1  ;;  %v431_v11 = vrot.slane %v228_v7, 1  ;;  %v229_v15 = vld [vmem:[%s1010_s4 + $0x10] sm:$0x1] }
  0x2d   : > { %v243_v12 = vld [vmem:[%s1010_s4 + $0x80] sm:$0xff]  ;;  %861 = vmatpush.msra.mxu2 %v275_v8  ;;  %862 = vmatpush.msra.mxu3 %v836_v9  ;;  %v454_v13 = vsel %vm429_vm0, %v451_v3, %v453_v4  ;;  %v455_v16 = vrot.slane %v242_v6, 1  ;;  %v433_v18 = vrot.slane %v229_v15, 1  ;;  %v244_v20 = vld [vmem:[%s1010_s4 + $0x88] sm:$0x1]  ;;  %v230_v22 = vld [vmem:[%s1010_s4 + $0x18] sm:$0xff] }
  0x2e   : > { %825 = vmatmul.msk.f32.vlgmr.msra.gmra.mxu2 %vm276_vm1, %v1015_v1  ;;  %846 = vmatmul.msk.f32.vlgmr.msra.gmra.mxu3 %vm276_vm1, %v454_v13  ;;  %v432_v14 = vsel %vm429_vm0, %v430_v10, %v431_v11  ;;  %v456_v17 = vrot.slane %v243_v12, 1  ;;  %v231_v23 = vld [vmem:[%s1010_s4 + $0x20] sm:$0xff]  ;;  %v458_v24 = vrot.slane %v244_v20, 1  ;;  %v435_v25 = vrot.slane %v230_v22, 1  ;;  %v245_v28 = vld [vmem:[%s1010_s4 + $0x90] sm:$0xff]  ;;  %v246_v29 = vld [vmem:[%s1010_s4 + $0x98] sm:$0xff] }
  0x2f   : > { %346 = vmatpush.msra.mxu0 %v275_v8  ;;  %530 = vmatpush.msra.mxu1 %v836_v9  ;;  %v434_v21 = vsel %vm429_vm0, %v431_v11, %v433_v18  ;;  %v436_v26 = vrot.slane %v231_v23, 1  ;;  %v232_v31 = vld [vmem:[%s1010_s4 + $0x28] sm:$0x1]  ;;  %v460_v32 = vrot.slane %v245_v28, 1  ;;  %v461_v33 = vrot.slane %v246_v29, 1  ;;  %v233_v38 = vld [vmem:[%s1010_s4 + $0x30] sm:$0xff] }
  0x30   : > { %816 = vmatmul.msk.f32.vlgmr.msra.gmra.mxu0 %vm276_vm1, %v227_v5  ;;  %837 = vmatmul.msk.f32.vlgmr.msra.gmra.mxu1 %vm276_vm1, %v432_v14  ;;  %v457_v19 = vsel %vm429_vm0, %v455_v16, %v456_v17  ;;  %v459_v27 = vsel %vm429_vm0, %v456_v17, %v458_v24  ;;  %v438_v34 = vrot.slane %v232_v31, 1  ;;  %v247_v36 = vld [vmem:[%s1010_s4 + $0xa0] sm:$0x1]  ;;  %v234_v39 = vld [vmem:[%s1010_s4 + $0x38] sm:$0xff]  ;;  %v440_v41 = vrot.slane %v233_v38, 1  ;;  %v248_v44 = vld [vmem:[%s1010_s4 + $0xa8] sm:$0xff] }
  0x31   : > { %v437_v30 = vsel %vm429_vm0, %v435_v25, %v436_v26  ;;  %v462_v35 = vsel %vm429_vm0, %v460_v32, %v461_v33  ;;  %v463_v40 = vrot.slane %v247_v36, 1  ;;  %v441_v42 = vrot.slane %v234_v39, 1  ;;  %v249_v45 = vld [vmem:[%s1010_s4 + $0xb0] sm:$0xff]  ;;  %v235_v47 = vld [vmem:[%s1010_s4 + $0x40] sm:$0x1]  ;;  %v236_v57 = vld [vmem:[%s1010_s4 + $0x48] sm:$0xff] }
  0x32   : > { %v439_v37 = vsel %vm429_vm0, %v436_v26, %v438_v34  ;;  %v239_v48 = vld [vmem:[%s1010_s4 + $0x60] sm:$0xff]  ;;  %v465_v49 = vrot.slane %v248_v44, 1  ;;  %v466_v50 = vrot.slane %v249_v45, 1  ;;  %v443_v52 = vrot.slane %v235_v47, 1  ;;  %v250_v55 = vld [vmem:[%s1010_s4 + $0xb8] sm:$0x1] }
  0x33   : > { %v464_v43 = vsel %vm429_vm0, %v461_v33, %v463_v40  ;;  %v442_v46 = vsel %vm429_vm0, %v440_v41, %v441_v42  ;;  %v450_v51 = vrot.slane %v239_v48, 1  ;;  %v237_v58 = vld [vmem:[%s1010_s4 + $0x50] sm:$0xff]  ;;  %v468_v59 = vrot.slane %v250_v55, 1  ;;  %v251_v63 = vld [vmem:[%s1010_s4 + $0xc0] sm:$0xff]  ;;  %v252_v0 = vld [vmem:[%s1010_s4 + $0xc8] sm:$0xff] }
  0x34   : > { %v467_v54 = vsel %vm429_vm0, %v465_v49, %v466_v50  ;;  %v444_v56 = vsel %vm429_vm0, %v441_v42, %v443_v52  ;;  %v445_v60 = vrot.slane %v236_v57, 1  ;;  %v446_v61 = vrot.slane %v237_v58, 1  ;;  %v238_v2 = vld [vmem:[%s1010_s4 + $0x58] sm:$0x1]  ;;  %v254_v11 = vld [vmem:[#allocation2] sm:$0xff]  ;;  %v264_v25 = vld [vmem:[#allocation2 + $0x50] sm:$0xff] }
  0x35   : > { %v452_v53 = vsel %vm429_vm0, %v450_v51, %v451_v3  ;;  %v469_v62 = vsel %vm429_vm0, %v466_v50, %v468_v59  ;;  %v470_v3 = vrot.slane %v251_v63, 1  ;;  %v471_v4 = vrot.slane %v252_v0, 1  ;;  %v263_v15 = vld [vmem:[#allocation2 + $0x40] sm:$0xff]  ;;  %v255_v20 = vld [vmem:[#allocation2 + $0x38] sm:$0xff]  ;;  %v267_v55 = vld [vmem:[#allocation2 + $0x48] sm:$0xff] }
  0x36   : > { %826 = vmatmul.msk.f32.gmra.mxu2 %vm276_vm1, %v242_v6  ;;  %847 = vmatmul.msk.f32.gmra.mxu3 %vm276_vm1, %v457_v19  ;;  %v447_v1 = vsel %vm429_vm0, %v445_v60, %v446_v61  ;;  %v448_v5 = vrot.slane %v238_v2, 1  ;;  %v257_v40 = vld [vmem:[#allocation2 + $0x58] sm:$0xff]  ;;  %v258_v50 = vld [vmem:[#allocation2 + $0x20] sm:$0xff]  ;;  %v259_v60 = vld [vmem:[#allocation2 + $0x8] sm:$0xff] }
  0x37   : > { %v472_v6 = vsel %vm429_vm0, %v470_v3, %v471_v4 }
  0x38   : > { %817 = vmatmul.msk.f32.gmra.mxu0 %vm276_vm1, %v228_v7  ;;  %838 = vmatmul.msk.f32.gmra.mxu1 %vm276_vm1, %v434_v21  ;;  %v253_v7 = vld [vmem:[%s1010_s4 + $0xd0] sm:$0x1]  ;;  %v449_v8 = vsel %vm429_vm0, %v446_v61, %v448_v5 }
  0x39   : > { %v473_v9 = vrot.slane %v253_v7, 1 }
  0x3b   : > { %v474_v10 = vsel %vm429_vm0, %v471_v4, %v473_v9 }
  0x3e   : > { %827 = vmatmul.msk.f32.gmra.mxu2 %vm276_vm1, %v243_v12  ;;  %848 = vmatmul.msk.f32.gmra.mxu3 %vm276_vm1, %v459_v27 }
  0x40   : > { %818 = vmatmul.msk.f32.gmra.mxu0 %vm276_vm1, %v230_v22  ;;  %839 = vmatmul.msk.f32.gmra.mxu1 %vm276_vm1, %v437_v30  ;;  %v256_v30 = vld [vmem:[#allocation2 + $0x78] sm:$0xff] }
  0x46   : > { %828 = vmatmul.msk.f32.gmra.mxu2 %vm276_vm1, %v245_v28  ;;  %849 = vmatmul.msk.f32.gmra.mxu3 %vm276_vm1, %v462_v35  ;;  %v265_v35 = vld [vmem:[#allocation2 + $0x28] sm:$0xff] }
  0x48   : > { %819 = vmatmul.msk.f32.gmra.mxu0 %vm276_vm1, %v231_v23  ;;  %840 = vmatmul.msk.f32.gmra.mxu1 %vm276_vm1, %v439_v37 }
  0x4e   : > { %829 = vmatmul.msk.f32.gmra.mxu2 %vm276_vm1, %v246_v29  ;;  %850 = vmatmul.msk.f32.gmra.mxu3 %vm276_vm1, %v464_v43 }
  0x50   : > { %820 = vmatmul.msk.f32.gmra.mxu0 %vm276_vm1, %v233_v38  ;;  %841 = vmatmul.msk.f32.gmra.mxu1 %vm276_vm1, %v442_v46 }
  0x56   : > { %830 = vmatmul.msk.f32.gmra.mxu2 %vm276_vm1, %v248_v44  ;;  %851 = vmatmul.msk.f32.gmra.mxu3 %vm276_vm1, %v467_v54 }
  0x58   : > { %821 = vmatmul.msk.f32.gmra.mxu0 %vm276_vm1, %v234_v39  ;;  %842 = vmatmul.msk.f32.gmra.mxu1 %vm276_vm1, %v444_v56 }
  0x5e   : > { %831 = vmatmul.msk.f32.gmra.mxu2 %vm276_vm1, %v249_v45  ;;  %852 = vmatmul.msk.f32.gmra.mxu3 %vm276_vm1, %v469_v62  ;;  %v266_v45 = vld [vmem:[#allocation2 + $0x10] sm:$0xff] }
  0x60   : > { %822 = vmatmul.msk.f32.gmra.mxu0 %vm276_vm1, %v236_v57  ;;  %843 = vmatmul.msk.f32.gmra.mxu1 %vm276_vm1, %v447_v1  ;;  %v268_v1 = vld [vmem:[#allocation2 + $0x30] sm:$0xff] }
  0x66   : > { %832 = vmatmul.msk.f32.gmra.mxu2 %vm276_vm1, %v251_v63  ;;  %853 = vmatmul.msk.f32.gmra.mxu3 %vm276_vm1, %v472_v6  ;;  %v260_v6 = vld [vmem:[#allocation2 + $0x70] sm:$0xff] }
  0x68   : > { %823 = vmatmul.msk.f32.gmra.mxu0 %vm276_vm1, %v237_v58  ;;  %844 = vmatmul.msk.f32.gmra.mxu1 %vm276_vm1, %v449_v8 }
  0x6e   : > { %833 = vmatmul.msk.f32.gmra.mxu2 %vm276_vm1, %v252_v0  ;;  %854 = vmatmul.msk.f32.gmra.mxu3 %vm276_vm1, %v474_v10 }
  0x70   : > { %824 = vmatmul.msk.f32.gmra.mxu0 %vm276_vm1, %v239_v48  ;;  %845 = vmatmul.msk.f32.gmra.mxu1 %vm276_vm1, %v452_v53 }
  0xad   : > { %v348_v12 = vpop.f32.mrf.mxu0  ;;  %v532_v13 = vpop.f32.mrf.mxu1 }
  0xae   : > { %v402_v14 = vadd.f32 %v348_v12, %v254_v11  ;;  %v269_v11 = vld [vmem:[#allocation2 + $0x18] sm:$0xff] }
  0xb0   : > { %v1106_v16 = vadd.f32 %v532_v13, %v402_v14 }
  0xb1   : > { %v375_v17 = vpop.f32.mrf.mxu2  ;;  %v559_v18 = vpop.f32.mrf.mxu3 }
  0xb2   : > { %v411_v19 = vadd.f32 %v375_v17, %v263_v15  ;;  %604 = vst [vmem:[#allocation2] sm:$0xff] %v1106_v16  ;;  %v261_v17 = vld [vmem:[#allocation2 + $0x80] sm:$0xff] }
  0xb4   : > { %v1109_v21 = vadd.f32 %v559_v18, %v411_v19 }
  0xb5   : > { %v351_v22 = vpop.f32.mrf.mxu0  ;;  %v535_v23 = vpop.f32.mrf.mxu1 }
  0xb6   : > { %613 = vst [vmem:[#allocation2 + $0x40] sm:$0xff] %v1109_v21  ;;  %v403_v24 = vadd.f32 %v351_v22, %v255_v20 }
  0xb8   : > { %v1112_v26 = vadd.f32 %v535_v23, %v403_v24  ;;  %v270_v23 = vld [vmem:[#allocation2 + $0x68] sm:$0xff] }
  0xb9   : > { %v378_v27 = vpop.f32.mrf.mxu2  ;;  %v562_v28 = vpop.f32.mrf.mxu3 }
  0xba   : > { %v412_v29 = vadd.f32 %v378_v27, %v264_v25  ;;  %605 = vst [vmem:[#allocation2 + $0x38] sm:$0xff] %v1112_v26 }
  0xbc   : > { %v1115_v31 = vadd.f32 %v562_v28, %v412_v29  ;;  %v262_v29 = vld [vmem:[#allocation2 + $0x88] sm:$0xff] }
  0xbd   : > { %v354_v32 = vpop.f32.mrf.mxu0  ;;  %v538_v33 = vpop.f32.mrf.mxu1 }
  0xbe   : > { %614 = vst [vmem:[#allocation2 + $0x50] sm:$0xff] %v1115_v31  ;;  %v404_v34 = vadd.f32 %v354_v32, %v256_v30 }
  0xc0   : > { %v1118_v36 = vadd.f32 %v538_v33, %v404_v34 }
  0xc1   : > { %v381_v37 = vpop.f32.mrf.mxu2  ;;  %v565_v38 = vpop.f32.mrf.mxu3 }
  0xc2   : > { %v413_v39 = vadd.f32 %v381_v37, %v265_v35  ;;  %606 = vst [vmem:[#allocation2 + $0x78] sm:$0xff] %v1118_v36  ;;  %v271_v35 = vld [vmem:[#allocation2 + $0x60] sm:$0xff] }
  0xc4   : > { %v1121_v41 = vadd.f32 %v565_v38, %v413_v39 }
  0xc5   : > { %v357_v42 = vpop.f32.mrf.mxu0  ;;  %v541_v43 = vpop.f32.mrf.mxu1 }
  0xc6   : > { %615 = vst [vmem:[#allocation2 + $0x28] sm:$0xff] %v1121_v41  ;;  %v405_v44 = vadd.f32 %v357_v42, %v257_v40 }
  0xc8   : > { %v1124_v46 = vadd.f32 %v541_v43, %v405_v44 }
  0xc9   : > { %v384_v47 = vpop.f32.mrf.mxu2  ;;  %v568_v48 = vpop.f32.mrf.mxu3 }
  0xca   : > { %v414_v49 = vadd.f32 %v384_v47, %v266_v45  ;;  %607 = vst [vmem:[#allocation2 + $0x58] sm:$0xff] %v1124_v46 }
  0xcc   : > { %v1127_v51 = vadd.f32 %v568_v48, %v414_v49 }
  0xcd   : > { %v360_v52 = vpop.f32.mrf.mxu0  ;;  %v544_v53 = vpop.f32.mrf.mxu1 }
  0xce   : > { %616 = vst [vmem:[#allocation2 + $0x10] sm:$0xff] %v1127_v51  ;;  %v406_v54 = vadd.f32 %v360_v52, %v258_v50 }
  0xd0   : > { %v590_v56 = vadd.f32 %v544_v53, %v406_v54 }
  0xd1   : > { %v387_v57 = vpop.f32.mrf.mxu2  ;;  %v571_v58 = vpop.f32.mrf.mxu3 }
  0xd2   : > { %v415_v59 = vadd.f32 %v387_v57, %v267_v55  ;;  %608 = vst [vmem:[#allocation2 + $0x20] sm:$0xff] %v590_v56 }
  0xd4   : > { %v1130_v61 = vadd.f32 %v571_v58, %v415_v59 }
  0xd5   : > { %v363_v62 = vpop.f32.mrf.mxu0  ;;  %v547_v63 = vpop.f32.mrf.mxu1 }
  0xd6   : > { %617 = vst [vmem:[#allocation2 + $0x48] sm:$0xff] %v1130_v61  ;;  %v407_v0 = vadd.f32 %v363_v62, %v259_v60 }
  0xd8   : > { %v591_v2 = vadd.f32 %v547_v63, %v407_v0 }
  0xd9   : > { %v390_v3 = vpop.f32.mrf.mxu2  ;;  %v574_v4 = vpop.f32.mrf.mxu3 }
  0xda   : > { %v416_v5 = vadd.f32 %v390_v3, %v268_v1  ;;  %609 = vst [vmem:[#allocation2 + $0x8] sm:$0xff] %v591_v2 }
  0xdc   : > { %v1133_v7 = vadd.f32 %v574_v4, %v416_v5 }
  0xdd   : > { %v366_v8 = vpop.f32.mrf.mxu0  ;;  %v550_v9 = vpop.f32.mrf.mxu1 }
  0xde   : > { %618 = vst [vmem:[#allocation2 + $0x30] sm:$0xff] %v1133_v7  ;;  %v408_v10 = vadd.f32 %v366_v8, %v260_v6 }
  0xe0   : > { %v592_v12 = vadd.f32 %v550_v9, %v408_v10 }
  0xe1   : > { %v393_v13 = vpop.f32.mrf.mxu2  ;;  %v577_v14 = vpop.f32.mrf.mxu3 }
  0xe2   : > { %v417_v15 = vadd.f32 %v393_v13, %v269_v11  ;;  %610 = vst [vmem:[#allocation2 + $0x70] sm:$0xff] %v592_v12 }
  0xe4   : > { %v1136_v18 = vadd.f32 %v577_v14, %v417_v15 }
  0xe5   : > { %v369_v19 = vpop.f32.mrf.mxu0  ;;  %v553_v20 = vpop.f32.mrf.mxu1 }
  0xe6   : > { %619 = vst [vmem:[#allocation2 + $0x18] sm:$0xff] %v1136_v18  ;;  %v409_v22 = vadd.f32 %v369_v19, %v261_v17 }
  0xe8   : > { %v593_v24 = vadd.f32 %v553_v20, %v409_v22 }
  0xe9   : > { %v396_v25 = vpop.f32.mrf.mxu2  ;;  %v580_v27 = vpop.f32.mrf.mxu3 }
  0xea   : > { %v418_v28 = vadd.f32 %v396_v25, %v270_v23  ;;  %611 = vst [vmem:[#allocation2 + $0x80] sm:$0xff] %v593_v24 }
  0xec   : > { %v1139_v30 = vadd.f32 %v580_v27, %v418_v28 }
  0xed   : > { %v372_v32 = vpop.f32.mrf.mxu0  ;;  %v556_v33 = vpop.f32.mrf.mxu1 }
  0xee   : > { %620 = vst [vmem:[#allocation2 + $0x68] sm:$0xff] %v1139_v30  ;;  %v410_v34 = vadd.f32 %v372_v32, %v262_v29 }
  0xf0   : > { %v594_v37 = vadd.f32 %v556_v33, %v410_v34 }
  0xf1   : > { %v399_v38 = vpop.f32.mrf.mxu2  ;;  %v583_v39 = vpop.f32.mrf.mxu3 }
  0xf2   : > { %v419_v40 = vadd.f32 %v399_v38, %v271_v35  ;;  %612 = vst [vmem:[#allocation2 + $0x88] sm:$0xff] %v594_v37  ;;  %625 = sbr.rel (%p855_p8) target bundleno = 271 (0x10f), region = 40 }
  0xf4   : > { %v1142_v42 = vadd.f32 %v583_v39, %v419_v40 }
  0xf6   : > { %621 = vst [vmem:[#allocation2 + $0x60] sm:$0xff] %v1142_v42 }
  0xf7   : > { %v1149_v43 = vld [vmem:[%s1217_s2] ss:$0 sm:$0xff] }
  0xf8   : > { %v630_v44 = vadd.f32 %v1149_v43, %v1106_v16  ;;  %v631_v45 = vadd.f32 %v1149_v43, %v1112_v26  ;;  %v632_v47 = vadd.f32 %v1149_v43, %v1118_v36  ;;  %v633_v48 = vadd.f32 %v1149_v43, %v1124_v46 }
  0xf9   : > { %v634_v49 = vadd.f32 %v1149_v43, %v590_v56  ;;  %v635_v50 = vadd.f32 %v1149_v43, %v591_v2  ;;  %v636_v52 = vadd.f32 %v1149_v43, %v592_v12  ;;  %v637_v53 = vadd.f32 %v1149_v43, %v593_v24 }
  0xfa   : > { %vm648_vm2 = vcmp.ge.f32.partialorder %v630_v44, 0.0  ;;  %v666_v16 = vmul.f32 0.2, %v630_v44  ;;  %vm649_vm3 = vcmp.ge.f32.partialorder %v631_v45, 0.0  ;;  %v667_v26 = vmul.f32 0.2, %v631_v45 }
  0xfb   : > { %vm650_vm4 = vcmp.ge.f32.partialorder %v632_v47, 0.0  ;;  %v668_v54 = vmul.f32 0.2, %v632_v47  ;;  %vm651_vm5 = vcmp.ge.f32.partialorder %v633_v48, 0.0  ;;  %v669_v36 = vmul.f32 0.2, %v633_v48 }
  0xfc   : > { %v684_v46 = vsel %vm648_vm2, %v630_v44, %v666_v16  ;;  %v685_v55 = vsel %vm649_vm3, %v631_v45, %v667_v26  ;;  %vm652_vm6 = vcmp.ge.f32.partialorder %v634_v49, 0.0  ;;  %v670_v56 = vmul.f32 0.2, %v634_v49 }
  0xfd   : > { %702 = vst [vmem:[%s1005_s26] sm:$0xff] %v684_v46  ;;  %v686_v57 = vsel %vm650_vm4, %v632_v47, %v668_v54  ;;  %v687_v58 = vsel %vm651_vm5, %v633_v48, %v669_v36  ;;  %vm653_vm7 = vcmp.ge.f32.partialorder %v635_v50, 0.0  ;;  %v671_v59 = vmul.f32 0.2, %v635_v50 }
  0xfe   : > { %703 = vst [vmem:[%s1005_s26 + $0x8] sm:$0xff] %v685_v55  ;;  %v688_v60 = vsel %vm652_vm6, %v634_v49, %v670_v56  ;;  %vm654_vm8 = vcmp.ge.f32.partialorder %v636_v52, 0.0  ;;  %v672_v62 = vmul.f32 0.2, %v636_v52  ;;  %vm655_vm9 = vcmp.ge.f32.partialorder %v637_v53, 0.0 }
  0xff   : > { %704 = vst [vmem:[%s1005_s26 + $0x10] sm:$0xff] %v686_v57  ;;  %v689_v63 = vsel %vm653_vm7, %v635_v50, %v671_v59  ;;  %v673_v0 = vmul.f32 0.2, %v637_v53  ;;  %v638_v1 = vadd.f32 %v1149_v43, %v594_v37  ;;  %v639_v2 = vadd.f32 %v1149_v43, %v1109_v21 }
 0x100   : > { %705 = vst [vmem:[%s1005_s26 + $0x18] sm:$0xff] %v687_v58  ;;  %v690_v3 = vsel %vm654_vm8, %v636_v52, %v672_v62  ;;  %v640_v4 = vadd.f32 %v1149_v43, %v1115_v31  ;;  %v641_v5 = vadd.f32 %v1149_v43, %v1121_v41  ;;  %v642_v6 = vadd.f32 %v1149_v43, %v1127_v51 }
 0x101   : > { %706 = vst [vmem:[%s1005_s26 + $0x20] sm:$0xff] %v688_v60  ;;  %v691_v8 = vsel %vm655_vm9, %v637_v53, %v673_v0  ;;  %vm656_vm10 = vcmp.ge.f32.partialorder %v638_v1, 0.0  ;;  %v674_v9 = vmul.f32 0.2, %v638_v1  ;;  %vm657_vm11 = vcmp.ge.f32.partialorder %v639_v2, 0.0 }
 0x102   : > { %707 = vst [vmem:[%s1005_s26 + $0x28] sm:$0xff] %v689_v63  ;;  %v675_v21 = vmul.f32 0.2, %v639_v2  ;;  %vm658_vm12 = vcmp.ge.f32.partialorder %v640_v4, 0.0  ;;  %v676_v10 = vmul.f32 0.2, %v640_v4  ;;  %v643_v31 = vadd.f32 %v1149_v43, %v1130_v61 }
 0x103   : > { %708 = vst [vmem:[%s1005_s26 + $0x30] sm:$0xff] %v690_v3  ;;  %v692_v41 = vsel %vm656_vm10, %v638_v1, %v674_v9  ;;  %vm659_vm13 = vcmp.ge.f32.partialorder %v641_v5, 0.0  ;;  %v677_v11 = vmul.f32 0.2, %v641_v5  ;;  %vm660_vm14 = vcmp.ge.f32.partialorder %v642_v6, 0.0 }
 0x104   : > { %709 = vst [vmem:[%s1005_s26 + $0x38] sm:$0xff] %v691_v8  ;;  %v693_v51 = vsel %vm657_vm11, %v639_v2, %v675_v21  ;;  %v694_v12 = vsel %vm658_vm12, %v640_v4, %v676_v10  ;;  %v678_v13 = vmul.f32 0.2, %v642_v6  ;;  %vm661_vm15 = vcmp.ge.f32.partialorder %v643_v31, 0.0 }
 0x105   : > { %710 = vst [vmem:[%s1005_s26 + $0x40] sm:$0xff] %v692_v41  ;;  %v695_v14 = vsel %vm659_vm13, %v641_v5, %v677_v11  ;;  %v679_v15 = vmul.f32 0.2, %v643_v31  ;;  %v644_v61 = vadd.f32 %v1149_v43, %v1133_v7  ;;  %v645_v17 = vadd.f32 %v1149_v43, %v1136_v18 }
 0x106   : > { %711 = vst [vmem:[%s1005_s26 + $0x48] sm:$0xff] %v693_v51  ;;  %v696_v19 = vsel %vm660_vm14, %v642_v6, %v678_v13  ;;  %v646_v20 = vadd.f32 %v1149_v43, %v1139_v30  ;;  %v647_v22 = vadd.f32 %v1149_v43, %v1142_v42 }
 0x107   : > { %712 = vst [vmem:[%s1005_s26 + $0x50] sm:$0xff] %v694_v12  ;;  %v697_v23 = vsel %vm661_vm15, %v643_v31, %v679_v15  ;;  %vm662_vm0 = vcmp.ge.f32.partialorder %v644_v61, 0.0  ;;  %v680_v24 = vmul.f32 0.2, %v644_v61  ;;  %vm663_vm1 = vcmp.ge.f32.partialorder %v645_v17, 0.0 }
 0x108   : > { %713 = vst [vmem:[%s1005_s26 + $0x58] sm:$0xff] %v695_v14  ;;  %v681_v7 = vmul.f32 0.2, %v645_v17  ;;  %vm664_vm2 = vcmp.ge.f32.partialorder %v646_v20, 0.0  ;;  %v682_v18 = vmul.f32 0.2, %v646_v20 }
 0x109   : > { %714 = vst [vmem:[%s1005_s26 + $0x60] sm:$0xff] %v696_v19  ;;  %v698_v25 = vsel %vm662_vm0, %v644_v61, %v680_v24  ;;  %vm665_vm3 = vcmp.ge.f32.partialorder %v647_v22, 0.0  ;;  %v683_v27 = vmul.f32 0.2, %v647_v22 }
 0x10a   : > { %715 = vst [vmem:[%s1005_s26 + $0x68] sm:$0xff] %v697_v23  ;;  %v699_v28 = vsel %vm663_vm1, %v645_v17, %v681_v7  ;;  %v700_v29 = vsel %vm664_vm2, %v646_v20, %v682_v18 }
 0x10b   : > { %716 = vst [vmem:[%s1005_s26 + $0x70] sm:$0xff] %v698_v25  ;;  %v701_v30 = vsel %vm665_vm3, %v647_v22, %v683_v27 }
 0x10c   : > { %717 = vst [vmem:[%s1005_s26 + $0x78] sm:$0xff] %v699_v28 }
 0x10d   : > { %718 = vst [vmem:[%s1005_s26 + $0x80] sm:$0xff] %v700_v29 }
 0x10e   : > { %719 = vst [vmem:[%s1005_s26 + $0x88] sm:$0xff] %v701_v30 }
 0x10f PF: > { %s13_s16 = sadd.s32 1, %s945_s16   ;;  %s1219_s12 = smov %s937_s14 }
 0x110   : > { %p10_p9 = scmp.ge.s32.totalorder %s13_s16, 18   ;;  %s1220_s13 = smov %s941_s15 }
 0x111   : > { %s1221_s14 = smov %s1224_s17  ;;  %s1222_s15 = smov %s1228_s18 }
 0x112   :  { %12 = sbr.rel (!%p10_p9) target bundleno = 3 (0x3), region = 72 }

// kernel: _lambda_.6
= control target key start
LH: loop header
LB: loop body
LE: loop exit
PB: predicated region body
PF: predicated region fallthrough
CT: control target
= control target key end

     0   :  { %s848_s15 = smov 0   ;;  %s850_s16 = smov 0   ;;  %s987_s0 = inlined_call_operand.vmem [shape: f32[8,10,9,128], index: 0, kind: input, shape index: {}]   ;;  %s988_s1 = inlined_call_operand.vmem [shape: f32[16,128,128], index: 1, kind: input, shape index: {}]   ;;  %s989_s2 = inlined_call_operand.vmem [shape: f32[10,8,128], index: 2, kind: output, shape index: {0}]   ;;  %s990_s3 = inlined_call_operand.vmem [shape: f32[2,1,128], index: 3, kind: output, shape index: {1}]   ;;  %s991_s4 = inlined_call_operand.vmem [shape: f32[2,1,128], index: 4, kind: output, shape index: {2}]  }
   0x1   :  { %s852_s17 = smov 0   ;;  %s854_s18 = smov 0  }
   0x2   :  { %s856_s19 = smov 0  }
   0x3 LB: > { %s24_s20 = sadd.s32 1, %s812_s17  ;;  %s27_s21 = sadd.s32 1, %s816_s18  ;;  %s820_s19 = sphi %s856_s19, %s15_s19   ;;  %s816_s18 = sphi %s854_s18, %s995_s18   ;;  %s812_s17 = sphi %s852_s17, %s994_s17   ;;  %s808_s16 = sphi %s850_s16, %s993_s16   ;;  %s804_s15 = sphi %s848_s15, %s992_s15  }
   0x4   : > { %p25_p0 = scmp.ge.s32.totalorder %s24_s20, 8  ;;  %p678_p1 = scmp.ge.s32.totalorder %s820_s19, 1 }
   0x5   : > { %p187_p2 = scmp.lt.s32.totalorder %s820_s19, 17 }
   0x6   : > { %s997_s20 = smov (%p25_p0, %s24_s20), 0  ;;  %s999_s21 = smov (!%p25_p0, %s27_s21), %s816_s18 }
   0x7   : > { %p188_p3 = pnand %p678_p1, %p187_p2  ;;  %p29_p4 = scmp.ge.s32.totalorder %s999_s21, 2 }
   0x8   : > { %s224_s22 = smul.u32 (!%p188_p3), 5, %s808_s16  ;;  %p225_p5 = scmp.lt.s32.totalorder (!%p188_p3), %s804_s15, 7 }
   0x9   : > { %s1001_s21 = smov (%p29_p4, %s999_s21), 0  ;;  %191 = sbr.rel (%p188_p3) target bundleno = 251 (0xfb), region = 28 }
   0xa   : > { %p241_p6 = scmp.lt.s32.totalorder (!%p188_p3), %s808_s16, 1  ;;  %p227_p7 = scmp.lt.s32.totalorder (!%p188_p3), %s224_s22, 9 }
   0xb   : > { %p682_p8 = scmp.ne.s32.totalorder (!%p188_p3), %s804_s15, 0 }
   0xe   : > { %s226_s23 = scalar_select %p225_p5, %s804_s15, 7 }
   0xf   : > { %s1003_s22 = smov (!%p227_p7, %s224_s22), 9  ;;  %s1005_s16 = smov (!%p241_p6, %s808_s16), 1 }
  0x10   : > { %s740_s24 = smul.u32 20, %s226_s23  ;;  %s679_s25 = sshll.u32 %s1003_s22, 1 }
  0x11   : > { %s681_s26 = sshll.u32 %s1003_s22, 3  ;;  %s243_s8 = scalar_lea.vmem %s990_s3, %s1005_s16 }
  0x12   : > { %s231_s27 = sadd.s32 %s740_s24, %s679_s25  ;;  %s887_s30 = scalar_lea.vmem %s989_s2, %s681_s26 }
  0x13   : > { %s680_s5 = sshll.u32 %s231_s27, 3  ;;  %s246_s14 = scalar_lea.vmem %s991_s4, %s1005_s16 }
  0x14   : > { %s896_s11 = scalar_lea.vmem %s987_s0, %s680_s5  ;;  %250 = sbr.rel (%p682_p8) target bundleno = 31 (0x1f), region = 32 }
  0x19   : > { %v822_v0 = vmov 0.0  }
  0x1a   : > { %251 = vst [vmem:[#allocation2 + $0x8] sm:$0xff] %v822_v0 }
  0x1b   : > { %252 = vst [vmem:[#allocation2] sm:$0xff] %v822_v0 }
  0x1c   : > { %253 = vst [vmem:[#allocation2 + $0x20] sm:$0xff] %v822_v0 }
  0x1d   : > { %254 = vst [vmem:[#allocation2 + $0x10] sm:$0xff] %v822_v0 }
  0x1e   : > { %255 = vst [vmem:[#allocation2 + $0x18] sm:$0xff] %v822_v0 }
  0x1f PF: > { %s706_s22 = sshll.u32 %s804_s15, 8  ;;  %v256_v25 = vld [vmem:[%s896_s11] sm:$0xff]  ;;  %v257_v28 = vld [vmem:[%s896_s11 + $0x8] sm:$0x1]  ;;  %v262_v31 = vld [vmem:[%s896_s11 + $0x30] sm:$0xff]  ;;  %vm337_vm0 = vcmask 1046528  }
  0x20   : > { %s907_s25 = scalar_lea.vmem %s988_s1, %s706_s22  ;;  %v263_v32 = vld [vmem:[%s896_s11 + $0x38] sm:$0x1]  ;;  %v338_v33 = vrot.slane %v256_v25, 1  ;;  %v339_v34 = vrot.slane %v257_v28, 1  ;;  %v347_v37 = vrot.slane %v262_v31, 1  ;;  %v260_v41 = vld [vmem:[%s896_s11 + $0x20] sm:$0xff] }
  0x21   : > { %v289_v1 = vld [vmem:[%s907_s25 + $0x78] sm:$0xff]  ;;  %v288_v3 = vld [vmem:[%s907_s25 + $0x70] sm:$0xff]  ;;  %v287_v5 = vld [vmem:[%s907_s25 + $0x68] sm:$0xff]  ;;  %v348_v38 = vrot.slane %v263_v32, 1  ;;  %v344_v55 = vrot.slane %v260_v41, 1  ;;  %p703_p9 = scmp.ne.s32.totalorder %s804_s15, 7 }
  0x22   : > { %v702_v2 = vld [vmem:[%s907_s25 + $0xf8] sm:$0xff]  ;;  %708 = vmatpush.msra.mxu2 %v289_v1  ;;  %v701_v4 = vld [vmem:[%s907_s25 + $0xf0] sm:$0xff]  ;;  %v700_v6 = vld [vmem:[%s907_s25 + $0xe8] sm:$0xff]  ;;  %290 = vmatpush.msra.mxu0 %v289_v1  ;;  %v340_v42 = vsel %vm337_vm0, %v338_v33, %v339_v34 }
  0x23   : > { %377 = vmatpush.msra.mxu1 %v702_v2  ;;  %724 = vmatpush.msra.mxu3 %v702_v2  ;;  %v286_v7 = vld [vmem:[%s907_s25 + $0x60] sm:$0xff]  ;;  %v285_v9 = vld [vmem:[%s907_s25 + $0x58] sm:$0xff]  ;;  %v284_v11 = vld [vmem:[%s907_s25 + $0x50] sm:$0xff]  ;;  %v349_v45 = vsel %vm337_vm0, %v347_v37, %v348_v38 }
  0x24   : > { %709 = vmatpush.msra.mxu2 %v288_v3  ;;  %v699_v8 = vld [vmem:[%s907_s25 + $0xe0] sm:$0xff]  ;;  %291 = vmatpush.msra.mxu0 %v288_v3  ;;  %v698_v10 = vld [vmem:[%s907_s25 + $0xd8] sm:$0xff]  ;;  %v697_v12 = vld [vmem:[%s907_s25 + $0xd0] sm:$0xff] }
  0x25   : > { %378 = vmatpush.msra.mxu1 %v701_v4  ;;  %725 = vmatpush.msra.mxu3 %v701_v4  ;;  %v283_v13 = vld [vmem:[%s907_s25 + $0x48] sm:$0xff]  ;;  %v282_v15 = vld [vmem:[%s907_s25 + $0x40] sm:$0xff]  ;;  %v281_v17 = vld [vmem:[%s907_s25 + $0x38] sm:$0xff] }
  0x26   : > { %710 = vmatpush.msra.mxu2 %v287_v5  ;;  %292 = vmatpush.msra.mxu0 %v287_v5  ;;  %v696_v14 = vld [vmem:[%s907_s25 + $0xc8] sm:$0xff]  ;;  %v695_v16 = vld [vmem:[%s907_s25 + $0xc0] sm:$0xff]  ;;  %v694_v18 = vld [vmem:[%s907_s25 + $0xb8] sm:$0xff] }
  0x27   : > { %379 = vmatpush.msra.mxu1 %v700_v6  ;;  %726 = vmatpush.msra.mxu3 %v700_v6  ;;  %v280_v19 = vld [vmem:[%s907_s25 + $0x30] sm:$0xff]  ;;  %v279_v21 = vld [vmem:[%s907_s25 + $0x28] sm:$0xff]  ;;  %v278_v23 = vld [vmem:[%s907_s25 + $0x20] sm:$0xff] }
  0x28   : > { %711 = vmatpush.msra.mxu2 %v286_v7  ;;  %293 = vmatpush.msra.mxu0 %v286_v7  ;;  %v693_v20 = vld [vmem:[%s907_s25 + $0xb0] sm:$0xff]  ;;  %v692_v22 = vld [vmem:[%s907_s25 + $0xa8] sm:$0xff]  ;;  %v691_v24 = vld [vmem:[%s907_s25 + $0xa0] sm:$0xff] }
  0x29   : > { %380 = vmatpush.msra.mxu1 %v699_v8  ;;  %727 = vmatpush.msra.mxu3 %v699_v8  ;;  %v277_v26 = vld [vmem:[%s907_s25 + $0x18] sm:$0xff]  ;;  %v276_v29 = vld [vmem:[%s907_s25 + $0x10] sm:$0xff]  ;;  %v275_v35 = vld [vmem:[%s907_s25 + $0x8] sm:$0xff] }
  0x2a   : > { %712 = vmatpush.msra.mxu2 %v285_v9  ;;  %294 = vmatpush.msra.mxu0 %v285_v9  ;;  %v690_v27 = vld [vmem:[%s907_s25 + $0x98] sm:$0xff]  ;;  %v689_v30 = vld [vmem:[%s907_s25 + $0x90] sm:$0xff]  ;;  %v688_v36 = vld [vmem:[%s907_s25 + $0x88] sm:$0xff] }
  0x2b   : > { %381 = vmatpush.msra.mxu1 %v698_v10  ;;  %728 = vmatpush.msra.mxu3 %v698_v10  ;;  %v274_v39 = vld [vmem:[%s907_s25] sm:$0xff]  ;;  %v258_v43 = vld [vmem:[%s896_s11 + $0x10] sm:$0xff]  ;;  %v259_v44 = vld [vmem:[%s896_s11 + $0x18] sm:$0x1] }
  0x2c   : > { %713 = vmatpush.msra.mxu2 %v284_v11  ;;  %295 = vmatpush.msra.mxu0 %v284_v11  ;;  %v687_v40 = vld [vmem:[%s907_s25 + $0x80] sm:$0xff]  ;;  %v265_v47 = vld [vmem:[%s896_s11 + $0x48] sm:$0x1]  ;;  %v341_v48 = vrot.slane %v258_v43, 1  ;;  %v342_v49 = vrot.slane %v259_v44, 1  ;;  %v269_v5 = vld [vmem:[#allocation2 + $0x10] sm:$0xff] }
  0x2d   : > { %382 = vmatpush.msra.mxu1 %v697_v12  ;;  %729 = vmatpush.msra.mxu3 %v697_v12  ;;  %v264_v46 = vld [vmem:[%s896_s11 + $0x40] sm:$0xff]  ;;  %v351_v51 = vrot.slane %v265_v47, 1  ;;  %v261_v53 = vld [vmem:[%s896_s11 + $0x28] sm:$0x1] }
  0x2e   : > { %714 = vmatpush.msra.mxu2 %v283_v13  ;;  %296 = vmatpush.msra.mxu0 %v283_v13  ;;  %v350_v50 = vrot.slane %v264_v46, 1  ;;  %v343_v52 = vsel %vm337_vm0, %v341_v48, %v342_v49  ;;  %v345_v56 = vrot.slane %v261_v53, 1  ;;  %v266_v59 = vld [vmem:[#allocation2 + $0x8] sm:$0xff]  ;;  %v267_v1 = vld [vmem:[#allocation2] sm:$0xff] }
  0x2f   : > { %383 = vmatpush.msra.mxu1 %v696_v14  ;;  %730 = vmatpush.msra.mxu3 %v696_v14  ;;  %v268_v4 = vld [vmem:[#allocation2 + $0x20] sm:$0xff]  ;;  %v270_v14 = vld [vmem:[#allocation2 + $0x18] sm:$0xff] }
  0x30   : > { %715 = vmatpush.msra.mxu2 %v282_v15  ;;  %297 = vmatpush.msra.mxu0 %v282_v15  ;;  %v352_v54 = vsel %vm337_vm0, %v350_v50, %v351_v51  ;;  %v346_v57 = vsel %vm337_vm0, %v344_v55, %v345_v56 }
  0x31   : > { %384 = vmatpush.msra.mxu1 %v695_v16  ;;  %731 = vmatpush.msra.mxu3 %v695_v16 }
  0x32   : > { %716 = vmatpush.msra.mxu2 %v281_v17  ;;  %298 = vmatpush.msra.mxu0 %v281_v17 }
  0x33   : > { %385 = vmatpush.msra.mxu1 %v694_v18  ;;  %732 = vmatpush.msra.mxu3 %v694_v18 }
  0x34   : > { %717 = vmatpush.msra.mxu2 %v280_v19  ;;  %299 = vmatpush.msra.mxu0 %v280_v19 }
  0x35   : > { %386 = vmatpush.msra.mxu1 %v693_v20  ;;  %733 = vmatpush.msra.mxu3 %v693_v20 }
  0x36   : > { %718 = vmatpush.msra.mxu2 %v279_v21  ;;  %300 = vmatpush.msra.mxu0 %v279_v21 }
  0x37   : > { %387 = vmatpush.msra.mxu1 %v692_v22  ;;  %734 = vmatpush.msra.mxu3 %v692_v22 }
  0x38   : > { %719 = vmatpush.msra.mxu2 %v278_v23  ;;  %301 = vmatpush.msra.mxu0 %v278_v23 }
  0x39   : > { %388 = vmatpush.msra.mxu1 %v691_v24  ;;  %735 = vmatpush.msra.mxu3 %v691_v24 }
  0x3a   : > { %720 = vmatpush.msra.mxu2 %v277_v26  ;;  %302 = vmatpush.msra.mxu0 %v277_v26 }
  0x3b   : > { %389 = vmatpush.msra.mxu1 %v690_v27  ;;  %736 = vmatpush.msra.mxu3 %v690_v27 }
  0x3c   : > { %721 = vmatpush.msra.mxu2 %v276_v29  ;;  %303 = vmatpush.msra.mxu0 %v276_v29 }
  0x3d   : > { %390 = vmatpush.msra.mxu1 %v689_v30  ;;  %737 = vmatpush.msra.mxu3 %v689_v30 }
  0x3e   : > { %722 = vmatpush.msra.mxu2 %v275_v35  ;;  %304 = vmatpush.msra.mxu0 %v275_v35 }
  0x3f   : > { %391 = vmatpush.msra.mxu1 %v688_v36  ;;  %738 = vmatpush.msra.mxu3 %v688_v36 }
  0x40   : > { %723 = vmatpush.msra.mxu2 %v274_v39  ;;  %305 = vmatpush.msra.mxu0 %v274_v39 }
  0x41   : > { %392 = vmatpush.msra.mxu1 %v687_v40  ;;  %312 = vmatmul.f32.vlgmr.msra.gmra.mxu2 %v260_v41 }
  0x42   : > { %393 = vmatmul.f32.vlgmr.msra.gmra.mxu1 %v340_v42  ;;  %739 = vmatpush.msra.mxu3 %v687_v40 }
  0x43   : > { %306 = vmatmul.f32.vlgmr.msra.gmra.mxu0 %v256_v25  ;;  %402 = vmatmul.f32.vlgmr.msra.gmra.mxu3 %v349_v45 }
  0x49   : > { %315 = vmatmul.f32.gmra.mxu2 %v262_v31 }
  0x4a   : > { %396 = vmatmul.f32.gmra.mxu1 %v343_v52 }
  0x4b   : > { %309 = vmatmul.f32.gmra.mxu0 %v258_v43  ;;  %405 = vmatmul.f32.gmra.mxu3 %v352_v54 }
  0x51   : > { %318 = vmatmul.f32.gmra.mxu2 %v264_v46 }
  0x52   : > { %399 = vmatmul.f32.gmra.mxu1 %v346_v57 }
  0xbf   : > { %v394_v58 = vpop.f32.mrf.mxu1 }
  0xc0   : > { %v307_v60 = vpop.f32.mrf.mxu0 }
  0xc1   : > { %v322_v61 = vadd.f32 %v307_v60, %v266_v59 }
  0xc3   : > { %v409_v62 = vadd.f32 %v394_v58, %v322_v61 }
  0xc4   : > { %v313_v63 = vpop.f32.mrf.mxu2 }
  0xc5   : > { %414 = vst [vmem:[#allocation2 + $0x8] sm:$0xff] %v409_v62  ;;  %v324_v9 = vadd.f32 %v313_v63, %v268_v4 }
  0xc6   : > { %v403_v6 = vpop.f32.mrf.mxu3 }
  0xc7   : > { %v397_v0 = vpop.f32.mrf.mxu1 }
  0xc8   : > { %v310_v2 = vpop.f32.mrf.mxu0 }
  0xc9   : > { %v323_v3 = vadd.f32 %v310_v2, %v267_v1 }
  0xcb   : > { %v410_v7 = vadd.f32 %v397_v0, %v323_v3 }
  0xcc   : > { %v316_v8 = vpop.f32.mrf.mxu2 }
  0xcd   : > { %415 = vst [vmem:[#allocation2] sm:$0xff] %v410_v7  ;;  %v325_v10 = vadd.f32 %v316_v8, %v269_v5 }
  0xce   : > { %v406_v16 = vpop.f32.mrf.mxu3 }
  0xcf   : > { %v400_v11 = vpop.f32.mrf.mxu1  ;;  %v412_v13 = vadd.f32 %v403_v6, %v325_v10 }
  0xd0   : > { %v411_v12 = vadd.f32 %v400_v11, %v324_v9 }
  0xd1   : > { %417 = vst [vmem:[#allocation2 + $0x10] sm:$0xff] %v412_v13 }
  0xd2   : > { %416 = vst [vmem:[#allocation2 + $0x20] sm:$0xff] %v411_v12 }
  0xd4   : > { %v319_v15 = vpop.f32.mrf.mxu2 }
  0xd5   : > { %v326_v17 = vadd.f32 %v319_v15, %v270_v14  ;;  %422 = sbr.rel (%p703_p9) target bundleno = 251 (0xfb), region = 36 }
  0xd7   : > { %v413_v18 = vadd.f32 %v406_v16, %v326_v17 }
  0xd9   : > { %418 = vst [vmem:[#allocation2 + $0x18] sm:$0xff] %v413_v18 }
  0xda   : > { %v423_v19 = vlaneseq  ;;  %536 = vst [vmem:[%s887_s30] sm:$0xff] %v409_v62 }
  0xdb   : > { %537 = vst [vmem:[%s887_s30 + $0x8] sm:$0xff] %v410_v7 }
  0xdc   : > { %v424_v20 = vshrl.u32 %v423_v19, 7  ;;  %538 = vst [vmem:[%s887_s30 + $0x10] sm:$0xff] %v411_v12 }
  0xdd   : > { %539 = vst [vmem:[%s887_s30 + $0x18] sm:$0xff] %v412_v13 }
  0xde   : > { %v425_v21 = vadd.s32 8, %v424_v20  ;;  %v426_v22 = vadd.s32 16, %v424_v20  ;;  %v427_v23 = vadd.s32 24, %v424_v20  ;;  %v428_v24 = vadd.s32 32, %v424_v20  ;;  %540 = vst [vmem:[%s887_s30 + $0x20] sm:$0xff] %v413_v18 }
  0xdf   : > { %v433_v25 = vand.u32 7, %v424_v20 }
  0xe0   : > { %v440_v26 = vand.u32 7, %v425_v21  ;;  %v447_v27 = vand.u32 7, %v426_v22  ;;  %v454_v28 = vand.u32 7, %v427_v23  ;;  %v461_v29 = vand.u32 7, %v428_v24 }
  0xe1   : > { %vm489_vm1 = vcmp.lt.s32.totalorder %v433_v25, 5 }
  0xe2   : > { %vm490_vm2 = vcmp.lt.s32.totalorder %v440_v26, 5  ;;  %vm491_vm3 = vcmp.lt.s32.totalorder %v447_v27, 5  ;;  %vm492_vm4 = vcmp.lt.s32.totalorder %v454_v28, 5  ;;  %vm493_vm5 = vcmp.lt.s32.totalorder %v461_v29, 5 }
  0xe3   : > { %v504_v30 = vsel %vm489_vm1, %v409_v62, 0.0  ;;  %v505_v31 = vsel %vm490_vm2, %v410_v7, 0.0  ;;  %v506_v32 = vsel %vm491_vm3, %v411_v12, 0.0  ;;  %v507_v33 = vsel %vm492_vm4, %v412_v13, 0.0 }
  0xe4   : > { %v509_v34 = vadd.f32 %v505_v31, %v504_v30  ;;  %v520_v35 = vmul.f32 %v504_v30, %v504_v30  ;;  %v521_v36 = vmul.f32 %v505_v31, %v505_v31  ;;  %v508_v37 = vsel %vm493_vm5, %v413_v18, 0.0 }
  0xe5   : > { %v522_v38 = vmul.f32 %v506_v32, %v506_v32  ;;  %v523_v40 = vmul.f32 %v507_v33, %v507_v33  ;;  %v524_v43 = vmul.f32 %v508_v37, %v508_v37 }
  0xe6   : > { %v510_v39 = vadd.f32 %v509_v34, %v506_v32  ;;  %v525_v41 = vadd.f32 %v521_v36, %v520_v35 }
  0xe8   : > { %v511_v42 = vadd.f32 %v510_v39, %v507_v33  ;;  %v526_v44 = vadd.f32 %v525_v41, %v522_v38 }
  0xea   : > { %v512_v45 = vadd.f32 %v511_v42, %v508_v37  ;;  %v527_v46 = vadd.f32 %v526_v44, %v523_v40 }
  0xec   : > { %v513_v47 = vrot.slane %v512_v45, 4  ;;  %v528_v48 = vadd.f32 %v527_v46, %v524_v43 }
  0xee   : > { %v514_v49 = vadd.f32 %v513_v47, %v512_v45  ;;  %v529_v50 = vrot.slane %v528_v48, 4 }
  0xf0   : > { %v515_v51 = vrot.slane %v514_v49, 2  ;;  %v530_v52 = vadd.f32 %v529_v50, %v528_v48 }
  0xf2   : > { %v516_v53 = vadd.f32 %v515_v51, %v514_v49  ;;  %v531_v54 = vrot.slane %v530_v52, 2 }
  0xf4   : > { %v517_v55 = vrot.slane %v516_v53, 1  ;;  %v532_v56 = vadd.f32 %v531_v54, %v530_v52 }
  0xf6   : > { %v518_v57 = vadd.f32 %v517_v55, %v516_v53  ;;  %v533_v58 = vrot.slane %v532_v56, 1 }
  0xf8   : > { %519 = vst [vmem:[%s243_s8] sm:$0x1] %v518_v57  ;;  %v534_v59 = vadd.f32 %v533_v58, %v532_v56 }
  0xfa   : > { %535 = vst [vmem:[%s246_s14] sm:$0x1] %v534_v59 }
  0xfb PF: > { %s15_s19 = sadd.s32 1, %s820_s19   ;;  %s992_s15 = smov %s812_s17 }
  0xfc   : > { %p12_p10 = scmp.ge.s32.totalorder %s15_s19, 18   ;;  %s993_s16 = smov %s816_s18 }
  0xfd   : > { %s994_s17 = smov %s997_s20  ;;  %s995_s18 = smov %s1001_s21 }
  0xfe   :  { %14 = sbr.rel (!%p12_p10) target bundleno = 3 (0x3), region = 92 }

// kernel: _lambda_.7
= control target key start
LH: loop header
LB: loop body
LE: loop exit
PB: predicated region body
PF: predicated region fallthrough
CT: control target
= control target key end

     0   :  { %s768_s15 = smov 0   ;;  %s770_s16 = smov 0   ;;  %s899_s0 = inlined_call_operand.vmem [shape: f32[8,6,9,128], index: 0, kind: input, shape index: {}]   ;;  %s900_s1 = inlined_call_operand.vmem [shape: f32[16,128,128], index: 1, kind: input, shape index: {}]   ;;  %s901_s2 = inlined_call_operand.vmem [shape: f32[6,8,128], index: 2, kind: output, shape index: {0}]   ;;  %s902_s3 = inlined_call_operand.vmem [shape: f32[2,1,128], index: 3, kind: output, shape index: {1}]   ;;  %s903_s4 = inlined_call_operand.vmem [shape: f32[2,1,128], index: 4, kind: output, shape index: {2}]  }
   0x1   :  { %s772_s17 = smov 0   ;;  %s774_s18 = smov 0  }
   0x2   :  { %s776_s19 = smov 0  }
   0x3 LB: > { %s24_s20 = sadd.s32 1, %s732_s17  ;;  %s27_s21 = sadd.s32 1, %s736_s18  ;;  %s740_s19 = sphi %s776_s19, %s15_s19   ;;  %s736_s18 = sphi %s774_s18, %s907_s18   ;;  %s732_s17 = sphi %s772_s17, %s906_s17   ;;  %s728_s16 = sphi %s770_s16, %s905_s16   ;;  %s724_s15 = sphi %s768_s15, %s904_s15  }
   0x4   : > { %p25_p0 = scmp.ge.s32.totalorder %s24_s20, 8  ;;  %p598_p1 = scmp.ge.s32.totalorder %s740_s19, 1 }
   0x5   : > { %p187_p2 = scmp.lt.s32.totalorder %s740_s19, 17 }
   0x6   : > { %s909_s20 = smov (%p25_p0, %s24_s20), 0  ;;  %s911_s21 = smov (!%p25_p0, %s27_s21), %s736_s18 }
   0x7   : > { %p188_p3 = pnand %p598_p1, %p187_p2  ;;  %p29_p4 = scmp.ge.s32.totalorder %s911_s21, 2 }
   0x8   : > { %s224_s22 = smul.u32 (!%p188_p3), 3, %s728_s16  ;;  %p225_p5 = scmp.lt.s32.totalorder (!%p188_p3), %s724_s15, 7 }
   0x9   : > { %s913_s21 = smov (%p29_p4, %s911_s21), 0  ;;  %191 = sbr.rel (%p188_p3) target bundleno = 237 (0xed), region = 28 }
   0xa   : > { %p241_p6 = scmp.lt.s32.totalorder (!%p188_p3), %s728_s16, 1  ;;  %p227_p7 = scmp.lt.s32.totalorder (!%p188_p3), %s224_s22, 5 }
   0xb   : > { %p602_p8 = scmp.ne.s32.totalorder (!%p188_p3), %s724_s15, 0 }
   0xe   : > { %s226_s23 = scalar_select %p225_p5, %s724_s15, 7 }
   0xf   : > { %s915_s22 = smov (!%p227_p7, %s224_s22), 5  ;;  %s917_s16 = smov (!%p241_p6, %s728_s16), 1 }
  0x10   : > { %s660_s24 = smul.u32 12, %s226_s23  ;;  %s599_s25 = sshll.u32 %s915_s22, 1 }
  0x11   : > { %s601_s26 = sshll.u32 %s915_s22, 3  ;;  %s243_s8 = scalar_lea.vmem %s902_s3, %s917_s16 }
  0x12   : > { %s231_s27 = sadd.s32 %s660_s24, %s599_s25  ;;  %s807_s30 = scalar_lea.vmem %s901_s2, %s601_s26 }
  0x13   : > { %s600_s5 = sshll.u32 %s231_s27, 3  ;;  %s246_s14 = scalar_lea.vmem %s903_s4, %s917_s16 }
  0x14   : > { %s816_s11 = scalar_lea.vmem %s899_s0, %s600_s5  ;;  %250 = sbr.rel (%p602_p8) target bundleno = 29 (0x1d), region = 32 }
  0x19   : > { %v742_v0 = vmov 0.0  }
  0x1a   : > { %251 = vst [vmem:[#allocation2 + $0x10] sm:$0xff] %v742_v0 }
  0x1b   : > { %252 = vst [vmem:[#allocation2] sm:$0xff] %v742_v0 }
  0x1c   : > { %253 = vst [vmem:[#allocation2 + $0x8] sm:$0xff] %v742_v0 }
  0x1d PF: > { %s626_s22 = sshll.u32 %s724_s15, 8  ;;  %v256_v25 = vld [vmem:[%s816_s11 + $0x10] sm:$0xff]  ;;  %v257_v28 = vld [vmem:[%s816_s11 + $0x18] sm:$0x1]  ;;  %v254_v31 = vld [vmem:[%s816_s11] sm:$0xff]  ;;  %vm317_vm0 = vcmask 1046528  }
  0x1e   : > { %s827_s25 = scalar_lea.vmem %s900_s1, %s626_s22  ;;  %v255_v32 = vld [vmem:[%s816_s11 + $0x8] sm:$0x1]  ;;  %v321_v33 = vrot.slane %v256_v25, 1  ;;  %v322_v34 = vrot.slane %v257_v28, 1  ;;  %v318_v37 = vrot.slane %v254_v31, 1  ;;  %v258_v42 = vld [vmem:[%s816_s11 + $0x20] sm:$0xff] }
  0x1f   : > { %v281_v1 = vld [vmem:[%s827_s25 + $0x78] sm:$0xff]  ;;  %v280_v2 = vld [vmem:[%s827_s25 + $0x70] sm:$0xff]  ;;  %v279_v5 = vld [vmem:[%s827_s25 + $0x68] sm:$0xff]  ;;  %v319_v38 = vrot.slane %v255_v32, 1  ;;  %v324_v45 = vrot.slane %v258_v42, 1  ;;  %p623_p9 = scmp.ne.s32.totalorder %s724_s15, 7 }
  0x20   : > { %v622_v3 = vld [vmem:[%s827_s25 + $0xf8] sm:$0xff]  ;;  %628 = vmatpush.msra.mxu2 %v281_v1  ;;  %v621_v4 = vld [vmem:[%s827_s25 + $0xf0] sm:$0xff]  ;;  %v620_v6 = vld [vmem:[%s827_s25 + $0xe8] sm:$0xff]  ;;  %282 = vmatpush.msra.mxu0 %v281_v1  ;;  %v323_v41 = vsel %vm317_vm0, %v321_v33, %v322_v34 }
  0x21   : > { %644 = vmatpush.msra.mxu3 %v622_v3  ;;  %349 = vmatpush.msra.mxu1 %v622_v3  ;;  %v278_v7 = vld [vmem:[%s827_s25 + $0x60] sm:$0xff]  ;;  %v277_v9 = vld [vmem:[%s827_s25 + $0x58] sm:$0xff]  ;;  %v276_v11 = vld [vmem:[%s827_s25 + $0x50] sm:$0xff]  ;;  %v320_v44 = vsel %vm317_vm0, %v318_v37, %v319_v38 }
  0x22   : > { %629 = vmatpush.msra.mxu2 %v280_v2  ;;  %v619_v8 = vld [vmem:[%s827_s25 + $0xe0] sm:$0xff]  ;;  %283 = vmatpush.msra.mxu0 %v280_v2  ;;  %v618_v10 = vld [vmem:[%s827_s25 + $0xd8] sm:$0xff]  ;;  %v617_v12 = vld [vmem:[%s827_s25 + $0xd0] sm:$0xff] }
  0x23   : > { %645 = vmatpush.msra.mxu3 %v621_v4  ;;  %350 = vmatpush.msra.mxu1 %v621_v4  ;;  %v275_v13 = vld [vmem:[%s827_s25 + $0x48] sm:$0xff]  ;;  %v274_v15 = vld [vmem:[%s827_s25 + $0x40] sm:$0xff]  ;;  %v273_v17 = vld [vmem:[%s827_s25 + $0x38] sm:$0xff] }
  0x24   : > { %630 = vmatpush.msra.mxu2 %v279_v5  ;;  %284 = vmatpush.msra.mxu0 %v279_v5  ;;  %v616_v14 = vld [vmem:[%s827_s25 + $0xc8] sm:$0xff]  ;;  %v615_v16 = vld [vmem:[%s827_s25 + $0xc0] sm:$0xff]  ;;  %v614_v18 = vld [vmem:[%s827_s25 + $0xb8] sm:$0xff] }
  0x25   : > { %646 = vmatpush.msra.mxu3 %v620_v6  ;;  %351 = vmatpush.msra.mxu1 %v620_v6  ;;  %v272_v19 = vld [vmem:[%s827_s25 + $0x30] sm:$0xff]  ;;  %v271_v21 = vld [vmem:[%s827_s25 + $0x28] sm:$0xff]  ;;  %v270_v23 = vld [vmem:[%s827_s25 + $0x20] sm:$0xff] }
  0x26   : > { %631 = vmatpush.msra.mxu2 %v278_v7  ;;  %285 = vmatpush.msra.mxu0 %v278_v7  ;;  %v613_v20 = vld [vmem:[%s827_s25 + $0xb0] sm:$0xff]  ;;  %v612_v22 = vld [vmem:[%s827_s25 + $0xa8] sm:$0xff]  ;;  %v611_v24 = vld [vmem:[%s827_s25 + $0xa0] sm:$0xff] }
  0x27   : > { %647 = vmatpush.msra.mxu3 %v619_v8  ;;  %352 = vmatpush.msra.mxu1 %v619_v8  ;;  %v269_v26 = vld [vmem:[%s827_s25 + $0x18] sm:$0xff]  ;;  %v268_v29 = vld [vmem:[%s827_s25 + $0x10] sm:$0xff]  ;;  %v267_v35 = vld [vmem:[%s827_s25 + $0x8] sm:$0xff] }
  0x28   : > { %632 = vmatpush.msra.mxu2 %v277_v9  ;;  %286 = vmatpush.msra.mxu0 %v277_v9  ;;  %v610_v27 = vld [vmem:[%s827_s25 + $0x98] sm:$0xff]  ;;  %v609_v30 = vld [vmem:[%s827_s25 + $0x90] sm:$0xff]  ;;  %v608_v36 = vld [vmem:[%s827_s25 + $0x88] sm:$0xff] }
  0x29   : > { %648 = vmatpush.msra.mxu3 %v618_v10  ;;  %353 = vmatpush.msra.mxu1 %v618_v10  ;;  %v266_v39 = vld [vmem:[%s827_s25] sm:$0xff]  ;;  %v259_v43 = vld [vmem:[%s816_s11 + $0x28] sm:$0x1]  ;;  %v260_v48 = vld [vmem:[#allocation2 + $0x10] sm:$0xff] }
  0x2a   : > { %633 = vmatpush.msra.mxu2 %v276_v11  ;;  %287 = vmatpush.msra.mxu0 %v276_v11  ;;  %v607_v40 = vld [vmem:[%s827_s25 + $0x80] sm:$0xff]  ;;  %v325_v46 = vrot.slane %v259_v43, 1  ;;  %v262_v58 = vld [vmem:[#allocation2 + $0x8] sm:$0xff] }
  0x2b   : > { %649 = vmatpush.msra.mxu3 %v617_v12  ;;  %354 = vmatpush.msra.mxu1 %v617_v12  ;;  %v261_v52 = vld [vmem:[#allocation2] sm:$0xff] }
  0x2c   : > { %634 = vmatpush.msra.mxu2 %v275_v13  ;;  %288 = vmatpush.msra.mxu0 %v275_v13  ;;  %v326_v47 = vsel %vm317_vm0, %v324_v45, %v325_v46 }
  0x2d   : > { %650 = vmatpush.msra.mxu3 %v616_v14  ;;  %355 = vmatpush.msra.mxu1 %v616_v14 }
  0x2e   : > { %635 = vmatpush.msra.mxu2 %v274_v15  ;;  %289 = vmatpush.msra.mxu0 %v274_v15 }
  0x2f   : > { %651 = vmatpush.msra.mxu3 %v615_v16  ;;  %356 = vmatpush.msra.mxu1 %v615_v16 }
  0x30   : > { %636 = vmatpush.msra.mxu2 %v273_v17  ;;  %290 = vmatpush.msra.mxu0 %v273_v17 }
  0x31   : > { %652 = vmatpush.msra.mxu3 %v614_v18  ;;  %357 = vmatpush.msra.mxu1 %v614_v18 }
  0x32   : > { %637 = vmatpush.msra.mxu2 %v272_v19  ;;  %291 = vmatpush.msra.mxu0 %v272_v19 }
  0x33   : > { %653 = vmatpush.msra.mxu3 %v613_v20  ;;  %358 = vmatpush.msra.mxu1 %v613_v20 }
  0x34   : > { %638 = vmatpush.msra.mxu2 %v271_v21  ;;  %292 = vmatpush.msra.mxu0 %v271_v21 }
  0x35   : > { %654 = vmatpush.msra.mxu3 %v612_v22  ;;  %359 = vmatpush.msra.mxu1 %v612_v22 }
  0x36   : > { %639 = vmatpush.msra.mxu2 %v270_v23  ;;  %293 = vmatpush.msra.mxu0 %v270_v23 }
  0x37   : > { %655 = vmatpush.msra.mxu3 %v611_v24  ;;  %360 = vmatpush.msra.mxu1 %v611_v24 }
  0x38   : > { %640 = vmatpush.msra.mxu2 %v269_v26  ;;  %294 = vmatpush.msra.mxu0 %v269_v26 }
  0x39   : > { %656 = vmatpush.msra.mxu3 %v610_v27  ;;  %361 = vmatpush.msra.mxu1 %v610_v27 }
  0x3a   : > { %641 = vmatpush.msra.mxu2 %v268_v29  ;;  %295 = vmatpush.msra.mxu0 %v268_v29 }
  0x3b   : > { %657 = vmatpush.msra.mxu3 %v609_v30  ;;  %362 = vmatpush.msra.mxu1 %v609_v30 }
  0x3c   : > { %642 = vmatpush.msra.mxu2 %v267_v35  ;;  %296 = vmatpush.msra.mxu0 %v267_v35 }
  0x3d   : > { %658 = vmatpush.msra.mxu3 %v608_v36  ;;  %363 = vmatpush.msra.mxu1 %v608_v36 }
  0x3e   : > { %643 = vmatpush.msra.mxu2 %v266_v39  ;;  %297 = vmatpush.msra.mxu0 %v266_v39 }
  0x3f   : > { %659 = vmatpush.msra.mxu3 %v607_v40  ;;  %301 = vmatmul.f32.vlgmr.msra.gmra.mxu2 %v256_v25 }
  0x40   : > { %368 = vmatmul.f32.vlgmr.msra.gmra.mxu3 %v323_v41  ;;  %364 = vmatpush.msra.mxu1 %v607_v40 }
  0x41   : > { %298 = vmatmul.f32.vlgmr.msra.gmra.mxu0 %v254_v31  ;;  %365 = vmatmul.f32.vlgmr.msra.gmra.mxu1 %v320_v44 }
  0x47   : > { %304 = vmatmul.f32.gmra.mxu2 %v258_v42 }
  0x48   : > { %371 = vmatmul.f32.gmra.mxu3 %v326_v47 }
  0xbe   : > { %v299_v49 = vpop.f32.mrf.mxu0  ;;  %v366_v50 = vpop.f32.mrf.mxu1 }
  0xbf   : > { %v308_v51 = vadd.f32 %v299_v49, %v260_v48 }
  0xc1   : > { %v375_v53 = vadd.f32 %v366_v50, %v308_v51 }
  0xc2   : > { %v302_v54 = vpop.f32.mrf.mxu2 }
  0xc3   : > { %v369_v55 = vpop.f32.mrf.mxu3  ;;  %v309_v56 = vadd.f32 %v302_v54, %v261_v52  ;;  %378 = vst [vmem:[#allocation2 + $0x10] sm:$0xff] %v375_v53 }
  0xc5   : > { %v376_v57 = vadd.f32 %v369_v55, %v309_v56 }
  0xc7   : > { %379 = vst [vmem:[#allocation2] sm:$0xff] %v376_v57 }
  0xca   : > { %v305_v59 = vpop.f32.mrf.mxu2 }
  0xcb   : > { %v372_v60 = vpop.f32.mrf.mxu3  ;;  %v310_v61 = vadd.f32 %v305_v59, %v262_v58  ;;  %384 = sbr.rel (%p623_p9) target bundleno = 237 (0xed), region = 36 }
  0xcd   : > { %v377_v62 = vadd.f32 %v372_v60, %v310_v61 }
  0xcf   : > { %380 = vst [vmem:[#allocation2 + $0x8] sm:$0xff] %v377_v62 }
  0xd0   : > { %458 = vst [vmem:[%s807_s30] sm:$0xff] %v375_v53  ;;  %v385_v63 = vlaneseq }
  0xd1   : > { %459 = vst [vmem:[%s807_s30 + $0x8] sm:$0xff] %v376_v57 }
  0xd2   : > { %460 = vst [vmem:[%s807_s30 + $0x10] sm:$0xff] %v377_v62  ;;  %v386_v0 = vshrl.u32 %v385_v63, 7 }
  0xd4   : > { %v387_v1 = vadd.s32 8, %v386_v0  ;;  %v388_v2 = vadd.s32 16, %v386_v0  ;;  %v393_v3 = vand.u32 7, %v386_v0 }
  0xd6   : > { %v400_v4 = vand.u32 7, %v387_v1  ;;  %v407_v5 = vand.u32 7, %v388_v2  ;;  %vm425_vm1 = vcmp.lt.s32.totalorder %v393_v3, 3 }
  0xd7   : > { %v434_v6 = vsel %vm425_vm1, %v375_v53, 0.0 }
  0xd8   : > { %vm426_vm2 = vcmp.lt.s32.totalorder %v400_v4, 3  ;;  %vm427_vm3 = vcmp.lt.s32.totalorder %v407_v5, 3  ;;  %v446_v7 = vmul.f32 %v434_v6, %v434_v6 }
  0xd9   : > { %v435_v8 = vsel %vm426_vm2, %v376_v57, 0.0  ;;  %v436_v9 = vsel %vm427_vm3, %v377_v62, 0.0 }
  0xda   : > { %v437_v10 = vadd.f32 %v435_v8, %v434_v6  ;;  %v447_v11 = vmul.f32 %v435_v8, %v435_v8  ;;  %v448_v12 = vmul.f32 %v436_v9, %v436_v9 }
  0xdc   : > { %v438_v13 = vadd.f32 %v437_v10, %v436_v9  ;;  %v449_v14 = vadd.f32 %v447_v11, %v446_v7 }
  0xde   : > { %v439_v15 = vrot.slane %v438_v13, 4  ;;  %v450_v16 = vadd.f32 %v449_v14, %v448_v12 }
  0xe0   : > { %v440_v17 = vadd.f32 %v439_v15, %v438_v13  ;;  %v451_v18 = vrot.slane %v450_v16, 4 }
  0xe2   : > { %v441_v19 = vrot.slane %v440_v17, 2  ;;  %v452_v20 = vadd.f32 %v451_v18, %v450_v16 }
  0xe4   : > { %v442_v21 = vadd.f32 %v441_v19, %v440_v17  ;;  %v453_v22 = vrot.slane %v452_v20, 2 }
  0xe6   : > { %v443_v23 = vrot.slane %v442_v21, 1  ;;  %v454_v24 = vadd.f32 %v453_v22, %v452_v20 }
  0xe8   : > { %v444_v25 = vadd.f32 %v443_v23, %v442_v21  ;;  %v455_v26 = vrot.slane %v454_v24, 1 }
  0xea   : > { %445 = vst [vmem:[%s243_s8] sm:$0x1] %v444_v25  ;;  %v456_v27 = vadd.f32 %v455_v26, %v454_v24 }
  0xec   : > { %457 = vst [vmem:[%s246_s14] sm:$0x1] %v456_v27 }
  0xed PF: > { %s15_s19 = sadd.s32 1, %s740_s19   ;;  %s904_s15 = smov %s732_s17 }
  0xee   : > { %p12_p10 = scmp.ge.s32.totalorder %s15_s19, 18   ;;  %s905_s16 = smov %s736_s18 }
  0xef   : > { %s906_s17 = smov %s909_s20  ;;  %s907_s18 = smov %s913_s21 }
  0xf0   :  { %14 = sbr.rel (!%p12_p10) target bundleno = 3 (0x3), region = 92 }

// kernel: _lambda_.8
= control target key start
LH: loop header
LB: loop body
LE: loop exit
PB: predicated region body
PF: predicated region fallthrough
CT: control target
= control target key end

     0   :  { %s962_s15 = smov 0   ;;  %s964_s16 = smov 0   ;;  %s1137_s0 = inlined_call_operand.vmem [shape: f32[4,8,11,128], index: 0, kind: input, shape index: {}]   ;;  %s1138_s1 = inlined_call_operand.vmem [shape: f32[16,128,128], index: 1, kind: input, shape index: {}]   ;;  %s1139_s2 = inlined_call_operand.vmem [shape: f32[8,8,128], index: 2, kind: output, shape index: {0}]   ;;  %s1140_s3 = inlined_call_operand.vmem [shape: f32[2,1,128], index: 3, kind: output, shape index: {1}]   ;;  %s1141_s4 = inlined_call_operand.vmem [shape: f32[2,1,128], index: 4, kind: output, shape index: {2}]  }
   0x1   :  { %s966_s17 = smov 0   ;;  %s968_s18 = smov 0  }
   0x2   :  { %s970_s19 = smov 0  }
   0x3 LB: > { %s24_s20 = sadd.s32 1, %s926_s17  ;;  %s27_s21 = sadd.s32 1, %s930_s18  ;;  %s934_s19 = sphi %s970_s19, %s15_s19   ;;  %s930_s18 = sphi %s968_s18, %s1145_s18   ;;  %s926_s17 = sphi %s966_s17, %s1144_s17   ;;  %s922_s16 = sphi %s964_s16, %s1143_s16   ;;  %s918_s15 = sphi %s962_s15, %s1142_s15  }
   0x4   : > { %p25_p0 = scmp.ge.s32.totalorder %s24_s20, 4  ;;  %p784_p1 = scmp.ge.s32.totalorder %s934_s19, 1 }
   0x5   : > { %p187_p2 = scmp.lt.s32.totalorder %s934_s19, 9 }
   0x6   : > { %s1147_s20 = smov (%p25_p0, %s24_s20), 0  ;;  %s1149_s21 = smov (!%p25_p0, %s27_s21), %s930_s18 }
   0x7   : > { %p188_p3 = pnand %p784_p1, %p187_p2  ;;  %p29_p4 = scmp.ge.s32.totalorder %s1149_s21, 2 }
   0x8   : > { %s785_s22 = sshll.u32 (!%p188_p3), %s922_s16, 2  ;;  %p225_p5 = scmp.lt.s32.totalorder (!%p188_p3), %s918_s15, 3 }
   0x9   : > { %s1151_s21 = smov (%p29_p4, %s1149_s21), 0  ;;  %191 = sbr.rel (%p188_p3) target bundleno = 257 (0x101), region = 28 }
   0xa   : > { %p227_p6 = scmp.lt.s32.totalorder (!%p188_p3), %s785_s22, 7  ;;  %p241_p7 = scmp.lt.s32.totalorder (!%p188_p3), %s922_s16, 1 }
   0xb   : > { %p791_p8 = scmp.ne.s32.totalorder (!%p188_p3), %s918_s15, 0 }
   0xe   : > { %s226_s23 = scalar_select %p225_p5, %s918_s15, 3 }
   0xf   : > { %s1153_s22 = smov (!%p227_p6, %s785_s22), 7  ;;  %s1155_s16 = smov (!%p241_p7, %s922_s16), 1 }
  0x10   : > { %s787_s24 = sshll.u32 %s226_s23, 4  ;;  %s786_s25 = sshll.u32 %s1153_s22, 1 }
  0x11   : > { %s790_s26 = sshll.u32 %s1153_s22, 3  ;;  %s231_s27 = sadd.s32 %s787_s24, %s786_s25 }
  0x12   : > { %s999_s30 = scalar_lea.vmem %s1139_s2, %s790_s26  ;;  %s788_s5 = sshll.u32 %s231_s27, 3 }
  0x13   : > { %s1004_s8 = scalar_lea.vmem %s1137_s0, %s788_s5  ;;  %s243_s11 = scalar_lea.vmem %s1140_s3, %s1155_s16 }
  0x14   : > { %s246_s14 = scalar_lea.vmem %s1141_s4, %s1155_s16  ;;  %250 = sbr.rel (%p791_p8) target bundleno = 30 (0x1e), region = 32 }
  0x19   : > { %v936_v0 = vmov 0.0  }
  0x1a   : > { %251 = vst [vmem:[#allocation2 + $0x10] sm:$0xff] %v936_v0 }
  0x1b   : > { %252 = vst [vmem:[#allocation2] sm:$0xff] %v936_v0 }
  0x1c   : > { %253 = vst [vmem:[#allocation2 + $0x18] sm:$0xff] %v936_v0 }
  0x1d   : > { %254 = vst [vmem:[#allocation2 + $0x8] sm:$0xff] %v936_v0 }
  0x1e PF: > { %s851_s22 = sshll.u32 %s918_s15, 9  ;;  %v255_v49 = vld [vmem:[%s1004_s8] sm:$0xff]  ;;  %v256_v52 = vld [vmem:[%s1004_s8 + $0x8] sm:$0x7]  ;;  %vm396_vm0 = vcmask 1045504   ;;  %vm465_vm1 = vcmask 1044480  }
  0x1f   : > { %s1021_s25 = scalar_lea.vmem %s1138_s1, %s851_s22  ;;  %v397_v59 = vrot.slane %v255_v49, 2  ;;  %v398_v60 = vrot.slane %v256_v52, 2  ;;  %v466_v63 = vrot.slane %v255_v49, 3  ;;  %v467_v0 = vrot.slane %v256_v52, 3  ;;  %p848_p9 = scmp.ne.s32.totalorder %s918_s15, 3 }
  0x20   : > { %v829_v1 = vld [vmem:[%s1021_s25 + $0x178] sm:$0xff]  ;;  %v828_v3 = vld [vmem:[%s1021_s25 + $0x170] sm:$0xff]  ;;  %v827_v7 = vld [vmem:[%s1021_s25 + $0x168] sm:$0xff]  ;;  %vm327_vm2 = vcmask 1046528  }
  0x21   : > { %v285_v2 = vld [vmem:[%s1021_s25 + $0x78] sm:$0xff]  ;;  %432 = vmatpush.msra.mxu2 %v829_v1  ;;  %v284_v5 = vld [vmem:[%s1021_s25 + $0x70] sm:$0xff]  ;;  %v283_v9 = vld [vmem:[%s1021_s25 + $0x68] sm:$0xff] }
  0x22   : > { %286 = vmatpush.msra.mxu0 %v285_v2  ;;  %v847_v4 = vld [vmem:[%s1021_s25 + $0x1f8] sm:$0xff]  ;;  %v846_v8 = vld [vmem:[%s1021_s25 + $0x1f0] sm:$0xff]  ;;  %v845_v11 = vld [vmem:[%s1021_s25 + $0x1e8] sm:$0xff] }
  0x23   : > { %v811_v6 = vld [vmem:[%s1021_s25 + $0xf8] sm:$0xff]  ;;  %501 = vmatpush.msra.mxu3 %v847_v4  ;;  %433 = vmatpush.msra.mxu2 %v828_v3  ;;  %v810_v10 = vld [vmem:[%s1021_s25 + $0xf0] sm:$0xff]  ;;  %v826_v12 = vld [vmem:[%s1021_s25 + $0x160] sm:$0xff] }
  0x24   : > { %363 = vmatpush.msra.mxu1 %v811_v6  ;;  %287 = vmatpush.msra.mxu0 %v284_v5  ;;  %v282_v13 = vld [vmem:[%s1021_s25 + $0x60] sm:$0xff]  ;;  %v809_v14 = vld [vmem:[%s1021_s25 + $0xe8] sm:$0xff]  ;;  %v825_v17 = vld [vmem:[%s1021_s25 + $0x158] sm:$0xff]  ;;  %v328_v5 = vrot.slane %v255_v49, 1  ;;  %v329_v6 = vrot.slane %v256_v52, 1 }
  0x25   : > { %502 = vmatpush.msra.mxu3 %v846_v8  ;;  %434 = vmatpush.msra.mxu2 %v827_v7  ;;  %v844_v15 = vld [vmem:[%s1021_s25 + $0x1e0] sm:$0xff]  ;;  %v281_v18 = vld [vmem:[%s1021_s25 + $0x58] sm:$0xff]  ;;  %v824_v21 = vld [vmem:[%s1021_s25 + $0x150] sm:$0xff]  ;;  %v399_v7 = vsel %vm396_vm0, %v397_v59, %v398_v60 }
  0x26   : > { %364 = vmatpush.msra.mxu1 %v810_v10  ;;  %288 = vmatpush.msra.mxu0 %v283_v9  ;;  %v808_v16 = vld [vmem:[%s1021_s25 + $0xe0] sm:$0xff]  ;;  %v843_v19 = vld [vmem:[%s1021_s25 + $0x1d8] sm:$0xff]  ;;  %v280_v22 = vld [vmem:[%s1021_s25 + $0x50] sm:$0xff]  ;;  %v468_v9 = vsel %vm465_vm1, %v466_v63, %v467_v0 }
  0x27   : > { %503 = vmatpush.msra.mxu3 %v845_v11  ;;  %435 = vmatpush.msra.mxu2 %v826_v12  ;;  %v807_v20 = vld [vmem:[%s1021_s25 + $0xd8] sm:$0xff]  ;;  %v842_v23 = vld [vmem:[%s1021_s25 + $0x1d0] sm:$0xff]  ;;  %v823_v25 = vld [vmem:[%s1021_s25 + $0x148] sm:$0xff] }
  0x28   : > { %365 = vmatpush.msra.mxu1 %v809_v14  ;;  %289 = vmatpush.msra.mxu0 %v282_v13  ;;  %v806_v24 = vld [vmem:[%s1021_s25 + $0xd0] sm:$0xff]  ;;  %v279_v26 = vld [vmem:[%s1021_s25 + $0x48] sm:$0xff]  ;;  %v822_v29 = vld [vmem:[%s1021_s25 + $0x140] sm:$0xff]  ;;  %v330_v13 = vsel %vm327_vm2, %v328_v5, %v329_v6 }
  0x29   : > { %504 = vmatpush.msra.mxu3 %v844_v15  ;;  %436 = vmatpush.msra.mxu2 %v825_v17  ;;  %v841_v27 = vld [vmem:[%s1021_s25 + $0x1c8] sm:$0xff]  ;;  %v278_v30 = vld [vmem:[%s1021_s25 + $0x40] sm:$0xff]  ;;  %v821_v33 = vld [vmem:[%s1021_s25 + $0x138] sm:$0xff] }
  0x2a   : > { %366 = vmatpush.msra.mxu1 %v808_v16  ;;  %290 = vmatpush.msra.mxu0 %v281_v18  ;;  %v805_v28 = vld [vmem:[%s1021_s25 + $0xc8] sm:$0xff]  ;;  %v840_v31 = vld [vmem:[%s1021_s25 + $0x1c0] sm:$0xff]  ;;  %v277_v34 = vld [vmem:[%s1021_s25 + $0x38] sm:$0xff] }
  0x2b   : > { %505 = vmatpush.msra.mxu3 %v843_v19  ;;  %437 = vmatpush.msra.mxu2 %v824_v21  ;;  %v804_v32 = vld [vmem:[%s1021_s25 + $0xc0] sm:$0xff]  ;;  %v839_v35 = vld [vmem:[%s1021_s25 + $0x1b8] sm:$0xff]  ;;  %v820_v37 = vld [vmem:[%s1021_s25 + $0x130] sm:$0xff] }
  0x2c   : > { %367 = vmatpush.msra.mxu1 %v807_v20  ;;  %291 = vmatpush.msra.mxu0 %v280_v22  ;;  %v803_v36 = vld [vmem:[%s1021_s25 + $0xb8] sm:$0xff]  ;;  %v276_v38 = vld [vmem:[%s1021_s25 + $0x30] sm:$0xff]  ;;  %v819_v41 = vld [vmem:[%s1021_s25 + $0x128] sm:$0xff] }
  0x2d   : > { %506 = vmatpush.msra.mxu3 %v842_v23  ;;  %438 = vmatpush.msra.mxu2 %v823_v25  ;;  %v838_v39 = vld [vmem:[%s1021_s25 + $0x1b0] sm:$0xff]  ;;  %v275_v42 = vld [vmem:[%s1021_s25 + $0x28] sm:$0xff]  ;;  %v818_v45 = vld [vmem:[%s1021_s25 + $0x120] sm:$0xff] }
  0x2e   : > { %368 = vmatpush.msra.mxu1 %v806_v24  ;;  %292 = vmatpush.msra.mxu0 %v279_v26  ;;  %v802_v40 = vld [vmem:[%s1021_s25 + $0xb0] sm:$0xff]  ;;  %v837_v43 = vld [vmem:[%s1021_s25 + $0x1a8] sm:$0xff]  ;;  %v274_v46 = vld [vmem:[%s1021_s25 + $0x20] sm:$0xff] }
  0x2f   : > { %507 = vmatpush.msra.mxu3 %v841_v27  ;;  %439 = vmatpush.msra.mxu2 %v822_v29  ;;  %v801_v44 = vld [vmem:[%s1021_s25 + $0xa8] sm:$0xff]  ;;  %v836_v47 = vld [vmem:[%s1021_s25 + $0x1a0] sm:$0xff]  ;;  %v817_v50 = vld [vmem:[%s1021_s25 + $0x118] sm:$0xff] }
  0x30   : > { %369 = vmatpush.msra.mxu1 %v805_v28  ;;  %293 = vmatpush.msra.mxu0 %v278_v30  ;;  %v800_v48 = vld [vmem:[%s1021_s25 + $0xa0] sm:$0xff]  ;;  %v273_v51 = vld [vmem:[%s1021_s25 + $0x18] sm:$0xff]  ;;  %v816_v55 = vld [vmem:[%s1021_s25 + $0x110] sm:$0xff] }
  0x31   : > { %508 = vmatpush.msra.mxu3 %v840_v31  ;;  %440 = vmatpush.msra.mxu2 %v821_v33  ;;  %v835_v53 = vld [vmem:[%s1021_s25 + $0x198] sm:$0xff]  ;;  %v272_v56 = vld [vmem:[%s1021_s25 + $0x10] sm:$0xff]  ;;  %v815_v61 = vld [vmem:[%s1021_s25 + $0x108] sm:$0xff] }
  0x32   : > { %370 = vmatpush.msra.mxu1 %v804_v32  ;;  %294 = vmatpush.msra.mxu0 %v277_v34  ;;  %v799_v54 = vld [vmem:[%s1021_s25 + $0x98] sm:$0xff]  ;;  %v834_v57 = vld [vmem:[%s1021_s25 + $0x190] sm:$0xff]  ;;  %v271_v62 = vld [vmem:[%s1021_s25 + $0x8] sm:$0xff] }
  0x33   : > { %509 = vmatpush.msra.mxu3 %v839_v35  ;;  %441 = vmatpush.msra.mxu2 %v820_v37  ;;  %v798_v58 = vld [vmem:[%s1021_s25 + $0x90] sm:$0xff]  ;;  %v833_v1 = vld [vmem:[%s1021_s25 + $0x188] sm:$0xff]  ;;  %v814_v3 = vld [vmem:[%s1021_s25 + $0x100] sm:$0xff] }
  0x34   : > { %371 = vmatpush.msra.mxu1 %v803_v36  ;;  %295 = vmatpush.msra.mxu0 %v276_v38  ;;  %v797_v2 = vld [vmem:[%s1021_s25 + $0x88] sm:$0xff]  ;;  %v270_v4 = vld [vmem:[%s1021_s25] sm:$0xff]  ;;  %v257_v10 = vld [vmem:[%s1004_s8 + $0x10] sm:$0xff] }
  0x35   : > { %510 = vmatpush.msra.mxu3 %v838_v39  ;;  %442 = vmatpush.msra.mxu2 %v819_v41  ;;  %v832_v8 = vld [vmem:[%s1021_s25 + $0x180] sm:$0xff]  ;;  %v258_v11 = vld [vmem:[%s1004_s8 + $0x18] sm:$0x7]  ;;  %v400_v14 = vrot.slane %v257_v10, 2  ;;  %v469_v16 = vrot.slane %v257_v10, 3  ;;  %v331_v18 = vrot.slane %v257_v10, 1 }
  0x36   : > { %372 = vmatpush.msra.mxu1 %v802_v40  ;;  %296 = vmatpush.msra.mxu0 %v275_v42  ;;  %v796_v12 = vld [vmem:[%s1021_s25 + $0x80] sm:$0xff]  ;;  %v401_v15 = vrot.slane %v258_v11, 2  ;;  %v470_v17 = vrot.slane %v258_v11, 3  ;;  %v332_v19 = vrot.slane %v258_v11, 1  ;;  %v260_v23 = vld [vmem:[%s1004_s8 + $0x28] sm:$0x7] }
  0x37   : > { %511 = vmatpush.msra.mxu3 %v837_v43  ;;  %443 = vmatpush.msra.mxu2 %v818_v45  ;;  %v259_v22 = vld [vmem:[%s1004_s8 + $0x20] sm:$0xff]  ;;  %v404_v26 = vrot.slane %v260_v23, 2  ;;  %v473_v28 = vrot.slane %v260_v23, 3  ;;  %v335_v30 = vrot.slane %v260_v23, 1  ;;  %v261_v33 = vld [vmem:[%s1004_s8 + $0x30] sm:$0xff] }
  0x38   : > { %373 = vmatpush.msra.mxu1 %v801_v44  ;;  %297 = vmatpush.msra.mxu0 %v274_v46  ;;  %v402_v20 = vsel %vm396_vm0, %v400_v14, %v401_v15  ;;  %v471_v21 = vsel %vm465_vm1, %v469_v16, %v470_v17  ;;  %v333_v24 = vsel %vm327_vm2, %v331_v18, %v332_v19  ;;  %v403_v25 = vrot.slane %v259_v22, 2  ;;  %v262_v34 = vld [vmem:[%s1004_s8 + $0x38] sm:$0x7]  ;;  %v263_v45 = vld [vmem:[#allocation2 + $0x10] sm:$0xff] }
  0x39   : > { %512 = vmatpush.msra.mxu3 %v836_v47  ;;  %444 = vmatpush.msra.mxu2 %v817_v50  ;;  %v472_v27 = vrot.slane %v259_v22, 3  ;;  %v334_v29 = vrot.slane %v259_v22, 1  ;;  %v406_v36 = vrot.slane %v261_v33, 2  ;;  %v407_v37 = vrot.slane %v262_v34, 2 }
  0x3a   : > { %374 = vmatpush.msra.mxu1 %v800_v48  ;;  %298 = vmatpush.msra.mxu0 %v273_v51  ;;  %v405_v31 = vsel %vm396_vm0, %v403_v25, %v404_v26  ;;  %v475_v38 = vrot.slane %v261_v33, 3  ;;  %v476_v39 = vrot.slane %v262_v34, 3  ;;  %v337_v40 = vrot.slane %v261_v33, 1 }
  0x3b   : > { %513 = vmatpush.msra.mxu3 %v835_v53  ;;  %445 = vmatpush.msra.mxu2 %v816_v55  ;;  %v474_v32 = vsel %vm465_vm1, %v472_v27, %v473_v28  ;;  %v336_v35 = vsel %vm327_vm2, %v334_v29, %v335_v30  ;;  %v338_v41 = vrot.slane %v262_v34, 1  ;;  %v408_v42 = vsel %vm396_vm0, %v406_v36, %v407_v37  ;;  %v264_v53 = vld [vmem:[#allocation2] sm:$0xff] }
  0x3c   : > { %375 = vmatpush.msra.mxu1 %v799_v54  ;;  %299 = vmatpush.msra.mxu0 %v272_v56  ;;  %v477_v43 = vsel %vm465_vm1, %v475_v38, %v476_v39 }
  0x3d   : > { %514 = vmatpush.msra.mxu3 %v834_v57  ;;  %446 = vmatpush.msra.mxu2 %v815_v61  ;;  %v339_v44 = vsel %vm327_vm2, %v337_v40, %v338_v41 }
  0x3e   : > { %376 = vmatpush.msra.mxu1 %v798_v58  ;;  %300 = vmatpush.msra.mxu0 %v271_v62  ;;  %v265_v62 = vld [vmem:[#allocation2 + $0x18] sm:$0xff] }
  0x3f   : > { %515 = vmatpush.msra.mxu3 %v833_v1  ;;  %447 = vmatpush.msra.mxu2 %v814_v3 }
  0x40   : > { %377 = vmatpush.msra.mxu1 %v797_v2  ;;  %301 = vmatpush.msra.mxu0 %v270_v4 }
  0x41   : > { %448 = vmatmul.f32.vlgmr.msra.gmra.mxu2 %v399_v7  ;;  %516 = vmatpush.msra.mxu3 %v832_v8  ;;  %v266_v7 = vld [vmem:[#allocation2 + $0x8] sm:$0xff] }
  0x42   : > { %302 = vmatmul.f32.vlgmr.msra.gmra.mxu0 %v255_v49  ;;  %517 = vmatmul.f32.vlgmr.msra.gmra.mxu3 %v468_v9 }
  0x43   : > { %378 = vmatpush.msra.mxu1 %v796_v12 }
  0x44   : > { %379 = vmatmul.f32.vlgmr.msra.gmra.mxu1 %v330_v13 }
  0x49   : > { %451 = vmatmul.f32.gmra.mxu2 %v402_v20 }
  0x4a   : > { %305 = vmatmul.f32.gmra.mxu0 %v257_v10  ;;  %520 = vmatmul.f32.gmra.mxu3 %v471_v21 }
  0x4c   : > { %382 = vmatmul.f32.gmra.mxu1 %v333_v24 }
  0x51   : > { %454 = vmatmul.f32.gmra.mxu2 %v405_v31 }
  0x52   : > { %308 = vmatmul.f32.gmra.mxu0 %v259_v22  ;;  %523 = vmatmul.f32.gmra.mxu3 %v474_v32 }
  0x54   : > { %385 = vmatmul.f32.gmra.mxu1 %v336_v35 }
  0x59   : > { %457 = vmatmul.f32.gmra.mxu2 %v408_v42 }
  0x5a   : > { %311 = vmatmul.f32.gmra.mxu0 %v261_v33  ;;  %526 = vmatmul.f32.gmra.mxu3 %v477_v43 }
  0x5c   : > { %388 = vmatmul.f32.gmra.mxu1 %v339_v44 }
  0xbf   : > { %v303_v46 = vpop.f32.mrf.mxu0 }
  0xc0   : > { %v315_v47 = vadd.f32 %v303_v46, %v263_v45 }
  0xc1   : > { %v380_v48 = vpop.f32.mrf.mxu1 }
  0xc2   : > { %v392_v49 = vadd.f32 %v380_v48, %v315_v47 }
  0xc4   : > { %v449_v50 = vpop.f32.mrf.mxu2 }
  0xc5   : > { %v461_v51 = vadd.f32 %v449_v50, %v392_v49  ;;  %v518_v52 = vpop.f32.mrf.mxu3 }
  0xc7   : > { %v530_v54 = vadd.f32 %v518_v52, %v461_v51  ;;  %v306_v55 = vpop.f32.mrf.mxu0 }
  0xc8   : > { %v316_v56 = vadd.f32 %v306_v55, %v264_v53 }
  0xc9   : > { %534 = vst [vmem:[#allocation2 + $0x10] sm:$0xff] %v530_v54  ;;  %v383_v57 = vpop.f32.mrf.mxu1 }
  0xca   : > { %v393_v58 = vadd.f32 %v383_v57, %v316_v56 }
  0xcc   : > { %v452_v59 = vpop.f32.mrf.mxu2 }
  0xcd   : > { %v462_v60 = vadd.f32 %v452_v59, %v393_v58  ;;  %v521_v61 = vpop.f32.mrf.mxu3 }
  0xcf   : > { %v531_v63 = vadd.f32 %v521_v61, %v462_v60  ;;  %v309_v0 = vpop.f32.mrf.mxu0 }
  0xd0   : > { %v317_v1 = vadd.f32 %v309_v0, %v265_v62 }
  0xd1   : > { %535 = vst [vmem:[#allocation2] sm:$0xff] %v531_v63  ;;  %v386_v2 = vpop.f32.mrf.mxu1 }
  0xd2   : > { %v394_v3 = vadd.f32 %v386_v2, %v317_v1 }
  0xd4   : > { %v455_v4 = vpop.f32.mrf.mxu2 }
  0xd5   : > { %v463_v5 = vadd.f32 %v455_v4, %v394_v3  ;;  %v524_v6 = vpop.f32.mrf.mxu3 }
  0xd7   : > { %v532_v8 = vadd.f32 %v524_v6, %v463_v5  ;;  %v312_v9 = vpop.f32.mrf.mxu0 }
  0xd8   : > { %v318_v10 = vadd.f32 %v312_v9, %v266_v7 }
  0xd9   : > { %536 = vst [vmem:[#allocation2 + $0x18] sm:$0xff] %v532_v8  ;;  %v389_v11 = vpop.f32.mrf.mxu1 }
  0xda   : > { %v395_v12 = vadd.f32 %v389_v11, %v318_v10 }
  0xdc   : > { %v458_v13 = vpop.f32.mrf.mxu2 }
  0xdd   : > { %v464_v14 = vadd.f32 %v458_v13, %v395_v12  ;;  %v527_v15 = vpop.f32.mrf.mxu3  ;;  %541 = sbr.rel (%p848_p9) target bundleno = 257 (0x101), region = 36 }
  0xdf   : > { %v533_v16 = vadd.f32 %v527_v15, %v464_v14 }
  0xe1   : > { %537 = vst [vmem:[#allocation2 + $0x8] sm:$0xff] %v533_v16 }
  0xe2   : > { %635 = vst [vmem:[%s999_s30] sm:$0xff] %v530_v54  ;;  %v542_v17 = vlaneseq }
  0xe3   : > { %636 = vst [vmem:[%s999_s30 + $0x8] sm:$0xff] %v531_v63 }
  0xe4   : > { %637 = vst [vmem:[%s999_s30 + $0x10] sm:$0xff] %v532_v8  ;;  %v543_v18 = vshrl.u32 %v542_v17, 7 }
  0xe5   : > { %638 = vst [vmem:[%s999_s30 + $0x18] sm:$0xff] %v533_v16 }
  0xe6   : > { %v544_v19 = vadd.s32 8, %v543_v18  ;;  %v545_v20 = vadd.s32 16, %v543_v18  ;;  %v546_v21 = vadd.s32 24, %v543_v18  ;;  %v551_v22 = vand.u32 7, %v543_v18 }
  0xe8   : > { %v558_v23 = vand.u32 7, %v544_v19  ;;  %v565_v24 = vand.u32 7, %v545_v20  ;;  %v572_v25 = vand.u32 7, %v546_v21  ;;  %vm595_vm3 = vcmp.lt.s32.totalorder %v551_v22, 4 }
  0xe9   : > { %v607_v26 = vsel %vm595_vm3, %v530_v54, 0.0 }
  0xea   : > { %vm596_vm4 = vcmp.lt.s32.totalorder %v558_v23, 4  ;;  %vm597_vm5 = vcmp.lt.s32.totalorder %v565_v24, 4  ;;  %vm598_vm6 = vcmp.lt.s32.totalorder %v572_v25, 4  ;;  %v621_v27 = vmul.f32 %v607_v26, %v607_v26 }
  0xeb   : > { %v608_v28 = vsel %vm596_vm4, %v531_v63, 0.0  ;;  %v609_v29 = vsel %vm597_vm5, %v532_v8, 0.0  ;;  %v610_v30 = vsel %vm598_vm6, %v533_v16, 0.0 }
  0xec   : > { %v611_v31 = vadd.f32 %v608_v28, %v607_v26  ;;  %v622_v32 = vmul.f32 %v608_v28, %v608_v28  ;;  %v623_v33 = vmul.f32 %v609_v29, %v609_v29  ;;  %v624_v35 = vmul.f32 %v610_v30, %v610_v30 }
  0xee   : > { %v612_v34 = vadd.f32 %v611_v31, %v609_v29  ;;  %v625_v36 = vadd.f32 %v622_v32, %v621_v27 }
  0xf0   : > { %v613_v37 = vadd.f32 %v612_v34, %v610_v30  ;;  %v626_v38 = vadd.f32 %v625_v36, %v623_v33 }
  0xf2   : > { %v614_v39 = vrot.slane %v613_v37, 4  ;;  %v627_v40 = vadd.f32 %v626_v38, %v624_v35 }
  0xf4   : > { %v615_v41 = vadd.f32 %v614_v39, %v613_v37  ;;  %v628_v42 = vrot.slane %v627_v40, 4 }
  0xf6   : > { %v616_v43 = vrot.slane %v615_v41, 2  ;;  %v629_v44 = vadd.f32 %v628_v42, %v627_v40 }
  0xf8   : > { %v617_v45 = vadd.f32 %v616_v43, %v615_v41  ;;  %v630_v46 = vrot.slane %v629_v44, 2 }
  0xfa   : > { %v618_v47 = vrot.slane %v617_v45, 1  ;;  %v631_v48 = vadd.f32 %v630_v46, %v629_v44 }
  0xfc   : > { %v619_v49 = vadd.f32 %v618_v47, %v617_v45  ;;  %v632_v50 = vrot.slane %v631_v48, 1 }
  0xfe   : > { %620 = vst [vmem:[%s243_s11] sm:$0x1] %v619_v49  ;;  %v633_v51 = vadd.f32 %v632_v50, %v631_v48 }
 0x100   : > { %634 = vst [vmem:[%s246_s14] sm:$0x1] %v633_v51 }
 0x101 PF: > { %s15_s19 = sadd.s32 1, %s934_s19   ;;  %s1142_s15 = smov %s926_s17 }
 0x102   : > { %p12_p10 = scmp.ge.s32.totalorder %s15_s19, 10   ;;  %s1143_s16 = smov %s930_s18 }
 0x103   : > { %s1144_s17 = smov %s1147_s20  ;;  %s1145_s18 = smov %s1151_s21 }
 0x104   :  { %14 = sbr.rel (!%p12_p10) target bundleno = 3 (0x3), region = 94 }

// kernel: _lambda_.9
= control target key start
LH: loop header
LB: loop body
LE: loop exit
PB: predicated region body
PF: predicated region fallthrough
CT: control target
= control target key end

     0   :  { %s814_s12 = smov 0   ;;  %s816_s13 = smov 0   ;;  %s978_s0 = inlined_call_operand.vmem [shape: f32[4,10,11,128], index: 0, kind: input, shape index: {}]   ;;  %s979_s1 = inlined_call_operand.vmem [shape: f32[16,128,128], index: 1, kind: input, shape index: {}]   ;;  %s980_s2 = inlined_call_operand.vmem [shape: f32[1,128], index: 2, kind: input, shape index: {}]   ;;  %s981_s3 = inlined_call_operand.vmem [shape: f32[10,8,128], index: 3, kind: output, shape index: {}]  }
   0x1   :  { %s818_s14 = smov 0   ;;  %s820_s15 = smov 0  }
   0x2   :  { %s822_s16 = smov 0  }
   0x3 LB: > { %s22_s17 = sadd.s32 1, %s783_s14  ;;  %s25_s18 = sadd.s32 1, %s787_s15  ;;  %s791_s16 = sphi %s822_s16, %s13_s16   ;;  %s787_s15 = sphi %s820_s15, %s985_s15   ;;  %s783_s14 = sphi %s818_s14, %s984_s14   ;;  %s779_s13 = sphi %s816_s13, %s983_s13   ;;  %s775_s12 = sphi %s814_s12, %s982_s12  }
   0x4   : > { %p23_p0 = scmp.ge.s32.totalorder %s22_s17, 4  ;;  %p642_p1 = scmp.ge.s32.totalorder %s791_s16, 1 }
   0x5   : > { %p157_p2 = scmp.lt.s32.totalorder %s791_s16, 9 }
   0x6   : > { %s987_s17 = smov (%p23_p0, %s22_s17), 0  ;;  %s989_s18 = smov (!%p23_p0, %s25_s18), %s787_s15 }
   0x7   : > { %p158_p3 = pnand %p642_p1, %p157_p2  ;;  %p27_p4 = scmp.ge.s32.totalorder %s989_s18, 2 }
   0x8   : > { %s186_s19 = smul.u32 (!%p158_p3), 5, %s779_s13  ;;  %p187_p5 = scmp.lt.s32.totalorder (!%p158_p3), %s775_s12, 3 }
   0x9   : > { %s991_s18 = smov (%p27_p4, %s989_s18), 0  ;;  %161 = sbr.rel (%p158_p3) target bundleno = 240 (0xf0), region = 32 }
   0xa   : > { %p189_p6 = scmp.lt.s32.totalorder (!%p158_p3), %s186_s19, 9  ;;  %p646_p7 = scmp.ne.s32.totalorder (!%p158_p3), %s775_s12, 0 }
   0xe   : > { %s188_s20 = scalar_select %p187_p5, %s775_s12, 3 }
   0xf   : > { %s993_s19 = smov (!%p189_p6, %s186_s19), 9 }
  0x10   : > { %s710_s21 = smul.u32 20, %s188_s20  ;;  %s643_s22 = sshll.u32 %s993_s19, 1 }
  0x11   : > { %s645_s23 = sshll.u32 %s993_s19, 3  ;;  %206 = sbr.rel (%p646_p7) target bundleno = 28 (0x1c), region = 36 }
  0x12   : > { %s193_s24 = sadd.s32 %s710_s21, %s643_s22  ;;  %s851_s27 = scalar_lea.vmem %s981_s3, %s645_s23 }
  0x13   : > { %s644_s28 = sshll.u32 %s193_s24, 3 }
  0x14   : > { %s856_s4 = scalar_lea.vmem %s978_s0, %s644_s28 }
  0x16   : > { %v793_v0 = vmov 0.0  }
  0x17   : > { %207 = vst [vmem:[#allocation2 + $0x8] sm:$0xff] %v793_v0 }
  0x18   : > { %208 = vst [vmem:[#allocation2] sm:$0xff] %v793_v0 }
  0x19   : > { %209 = vst [vmem:[#allocation2 + $0x20] sm:$0xff] %v793_v0 }
  0x1a   : > { %210 = vst [vmem:[#allocation2 + $0x10] sm:$0xff] %v793_v0 }
  0x1b   : > { %211 = vst [vmem:[#allocation2 + $0x18] sm:$0xff] %v793_v0 }
  0x1c PF: > { %s706_s5 = sshll.u32 %s775_s12, 9  ;;  %v212_v49 = vld [vmem:[%s856_s4] sm:$0xff]  ;;  %v213_v52 = vld [vmem:[%s856_s4 + $0x8] sm:$0x7]  ;;  %vm370_vm0 = vcmask 1045504   ;;  %vm447_vm1 = vcmask 1044480  }
  0x1d   : > { %s863_s8 = scalar_lea.vmem %s979_s1, %s706_s5  ;;  %v371_v59 = vrot.slane %v212_v49, 2  ;;  %v372_v60 = vrot.slane %v213_v52, 2  ;;  %v448_v63 = vrot.slane %v212_v49, 3  ;;  %v449_v0 = vrot.slane %v213_v52, 3  ;;  %p703_p8 = scmp.ne.s32.totalorder %s775_s12, 3 }
  0x1e   : > { %v684_v1 = vld [vmem:[%s863_s8 + $0x178] sm:$0xff]  ;;  %v683_v3 = vld [vmem:[%s863_s8 + $0x170] sm:$0xff]  ;;  %v682_v7 = vld [vmem:[%s863_s8 + $0x168] sm:$0xff]  ;;  %vm293_vm2 = vcmask 1046528  }
  0x1f   : > { %v245_v2 = vld [vmem:[%s863_s8 + $0x78] sm:$0xff]  ;;  %410 = vmatpush.msra.mxu2 %v684_v1  ;;  %v244_v5 = vld [vmem:[%s863_s8 + $0x70] sm:$0xff]  ;;  %v243_v9 = vld [vmem:[%s863_s8 + $0x68] sm:$0xff] }
  0x20   : > { %246 = vmatpush.msra.mxu0 %v245_v2  ;;  %v702_v4 = vld [vmem:[%s863_s8 + $0x1f8] sm:$0xff]  ;;  %v701_v8 = vld [vmem:[%s863_s8 + $0x1f0] sm:$0xff]  ;;  %v700_v11 = vld [vmem:[%s863_s8 + $0x1e8] sm:$0xff] }
  0x21   : > { %v666_v6 = vld [vmem:[%s863_s8 + $0xf8] sm:$0xff]  ;;  %487 = vmatpush.msra.mxu3 %v702_v4  ;;  %411 = vmatpush.msra.mxu2 %v683_v3  ;;  %v665_v10 = vld [vmem:[%s863_s8 + $0xf0] sm:$0xff]  ;;  %v681_v12 = vld [vmem:[%s863_s8 + $0x160] sm:$0xff] }
  0x22   : > { %333 = vmatpush.msra.mxu1 %v666_v6  ;;  %247 = vmatpush.msra.mxu0 %v244_v5  ;;  %v242_v13 = vld [vmem:[%s863_s8 + $0x60] sm:$0xff]  ;;  %v664_v14 = vld [vmem:[%s863_s8 + $0xe8] sm:$0xff]  ;;  %v680_v17 = vld [vmem:[%s863_s8 + $0x158] sm:$0xff]  ;;  %v294_v5 = vrot.slane %v212_v49, 1  ;;  %v295_v6 = vrot.slane %v213_v52, 1 }
  0x23   : > { %488 = vmatpush.msra.mxu3 %v701_v8  ;;  %412 = vmatpush.msra.mxu2 %v682_v7  ;;  %v699_v15 = vld [vmem:[%s863_s8 + $0x1e0] sm:$0xff]  ;;  %v241_v18 = vld [vmem:[%s863_s8 + $0x58] sm:$0xff]  ;;  %v679_v21 = vld [vmem:[%s863_s8 + $0x150] sm:$0xff]  ;;  %v373_v7 = vsel %vm370_vm0, %v371_v59, %v372_v60 }
  0x24   : > { %334 = vmatpush.msra.mxu1 %v665_v10  ;;  %248 = vmatpush.msra.mxu0 %v243_v9  ;;  %v663_v16 = vld [vmem:[%s863_s8 + $0xe0] sm:$0xff]  ;;  %v698_v19 = vld [vmem:[%s863_s8 + $0x1d8] sm:$0xff]  ;;  %v240_v22 = vld [vmem:[%s863_s8 + $0x50] sm:$0xff]  ;;  %v450_v9 = vsel %vm447_vm1, %v448_v63, %v449_v0 }
  0x25   : > { %489 = vmatpush.msra.mxu3 %v700_v11  ;;  %413 = vmatpush.msra.mxu2 %v681_v12  ;;  %v662_v20 = vld [vmem:[%s863_s8 + $0xd8] sm:$0xff]  ;;  %v697_v23 = vld [vmem:[%s863_s8 + $0x1d0] sm:$0xff]  ;;  %v678_v25 = vld [vmem:[%s863_s8 + $0x148] sm:$0xff] }
  0x26   : > { %335 = vmatpush.msra.mxu1 %v664_v14  ;;  %249 = vmatpush.msra.mxu0 %v242_v13  ;;  %v661_v24 = vld [vmem:[%s863_s8 + $0xd0] sm:$0xff]  ;;  %v239_v26 = vld [vmem:[%s863_s8 + $0x48] sm:$0xff]  ;;  %v677_v29 = vld [vmem:[%s863_s8 + $0x140] sm:$0xff]  ;;  %v296_v13 = vsel %vm293_vm2, %v294_v5, %v295_v6 }
  0x27   : > { %490 = vmatpush.msra.mxu3 %v699_v15  ;;  %414 = vmatpush.msra.mxu2 %v680_v17  ;;  %v696_v27 = vld [vmem:[%s863_s8 + $0x1c8] sm:$0xff]  ;;  %v238_v30 = vld [vmem:[%s863_s8 + $0x40] sm:$0xff]  ;;  %v676_v33 = vld [vmem:[%s863_s8 + $0x138] sm:$0xff] }
  0x28   : > { %336 = vmatpush.msra.mxu1 %v663_v16  ;;  %250 = vmatpush.msra.mxu0 %v241_v18  ;;  %v660_v28 = vld [vmem:[%s863_s8 + $0xc8] sm:$0xff]  ;;  %v695_v31 = vld [vmem:[%s863_s8 + $0x1c0] sm:$0xff]  ;;  %v237_v34 = vld [vmem:[%s863_s8 + $0x38] sm:$0xff] }
  0x29   : > { %491 = vmatpush.msra.mxu3 %v698_v19  ;;  %415 = vmatpush.msra.mxu2 %v679_v21  ;;  %v659_v32 = vld [vmem:[%s863_s8 + $0xc0] sm:$0xff]  ;;  %v694_v35 = vld [vmem:[%s863_s8 + $0x1b8] sm:$0xff]  ;;  %v675_v37 = vld [vmem:[%s863_s8 + $0x130] sm:$0xff] }
  0x2a   : > { %337 = vmatpush.msra.mxu1 %v662_v20  ;;  %251 = vmatpush.msra.mxu0 %v240_v22  ;;  %v658_v36 = vld [vmem:[%s863_s8 + $0xb8] sm:$0xff]  ;;  %v236_v38 = vld [vmem:[%s863_s8 + $0x30] sm:$0xff]  ;;  %v674_v41 = vld [vmem:[%s863_s8 + $0x128] sm:$0xff] }
  0x2b   : > { %492 = vmatpush.msra.mxu3 %v697_v23  ;;  %416 = vmatpush.msra.mxu2 %v678_v25  ;;  %v693_v39 = vld [vmem:[%s863_s8 + $0x1b0] sm:$0xff]  ;;  %v235_v42 = vld [vmem:[%s863_s8 + $0x28] sm:$0xff]  ;;  %v673_v45 = vld [vmem:[%s863_s8 + $0x120] sm:$0xff] }
  0x2c   : > { %338 = vmatpush.msra.mxu1 %v661_v24  ;;  %252 = vmatpush.msra.mxu0 %v239_v26  ;;  %v657_v40 = vld [vmem:[%s863_s8 + $0xb0] sm:$0xff]  ;;  %v692_v43 = vld [vmem:[%s863_s8 + $0x1a8] sm:$0xff]  ;;  %v234_v46 = vld [vmem:[%s863_s8 + $0x20] sm:$0xff] }
  0x2d   : > { %493 = vmatpush.msra.mxu3 %v696_v27  ;;  %417 = vmatpush.msra.mxu2 %v677_v29  ;;  %v656_v44 = vld [vmem:[%s863_s8 + $0xa8] sm:$0xff]  ;;  %v691_v47 = vld [vmem:[%s863_s8 + $0x1a0] sm:$0xff]  ;;  %v672_v50 = vld [vmem:[%s863_s8 + $0x118] sm:$0xff] }
  0x2e   : > { %339 = vmatpush.msra.mxu1 %v660_v28  ;;  %253 = vmatpush.msra.mxu0 %v238_v30  ;;  %v655_v48 = vld [vmem:[%s863_s8 + $0xa0] sm:$0xff]  ;;  %v233_v51 = vld [vmem:[%s863_s8 + $0x18] sm:$0xff]  ;;  %v671_v55 = vld [vmem:[%s863_s8 + $0x110] sm:$0xff] }
  0x2f   : > { %494 = vmatpush.msra.mxu3 %v695_v31  ;;  %418 = vmatpush.msra.mxu2 %v676_v33  ;;  %v690_v53 = vld [vmem:[%s863_s8 + $0x198] sm:$0xff]  ;;  %v232_v56 = vld [vmem:[%s863_s8 + $0x10] sm:$0xff]  ;;  %v670_v61 = vld [vmem:[%s863_s8 + $0x108] sm:$0xff] }
  0x30   : > { %340 = vmatpush.msra.mxu1 %v659_v32  ;;  %254 = vmatpush.msra.mxu0 %v237_v34  ;;  %v654_v54 = vld [vmem:[%s863_s8 + $0x98] sm:$0xff]  ;;  %v689_v57 = vld [vmem:[%s863_s8 + $0x190] sm:$0xff]  ;;  %v231_v62 = vld [vmem:[%s863_s8 + $0x8] sm:$0xff] }
  0x31   : > { %495 = vmatpush.msra.mxu3 %v694_v35  ;;  %419 = vmatpush.msra.mxu2 %v675_v37  ;;  %v653_v58 = vld [vmem:[%s863_s8 + $0x90] sm:$0xff]  ;;  %v688_v1 = vld [vmem:[%s863_s8 + $0x188] sm:$0xff]  ;;  %v669_v3 = vld [vmem:[%s863_s8 + $0x100] sm:$0xff] }
  0x32   : > { %341 = vmatpush.msra.mxu1 %v658_v36  ;;  %255 = vmatpush.msra.mxu0 %v236_v38  ;;  %v652_v2 = vld [vmem:[%s863_s8 + $0x88] sm:$0xff]  ;;  %v230_v4 = vld [vmem:[%s863_s8] sm:$0xff]  ;;  %v214_v10 = vld [vmem:[%s856_s4 + $0x10] sm:$0xff] }
  0x33   : > { %496 = vmatpush.msra.mxu3 %v693_v39  ;;  %420 = vmatpush.msra.mxu2 %v674_v41  ;;  %v687_v8 = vld [vmem:[%s863_s8 + $0x180] sm:$0xff]  ;;  %v215_v11 = vld [vmem:[%s856_s4 + $0x18] sm:$0x7]  ;;  %v374_v14 = vrot.slane %v214_v10, 2  ;;  %v451_v16 = vrot.slane %v214_v10, 3  ;;  %v297_v18 = vrot.slane %v214_v10, 1 }
  0x34   : > { %342 = vmatpush.msra.mxu1 %v657_v40  ;;  %256 = vmatpush.msra.mxu0 %v235_v42  ;;  %v651_v12 = vld [vmem:[%s863_s8 + $0x80] sm:$0xff]  ;;  %v375_v15 = vrot.slane %v215_v11, 2  ;;  %v452_v17 = vrot.slane %v215_v11, 3  ;;  %v298_v19 = vrot.slane %v215_v11, 1  ;;  %v217_v23 = vld [vmem:[%s856_s4 + $0x28] sm:$0x7] }
  0x35   : > { %497 = vmatpush.msra.mxu3 %v692_v43  ;;  %421 = vmatpush.msra.mxu2 %v673_v45  ;;  %v216_v22 = vld [vmem:[%s856_s4 + $0x20] sm:$0xff]  ;;  %v378_v26 = vrot.slane %v217_v23, 2  ;;  %v455_v28 = vrot.slane %v217_v23, 3  ;;  %v301_v30 = vrot.slane %v217_v23, 1  ;;  %v218_v33 = vld [vmem:[%s856_s4 + $0x30] sm:$0xff] }
  0x36   : > { %343 = vmatpush.msra.mxu1 %v656_v44  ;;  %257 = vmatpush.msra.mxu0 %v234_v46  ;;  %v376_v20 = vsel %vm370_vm0, %v374_v14, %v375_v15  ;;  %v453_v21 = vsel %vm447_vm1, %v451_v16, %v452_v17  ;;  %v299_v24 = vsel %vm293_vm2, %v297_v18, %v298_v19  ;;  %v377_v25 = vrot.slane %v216_v22, 2  ;;  %v219_v34 = vld [vmem:[%s856_s4 + $0x38] sm:$0x7]  ;;  %v220_v44 = vld [vmem:[%s856_s4 + $0x40] sm:$0xff]  ;;  %v221_v45 = vld [vmem:[%s856_s4 + $0x48] sm:$0x7] }
  0x37   : > { %498 = vmatpush.msra.mxu3 %v691_v47  ;;  %422 = vmatpush.msra.mxu2 %v672_v50  ;;  %v454_v27 = vrot.slane %v216_v22, 3  ;;  %v300_v29 = vrot.slane %v216_v22, 1  ;;  %v380_v36 = vrot.slane %v218_v33, 2  ;;  %v381_v37 = vrot.slane %v219_v34, 2  ;;  %v223_v0 = vld [vmem:[#allocation2] sm:$0xff]  ;;  %v225_v18 = vld [vmem:[#allocation2 + $0x10] sm:$0xff] }
  0x38   : > { %344 = vmatpush.msra.mxu1 %v655_v48  ;;  %258 = vmatpush.msra.mxu0 %v233_v51  ;;  %v379_v31 = vsel %vm370_vm0, %v377_v25, %v378_v26  ;;  %v457_v38 = vrot.slane %v218_v33, 3  ;;  %v458_v39 = vrot.slane %v219_v34, 3  ;;  %v303_v40 = vrot.slane %v218_v33, 1 }
  0x39   : > { %499 = vmatpush.msra.mxu3 %v690_v53  ;;  %423 = vmatpush.msra.mxu2 %v671_v55  ;;  %v456_v32 = vsel %vm447_vm1, %v454_v27, %v455_v28  ;;  %v302_v35 = vsel %vm293_vm2, %v300_v29, %v301_v30  ;;  %v304_v41 = vrot.slane %v219_v34, 1  ;;  %v382_v42 = vsel %vm370_vm0, %v380_v36, %v381_v37  ;;  %v226_v27 = vld [vmem:[#allocation2 + $0x18] sm:$0xff] }
  0x3a   : > { %345 = vmatpush.msra.mxu1 %v654_v54  ;;  %259 = vmatpush.msra.mxu0 %v232_v56  ;;  %v459_v43 = vsel %vm447_vm1, %v457_v38, %v458_v39  ;;  %v383_v47 = vrot.slane %v220_v44, 2  ;;  %v384_v48 = vrot.slane %v221_v45, 2  ;;  %v461_v50 = vrot.slane %v221_v45, 3  ;;  %v222_v56 = vld [vmem:[#allocation2 + $0x8] sm:$0xff] }
  0x3b   : > { %500 = vmatpush.msra.mxu3 %v689_v57  ;;  %424 = vmatpush.msra.mxu2 %v670_v61  ;;  %v305_v46 = vsel %vm293_vm2, %v303_v40, %v304_v41  ;;  %v306_v51 = vrot.slane %v220_v44, 1  ;;  %v307_v52 = vrot.slane %v221_v45, 1 }
  0x3c   : > { %346 = vmatpush.msra.mxu1 %v653_v58  ;;  %260 = vmatpush.msra.mxu0 %v231_v62  ;;  %v385_v53 = vsel %vm370_vm0, %v383_v47, %v384_v48 }
  0x3d   : > { %501 = vmatpush.msra.mxu3 %v688_v1  ;;  %425 = vmatpush.msra.mxu2 %v669_v3  ;;  %v308_v55 = vsel %vm293_vm2, %v306_v51, %v307_v52 }
  0x3e   : > { %347 = vmatpush.msra.mxu1 %v652_v2  ;;  %261 = vmatpush.msra.mxu0 %v230_v4 }
  0x3f   : > { %426 = vmatmul.f32.vlgmr.msra.gmra.mxu2 %v373_v7  ;;  %502 = vmatpush.msra.mxu3 %v687_v8 }
  0x40   : > { %262 = vmatmul.f32.vlgmr.msra.gmra.mxu0 %v212_v49  ;;  %503 = vmatmul.f32.vlgmr.msra.gmra.mxu3 %v450_v9  ;;  %v460_v49 = vrot.slane %v220_v44, 3  ;;  %v224_v9 = vld [vmem:[#allocation2 + $0x20] sm:$0xff] }
  0x41   : > { %348 = vmatpush.msra.mxu1 %v651_v12 }
  0x42   : > { %349 = vmatmul.f32.vlgmr.msra.gmra.mxu1 %v296_v13  ;;  %v462_v54 = vsel %vm447_vm1, %v460_v49, %v461_v50 }
  0x47   : > { %429 = vmatmul.f32.gmra.mxu2 %v376_v20 }
  0x48   : > { %265 = vmatmul.f32.gmra.mxu0 %v214_v10  ;;  %506 = vmatmul.f32.gmra.mxu3 %v453_v21 }
  0x4a   : > { %352 = vmatmul.f32.gmra.mxu1 %v299_v24 }
  0x4f   : > { %432 = vmatmul.f32.gmra.mxu2 %v379_v31 }
  0x50   : > { %268 = vmatmul.f32.gmra.mxu0 %v216_v22  ;;  %509 = vmatmul.f32.gmra.mxu3 %v456_v32 }
  0x52   : > { %355 = vmatmul.f32.gmra.mxu1 %v302_v35 }
  0x57   : > { %435 = vmatmul.f32.gmra.mxu2 %v382_v42 }
  0x58   : > { %271 = vmatmul.f32.gmra.mxu0 %v218_v33  ;;  %512 = vmatmul.f32.gmra.mxu3 %v459_v43 }
  0x5a   : > { %358 = vmatmul.f32.gmra.mxu1 %v305_v46 }
  0x5f   : > { %438 = vmatmul.f32.gmra.mxu2 %v385_v53 }
  0x60   : > { %274 = vmatmul.f32.gmra.mxu0 %v220_v44  ;;  %515 = vmatmul.f32.gmra.mxu3 %v462_v54 }
  0x62   : > { %361 = vmatmul.f32.gmra.mxu1 %v308_v55 }
  0xbd   : > { %v263_v57 = vpop.f32.mrf.mxu0 }
  0xbe   : > { %v278_v58 = vadd.f32 %v263_v57, %v222_v56 }
  0xbf   : > { %v350_v59 = vpop.f32.mrf.mxu1 }
  0xc0   : > { %v365_v60 = vadd.f32 %v350_v59, %v278_v58 }
  0xc2   : > { %v427_v61 = vpop.f32.mrf.mxu2 }
  0xc3   : > { %v442_v62 = vadd.f32 %v427_v61, %v365_v60  ;;  %v504_v63 = vpop.f32.mrf.mxu3 }
  0xc5   : > { %v519_v1 = vadd.f32 %v504_v63, %v442_v62  ;;  %v266_v2 = vpop.f32.mrf.mxu0 }
  0xc6   : > { %v279_v3 = vadd.f32 %v266_v2, %v223_v0 }
  0xc7   : > { %524 = vst [vmem:[#allocation2 + $0x8] sm:$0xff] %v519_v1  ;;  %v353_v4 = vpop.f32.mrf.mxu1 }
  0xc8   : > { %v366_v5 = vadd.f32 %v353_v4, %v279_v3 }
  0xca   : > { %v430_v6 = vpop.f32.mrf.mxu2 }
  0xcb   : > { %v443_v7 = vadd.f32 %v430_v6, %v366_v5  ;;  %v507_v8 = vpop.f32.mrf.mxu3 }
  0xcd   : > { %v520_v10 = vadd.f32 %v507_v8, %v443_v7  ;;  %v269_v11 = vpop.f32.mrf.mxu0 }
  0xce   : > { %v280_v12 = vadd.f32 %v269_v11, %v224_v9 }
  0xcf   : > { %525 = vst [vmem:[#allocation2] sm:$0xff] %v520_v10  ;;  %v356_v13 = vpop.f32.mrf.mxu1 }
  0xd0   : > { %v367_v14 = vadd.f32 %v356_v13, %v280_v12 }
  0xd2   : > { %v433_v15 = vpop.f32.mrf.mxu2 }
  0xd3   : > { %v444_v16 = vadd.f32 %v433_v15, %v367_v14  ;;  %v510_v17 = vpop.f32.mrf.mxu3 }
  0xd5   : > { %v521_v19 = vadd.f32 %v510_v17, %v444_v16  ;;  %v272_v20 = vpop.f32.mrf.mxu0 }
  0xd6   : > { %v281_v21 = vadd.f32 %v272_v20, %v225_v18 }
  0xd7   : > { %526 = vst [vmem:[#allocation2 + $0x20] sm:$0xff] %v521_v19  ;;  %v359_v22 = vpop.f32.mrf.mxu1 }
  0xd8   : > { %v368_v23 = vadd.f32 %v359_v22, %v281_v21 }
  0xda   : > { %v436_v24 = vpop.f32.mrf.mxu2 }
  0xdb   : > { %v445_v25 = vadd.f32 %v436_v24, %v368_v23  ;;  %v513_v26 = vpop.f32.mrf.mxu3 }
  0xdd   : > { %v522_v28 = vadd.f32 %v513_v26, %v445_v25  ;;  %v275_v29 = vpop.f32.mrf.mxu0 }
  0xde   : > { %v282_v30 = vadd.f32 %v275_v29, %v226_v27 }
  0xdf   : > { %527 = vst [vmem:[#allocation2 + $0x10] sm:$0xff] %v522_v28  ;;  %v362_v31 = vpop.f32.mrf.mxu1 }
  0xe0   : > { %v369_v32 = vadd.f32 %v362_v31, %v282_v30 }
  0xe2   : > { %v439_v33 = vpop.f32.mrf.mxu2 }
  0xe3   : > { %v446_v34 = vadd.f32 %v439_v33, %v369_v32  ;;  %v516_v35 = vpop.f32.mrf.mxu3  ;;  %532 = sbr.rel (%p703_p8) target bundleno = 240 (0xf0), region = 40 }
  0xe5   : > { %v523_v36 = vadd.f32 %v516_v35, %v446_v34 }
  0xe7   : > { %528 = vst [vmem:[#allocation2 + $0x18] sm:$0xff] %v523_v36 }
  0xe8   : > { %v752_v37 = vld [vmem:[%s980_s2] ss:$0 sm:$0xff] }
  0xe9   : > { %v537_v38 = vadd.f32 %v752_v37, %v519_v1  ;;  %v538_v39 = vadd.f32 %v752_v37, %v520_v10  ;;  %v539_v40 = vadd.f32 %v752_v37, %v521_v19  ;;  %v540_v41 = vadd.f32 %v752_v37, %v522_v28 }
  0xea   : > { %v541_v42 = vadd.f32 %v752_v37, %v523_v36 }
  0xeb   : > { %542 = vst [vmem:[%s851_s27] sm:$0xff] %v537_v38 }
  0xec   : > { %543 = vst [vmem:[%s851_s27 + $0x8] sm:$0xff] %v538_v39 }
  0xed   : > { %544 = vst [vmem:[%s851_s27 + $0x10] sm:$0xff] %v539_v40 }
  0xee   : > { %545 = vst [vmem:[%s851_s27 + $0x18] sm:$0xff] %v540_v41 }
  0xef   : > { %546 = vst [vmem:[%s851_s27 + $0x20] sm:$0xff] %v541_v42 }
  0xf0 PF: > { %s13_s16 = sadd.s32 1, %s791_s16   ;;  %s982_s12 = smov %s783_s14 }
  0xf1   : > { %p10_p9 = scmp.ge.s32.totalorder %s13_s16, 10   ;;  %s983_s13 = smov %s787_s15 }
  0xf2   : > { %s984_s14 = smov %s987_s17  ;;  %s985_s15 = smov %s991_s18 }
  0xf3   :  { %12 = sbr.rel (!%p10_p9) target bundleno = 3 (0x3), region = 74 }

</bundles_post_ra>
